<compile_context>
chip_gen: v7x
topology: tpu7x:2x2x1
jax: 0.10.0
libtpu: 0.0.40
codegen_flags: <defaults>
</compile_context>

<pallas_src>
import jax
import jax.numpy as jnp
from jax.experimental import pallas as pl
from jax.experimental.pallas import tpu as pltpu

EMB_DIM = 100
NUM_CLASSES = 10
IMG_H = IMG_W = 28
LEAKY_SLOPE = 0.2


# ---------------------------------------------------------------------------
# Fused kernel: conv1 -> conv2 -> conv3 -> Linear(12544,1), one image / step.
#
# Layouts (one image per grid step):
#   h1 (conv1 out, 14x14x64) lives zero-padded on a 16x16 grid, split by the
#   parity of the padded column wp:  h1e[hp*8 + wq, :] = h1p[hp, 2*wq, :]
#                                    h1o[hp*8 + wq, :] = h1p[hp, 2*wq+1, :]
#   => conv2 tap (i,j) needs h1p[2oh+i, 2ow+j, :] which is a CONTIGUOUS
#      128-row window of h1{e,o} starting at 8*i + j//2, indexed by the fake
#      output row m = 16*oh + ow (garbage at ow>=7 / oh>=7, masked later).
#   h2 (conv2 out, 7x7x128) lives on the same 8x16 fake grid at rows
#   [24, 152) of a zeroed scratch => conv3 tap (i,j) is a contiguous 128-row
#   window starting at 7 + 16*i + j.
#   The FC weight is pre-scattered onto the fake grid with zeros at invalid
#   positions, so the epilogue is a plain elementwise product + reduction.
# ---------------------------------------------------------------------------
def _fused_kernel(pe_ref, po_ref, m1e_ref, m1o_ref, m2_ref,
                  w1_ref, b1_ref, w2_ref, b2_ref, w3_ref, b3_ref,
                  wfc_ref, bfc_ref, o_ref,
                  h1e_ref, h1o_ref, h2_ref):
    # ---- zero the scratch margins (cheap; every step => megacore-safe) -----
    h1e_ref[pl.ds(128, 32), :] = jnp.zeros((32, 64), jnp.bfloat16)
    h1o_ref[pl.ds(128, 32), :] = jnp.zeros((32, 64), jnp.bfloat16)
    h2_ref[pl.ds(0, 24), :] = jnp.zeros((24, 128), jnp.bfloat16)
    h2_ref[pl.ds(152, 24), :] = jnp.zeros((24, 128), jnp.bfloat16)

    # ---- conv1 (+ bias + LeakyReLU) on the padded 16x16 grid, parity-split -
    w1 = w1_ref[...]
    b1 = b1_ref[...]
    for p_ref, m_ref, h_ref in ((pe_ref, m1e_ref, h1e_ref),
                                (po_ref, m1o_ref, h1o_ref)):
        acc = jnp.dot(p_ref[0], w1, preferred_element_type=jnp.float32) + b1
        acc = jnp.where(acc > 0, acc, LEAKY_SLOPE * acc)
        acc = jnp.where(m_ref[...] > 0.5, acc, 0.0)      # zero the pad ring
        h_ref[pl.ds(0, 128), :] = acc.astype(jnp.bfloat16)

    # ---- conv2: 4x4 stride-2 as 16 shifted (128,64)x(64,128) matmuls -------
    acc2 = jnp.zeros((128, 128), jnp.float32)
    for i in range(4):
        for j in range(4):
            src = h1e_ref if (j % 2 == 0) else h1o_ref
            a = src[pl.ds(8 * i + j // 2, 128), :]
            acc2 = acc2 + jnp.dot(a, w2_ref[i * 4 + j],
                                  preferred_element_type=jnp.float32)
    acc2 = acc2 + b2_ref[...]
    acc2 = jnp.where(acc2 > 0, acc2, LEAKY_SLOPE * acc2)
    acc2 = jnp.where(m2_ref[...] > 0.5, acc2, 0.0)       # zero fake-grid junk
    h2_ref[pl.ds(24, 128), :] = acc2.astype(jnp.bfloat16)

    # ---- conv3: 3x3 stride-1 as 9 shifted (128,128)x(128,256) matmuls ------
    acc3 = jnp.zeros((128, 256), jnp.float32)
    for i in range(3):
        for j in range(3):
            a = h2_ref[pl.ds(7 + 16 * i + j, 128), :]
            acc3 = acc3 + jnp.dot(a, w3_ref[i * 3 + j],
                                  preferred_element_type=jnp.float32)
    acc3 = acc3 + b3_ref[...]
    h3 = jnp.where(acc3 > 0, acc3, LEAKY_SLOPE * acc3)   # (128,256) f32

    # ---- fused Linear(12544 -> 1): fc weight is zero at invalid fake rows --
    prod = h3 * wfc_ref[...]
    per_row = jnp.sum(prod, axis=1, keepdims=True)       # (128, 1)
    total = jnp.sum(per_row, axis=0, keepdims=True)      # (1, 1)
    # Lane-broadcast the scalar so the output store is a full 128-lane store.
    o_ref[0] = jnp.broadcast_to(total + bfc_ref[...], (1, 128))


# ---------------------------------------------------------------------------
# Full forward pass.
# ---------------------------------------------------------------------------
def cgan_cnn_discriminator(images, labels, params):
    """images: (B,1,28,28) f32 NCHW, labels: (B,) int32 -> (B,1) f32."""
    (emb_table, w_lbl, b_lbl,
     w_c1, b_c1, w_c2, b_c2, w_c3, b_c3, w_fc, b_fc) = params
    B = images.shape[0]

    # --- label branch (tiny: left to XLA per review) + channel concat -------
    emb = emb_table[labels].astype(jnp.float32)                    # (B,100)
    lbl = emb @ jnp.transpose(w_lbl) + b_lbl                       # (B,784)
    lbl_img = lbl.reshape(B, IMG_H, IMG_W, 1)
    img = jnp.transpose(images.astype(jnp.float32), (0, 2, 3, 1))  # NHWC
    x = jnp.concatenate([img, lbl_img], axis=-1)                   # (B,28,28,2)

    # --- conv1 im2col (small: 16 KB bf16 / image), on the padded 16x16 grid -
    xp = jnp.pad(x, ((0, 0), (1, 1), (1, 1), (0, 0)))              # (B,30,30,2)
    cols = []
    for i in range(4):
        for j in range(4):
            cols.append(xp[:, i:i + 27:2, j:j + 27:2, :])          # (B,14,14,2)
    patches = jnp.stack(cols, axis=3).reshape(B, 14, 14, 32)
    pgrid = jnp.pad(patches, ((0, 0), (1, 1), (1, 1), (0, 0)))     # (B,16,16,32)
    p_even = pgrid[:, :, 0::2, :].reshape(B, 128, 32).astype(jnp.bfloat16)
    p_odd = pgrid[:, :, 1::2, :].reshape(B, 128, 32).astype(jnp.bfloat16)

    # --- validity masks for the padded / fake grids (constant-folded) -------
    valid16 = jnp.pad(jnp.ones((14, 14), jnp.float32), ((1, 1), (1, 1)))
    m1_even = valid16[:, 0::2].reshape(128, 1)
    m1_odd = valid16[:, 1::2].reshape(128, 1)
    m2 = jnp.pad(jnp.ones((7, 7), jnp.float32), ((0, 1), (0, 9))).reshape(128, 1)

    # --- weight packing: bf16 for the MXU, biases / fc weight stay f32 ------
    w1m = jnp.transpose(w_c1, (2, 3, 1, 0)).reshape(32, 64).astype(jnp.bfloat16)
    w2s = jnp.transpose(w_c2, (2, 3, 1, 0)).reshape(16, 64, 128).astype(jnp.bfloat16)
    w3s = jnp.transpose(w_c3, (2, 3, 1, 0)).reshape(9, 128, 256).astype(jnp.bfloat16)
    # PyTorch flattens (c,h,w): scatter w_fc onto the (8x16) fake grid, rows
    # = 16*oh + ow, zeros at invalid positions (so garbage rows contribute 0).
    wfcf = jnp.pad(jnp.transpose(w_fc.reshape(256, 7, 7), (1, 2, 0)),
                   ((0, 1), (0, 9), (0, 0))).reshape(128, 256).astype(jnp.float32)
    b1m = b_c1.reshape(1, 64).astype(jnp.float32)
    b2m = b_c2.reshape(1, 128).astype(jnp.float32)
    b3m = b_c3.reshape(1, 256).astype(jnp.float32)
    bfcm = b_fc.reshape(1, 1).astype(jnp.float32)

    out3 = pl.pallas_call(
        _fused_kernel,
        out_shape=jax.ShapeDtypeStruct((B, 1, 128), jnp.float32),
        grid_spec=pltpu.PrefetchScalarGridSpec(
            num_scalar_prefetch=0,
            grid=(B,),
            in_specs=[
                pl.BlockSpec((1, 128, 32), lambda b: (b, 0, 0)),    # p_even
                pl.BlockSpec((1, 128, 32), lambda b: (b, 0, 0)),    # p_odd
                pl.BlockSpec((128, 1), lambda b: (0, 0)),           # mask1 even
                pl.BlockSpec((128, 1), lambda b: (0, 0)),           # mask1 odd
                pl.BlockSpec((128, 1), lambda b: (0, 0)),           # mask2
                pl.BlockSpec((32, 64), lambda b: (0, 0)),           # w1
                pl.BlockSpec((1, 64), lambda b: (0, 0)),            # b1
                pl.BlockSpec((16, 64, 128), lambda b: (0, 0, 0)),   # w2
                pl.BlockSpec((1, 128), lambda b: (0, 0)),           # b2
                pl.BlockSpec((9, 128, 256), lambda b: (0, 0, 0)),   # w3
                pl.BlockSpec((1, 256), lambda b: (0, 0)),           # b3
                pl.BlockSpec((128, 256), lambda b: (0, 0)),         # w_fc (fake grid)
                pl.BlockSpec((1, 1), lambda b: (0, 0)),             # b_fc
            ],
            out_specs=pl.BlockSpec((1, 1, 128), lambda b: (b, 0, 0)),
            scratch_shapes=[
                pltpu.VMEM((160, 64), jnp.bfloat16),    # h1 even columns
                pltpu.VMEM((160, 64), jnp.bfloat16),    # h1 odd columns
                pltpu.VMEM((176, 128), jnp.bfloat16),   # h2 on padded fake grid
            ],
        ),
        compiler_params=pltpu.CompilerParams(
            dimension_semantics=("parallel",)),
    )(p_even, p_odd, m1_even, m1_odd, m2,
      w1m, b1m, w2s, b2m, w3s, b3m, wfcf, bfcm)

    return out3[:, 0, :1]                                           # (B, 1)


# ---------------------------------------------------------------------------
# Pure-JAX f32 reference (PyTorch semantics) for a correctness sanity check.
# ---------------------------------------------------------------------------
def _reference_forward(images, labels, params):
    (emb_table, w_lbl, b_lbl,
     w_c1, b_c1, w_c2, b_c2, w_c3, b_c3, w_fc, b_fc) = params
    B = images.shape[0]
    emb = emb_table[labels].astype(jnp.float32)
    lbl = emb @ jnp.transpose(w_lbl) + b_lbl
    lbl_img = lbl.reshape(B, 1, IMG_H, IMG_W)
    x = jnp.concatenate([images.astype(jnp.float32), lbl_img], axis=1)

    def conv(z, w, b, stride, pad):
        y = jax.lax.conv_general_dilated(
            z, w, window_strides=(stride, stride),
            padding=((pad, pad), (pad, pad)),
            dimension_numbers=("NCHW", "OIHW", "NCHW"))
        return y + b.reshape(1, -1, 1, 1)

    def lrelu(z):
        return jnp.where(z > 0, z, LEAKY_SLOPE * z)

    h = lrelu(conv(x, w_c1, b_c1, 2, 1))
    h = lrelu(conv(h, w_c2, b_c2, 2, 1))
    h = lrelu(conv(h, w_c3, b_c3, 1, 1))
    feats = h.reshape(B, -1)
    return feats @ jnp.transpose(w_fc) + b_fc


# ---------------------------------------------------------------------------
# Parameter init (PyTorch-layout tensors; scaled small for numerical sanity).
# ---------------------------------------------------------------------------
def init_params(key, embedding_dim=EMB_DIM):
    ks = jax.random.split(key, 11)
    emb = jax.random.normal(ks[0], (NUM_CLASSES, embedding_dim), jnp.float32)
    w_lbl = jax.random.normal(ks[1], (IMG_H * IMG_W, embedding_dim), jnp.float32) * 0.05
    b_lbl = jax.random.normal(ks[2], (IMG_H * IMG_W,), jnp.float32) * 0.05
    w_c1 = jax.random.normal(ks[3], (64, 2, 4, 4), jnp.float32) * 0.10
    b_c1 = jax.random.normal(ks[4], (64,), jnp.float32) * 0.10
    w_c2 = jax.random.normal(ks[5], (128, 64, 4, 4), jnp.float32) * 0.03
    b_c2 = jax.random.normal(ks[6], (128,), jnp.float32) * 0.03
    w_c3 = jax.random.normal(ks[7], (256, 128, 3, 3), jnp.float32) * 0.03
    b_c3 = jax.random.normal(ks[8], (256,), jnp.float32) * 0.03
    w_fc = jax.random.normal(ks[9], (1, 256 * 7 * 7), jnp.float32) * 0.01
    b_fc = jax.random.normal(ks[10], (1,), jnp.float32) * 0.01
    return (emb, w_lbl, b_lbl, w_c1, b_c1, w_c2, b_c2, w_c3, b_c3, w_fc, b_fc)


if __name__ == "__main__":
    key = jax.random.PRNGKey(0)
    k_img, k_lbl, k_par = jax.random.split(key, 3)

    B = 4
    images = jax.random.normal(k_img, (B, 1, IMG_H, IMG_W), jnp.float32)
    labels = jax.random.randint(k_lbl, (B,), 0, NUM_CLASSES, jnp.int32)
    params = init_params(k_par)

    out = jax.jit(cgan_cnn_discriminator)(images, labels, params)
    jax.block_until_ready(out)
    assert out.shape == (B, 1) and out.dtype == jnp.float32

    ref = _reference_forward(images, labels, params)
    max_err = float(jnp.max(jnp.abs(out - ref)))
    assert max_err < 5e-2, f"mismatch vs f32 reference: {max_err}"
    print("KERNEL_OK")
</pallas_src>

<mosaic_0001>
module attributes {stable_mosaic.version = 11 : i64} {
  func.func @_fused_kernel(%arg0: i32, %arg1: memref<1x128x32xbf16, #tpu.memory_space<vmem>>, %arg2: memref<1x128x32xbf16, #tpu.memory_space<vmem>>, %arg3: memref<128x1xf32, #tpu.memory_space<vmem>>, %arg4: memref<128x1xf32, #tpu.memory_space<vmem>>, %arg5: memref<128x1xf32, #tpu.memory_space<vmem>>, %arg6: memref<32x64xbf16, #tpu.memory_space<vmem>>, %arg7: memref<1x64xf32, #tpu.memory_space<vmem>>, %arg8: memref<16x64x128xbf16, #tpu.memory_space<vmem>>, %arg9: memref<1x128xf32, #tpu.memory_space<vmem>>, %arg10: memref<9x128x256xbf16, #tpu.memory_space<vmem>>, %arg11: memref<1x256xf32, #tpu.memory_space<vmem>>, %arg12: memref<128x256xf32, #tpu.memory_space<vmem>>, %arg13: memref<1x1xf32, #tpu.memory_space<vmem>>, %arg14: memref<1x1x128xf32, #tpu.memory_space<vmem>>, %arg15: memref<160x64xbf16, #tpu.memory_space<vmem>>, %arg16: memref<160x64xbf16, #tpu.memory_space<vmem>>, %arg17: memref<176x128xbf16, #tpu.memory_space<vmem>>) attributes {dimension_semantics = [#tpu.dimension_semantics<parallel>], iteration_bounds = array<i64: 4>, scalar_prefetch = 0 : i64, scratch_operands = 3 : i64, tpu.core_type = #tpu.core_type<tc>, window_params = [{transform_indices = @transform_0, window_bounds = array<i64: 1, 128, 32>}, {transform_indices = @transform_1, window_bounds = array<i64: 1, 128, 32>}, {pipeline_mode = #tpu.pipeline_mode<synchronous>, transform_indices = @transform_2, window_bounds = array<i64: 128, 1>}, {pipeline_mode = #tpu.pipeline_mode<synchronous>, transform_indices = @transform_3, window_bounds = array<i64: 128, 1>}, {pipeline_mode = #tpu.pipeline_mode<synchronous>, transform_indices = @transform_4, window_bounds = array<i64: 128, 1>}, {pipeline_mode = #tpu.pipeline_mode<synchronous>, transform_indices = @transform_5, window_bounds = array<i64: 32, 64>}, {pipeline_mode = #tpu.pipeline_mode<synchronous>, transform_indices = @transform_6, window_bounds = array<i64: 1, 64>}, {pipeline_mode = #tpu.pipeline_mode<synchronous>, transform_indices = @transform_7, window_bounds = array<i64: 16, 64, 128>}, {pipeline_mode = #tpu.pipeline_mode<synchronous>, transform_indices = @transform_8, window_bounds = array<i64: 1, 128>}, {pipeline_mode = #tpu.pipeline_mode<synchronous>, transform_indices = @transform_9, window_bounds = array<i64: 9, 128, 256>}, {pipeline_mode = #tpu.pipeline_mode<synchronous>, transform_indices = @transform_10, window_bounds = array<i64: 1, 256>}, {pipeline_mode = #tpu.pipeline_mode<synchronous>, transform_indices = @transform_11, window_bounds = array<i64: 128, 256>}, {pipeline_mode = #tpu.pipeline_mode<synchronous>, transform_indices = @transform_12, window_bounds = array<i64: 1, 1>}, {transform_indices = @transform_13, window_bounds = array<i64: 1, 1, 128>}]} {
    %cst = arith.constant 0.000000e+00 : bf16
    %0 = vector.broadcast %cst : bf16 to vector<32x64xbf16>
    %c128 = arith.constant 128 : index
    %c0 = arith.constant 0 : index
    %1 = vector.load %arg15[%c128, %c0] : memref<160x64xbf16, #tpu.memory_space<vmem>>, vector<32x64xbf16>
    tpu.vector_store %arg15[%c128, %c0], %0 {strides = array<i32>} : memref<160x64xbf16, #tpu.memory_space<vmem>>, vector<32x64xbf16>,
    %cst_0 = arith.constant 0.000000e+00 : bf16
    %2 = vector.broadcast %cst_0 : bf16 to vector<32x64xbf16>
    %c128_1 = arith.constant 128 : index
    %c0_2 = arith.constant 0 : index
    %3 = vector.load %arg16[%c128_1, %c0_2] : memref<160x64xbf16, #tpu.memory_space<vmem>>, vector<32x64xbf16>
    tpu.vector_store %arg16[%c128_1, %c0_2], %2 {strides = array<i32>} : memref<160x64xbf16, #tpu.memory_space<vmem>>, vector<32x64xbf16>,
    %cst_3 = arith.constant 0.000000e+00 : bf16
    %4 = vector.broadcast %cst_3 : bf16 to vector<24x128xbf16>
    %c0_4 = arith.constant 0 : index
    %c0_5 = arith.constant 0 : index
    %5 = vector.load %arg17[%c0_4, %c0_5] : memref<176x128xbf16, #tpu.memory_space<vmem>>, vector<24x128xbf16>
    tpu.vector_store %arg17[%c0_4, %c0_5], %4 {strides = array<i32>} : memref<176x128xbf16, #tpu.memory_space<vmem>>, vector<24x128xbf16>,
    %cst_6 = arith.constant 0.000000e+00 : bf16
    %6 = vector.broadcast %cst_6 : bf16 to vector<24x128xbf16>
    %c152 = arith.constant 152 : index
    %c0_7 = arith.constant 0 : index
    %7 = vector.load %arg17[%c152, %c0_7] : memref<176x128xbf16, #tpu.memory_space<vmem>>, vector<24x128xbf16>
    tpu.vector_store %arg17[%c152, %c0_7], %6 {strides = array<i32>} : memref<176x128xbf16, #tpu.memory_space<vmem>>, vector<24x128xbf16>,
    %c0_8 = arith.constant 0 : index
    %c0_9 = arith.constant 0 : index
    %8 = vector.load %arg6[%c0_8, %c0_9] : memref<32x64xbf16, #tpu.memory_space<vmem>>, vector<32x64xbf16>
    %c0_10 = arith.constant 0 : index
    %c0_11 = arith.constant 0 : index
    %9 = vector.load %arg7[%c0_10, %c0_11] : memref<1x64xf32, #tpu.memory_space<vmem>>, vector<1x64xf32>
    %c0_12 = arith.constant 0 : index
    %c0_13 = arith.constant 0 : index
    %c0_14 = arith.constant 0 : index
    %10 = vector.load %arg1[%c0_12, %c0_13, %c0_14] : memref<1x128x32xbf16, #tpu.memory_space<vmem>>, vector<1x128x32xbf16>
    %11 = vector.shape_cast %10 : vector<1x128x32xbf16> to vector<128x32xbf16>
    %cst_15 = arith.constant dense<0.000000e+00> : vector<128x64xf32>
    %12 = tpu.matmul %11, %8, %cst_15 {dimension_numbers = #tpu.dot_dimension_numbers<[1], [0], [0], [1], [0, 0, 1, 1], [], []>} : vector<128x32xbf16>, vector<32x64xbf16>, vector<128x64xf32> -> vector<128x64xf32>
    %13 = vector.broadcast %9 : vector<1x64xf32> to vector<128x64xf32>
    %14 = arith.addf %12, %13 : vector<128x64xf32>
    %cst_16 = arith.constant 0.000000e+00 : f32
    %15 = vector.broadcast %cst_16 : f32 to vector<128x64xf32>
    %16 = arith.cmpf ogt, %14, %15 : vector<128x64xf32>
    %cst_17 = arith.constant 2.000000e-01 : f32
    %17 = vector.broadcast %cst_17 : f32 to vector<128x64xf32>
    %18 = arith.mulf %17, %14 : vector<128x64xf32>
    %19 = arith.select %16, %14, %18 : vector<128x64xi1>, vector<128x64xf32>
    %c0_18 = arith.constant 0 : index
    %c0_19 = arith.constant 0 : index
    %20 = vector.load %arg3[%c0_18, %c0_19] : memref<128x1xf32, #tpu.memory_space<vmem>>, vector<128x1xf32>
    %cst_20 = arith.constant 5.000000e-01 : f32
    %21 = vector.broadcast %cst_20 : f32 to vector<128x1xf32>
    %22 = arith.cmpf ogt, %20, %21 : vector<128x1xf32>
    %cst_21 = arith.constant 0.000000e+00 : f32
    %23 = vector.shape_cast %22 : vector<128x1xi1> to vector<128x1xi1>
    %24 = vector.broadcast %23 : vector<128x1xi1> to vector<128x64xi1>
    %25 = vector.broadcast %cst_21 : f32 to vector<128x64xf32>
    %26 = arith.select %24, %19, %25 : vector<128x64xi1>, vector<128x64xf32>
    %27 = arith.truncf %26 : vector<128x64xf32> to vector<128x64xbf16>
    %c0_22 = arith.constant 0 : index
    %c0_23 = arith.constant 0 : index
    %28 = vector.load %arg15[%c0_22, %c0_23] : memref<160x64xbf16, #tpu.memory_space<vmem>>, vector<128x64xbf16>
    tpu.vector_store %arg15[%c0_22, %c0_23], %27 {strides = array<i32>} : memref<160x64xbf16, #tpu.memory_space<vmem>>, vector<128x64xbf16>,
    %c0_24 = arith.constant 0 : index
    %c0_25 = arith.constant 0 : index
    %c0_26 = arith.constant 0 : index
    %29 = vector.load %arg2[%c0_24, %c0_25, %c0_26] : memref<1x128x32xbf16, #tpu.memory_space<vmem>>, vector<1x128x32xbf16>
    %30 = vector.shape_cast %29 : vector<1x128x32xbf16> to vector<128x32xbf16>
    %cst_27 = arith.constant dense<0.000000e+00> : vector<128x64xf32>
    %31 = tpu.matmul %30, %8, %cst_27 {dimension_numbers = #tpu.dot_dimension_numbers<[1], [0], [0], [1], [0, 0, 1, 1], [], []>} : vector<128x32xbf16>, vector<32x64xbf16>, vector<128x64xf32> -> vector<128x64xf32>
    %32 = vector.broadcast %9 : vector<1x64xf32> to vector<128x64xf32>
    %33 = arith.addf %31, %32 : vector<128x64xf32>
    %cst_28 = arith.constant 0.000000e+00 : f32
    %34 = vector.broadcast %cst_28 : f32 to vector<128x64xf32>
    %35 = arith.cmpf ogt, %33, %34 : vector<128x64xf32>
    %cst_29 = arith.constant 2.000000e-01 : f32
    %36 = vector.broadcast %cst_29 : f32 to vector<128x64xf32>
    %37 = arith.mulf %36, %33 : vector<128x64xf32>
    %38 = arith.select %35, %33, %37 : vector<128x64xi1>, vector<128x64xf32>
    %c0_30 = arith.constant 0 : index
    %c0_31 = arith.constant 0 : index
    %39 = vector.load %arg4[%c0_30, %c0_31] : memref<128x1xf32, #tpu.memory_space<vmem>>, vector<128x1xf32>
    %cst_32 = arith.constant 5.000000e-01 : f32
    %40 = vector.broadcast %cst_32 : f32 to vector<128x1xf32>
    %41 = arith.cmpf ogt, %39, %40 : vector<128x1xf32>
    %cst_33 = arith.constant 0.000000e+00 : f32
    %42 = vector.shape_cast %41 : vector<128x1xi1> to vector<128x1xi1>
    %43 = vector.broadcast %42 : vector<128x1xi1> to vector<128x64xi1>
    %44 = vector.broadcast %cst_33 : f32 to vector<128x64xf32>
    %45 = arith.select %43, %38, %44 : vector<128x64xi1>, vector<128x64xf32>
    %46 = arith.truncf %45 : vector<128x64xf32> to vector<128x64xbf16>
    %c0_34 = arith.constant 0 : index
    %c0_35 = arith.constant 0 : index
    %47 = vector.load %arg16[%c0_34, %c0_35] : memref<160x64xbf16, #tpu.memory_space<vmem>>, vector<128x64xbf16>
    tpu.vector_store %arg16[%c0_34, %c0_35], %46 {strides = array<i32>} : memref<160x64xbf16, #tpu.memory_space<vmem>>, vector<128x64xbf16>,
    %cst_36 = arith.constant 0.000000e+00 : f32
    %48 = vector.broadcast %cst_36 : f32 to vector<128x128xf32>
    %c0_37 = arith.constant 0 : index
    %c0_38 = arith.constant 0 : index
    %49 = vector.load %arg15[%c0_37, %c0_38] : memref<160x64xbf16, #tpu.memory_space<vmem>>, vector<128x64xbf16>
    %c0_39 = arith.constant 0 : index
    %c0_40 = arith.constant 0 : index
    %c0_41 = arith.constant 0 : index
    %50 = vector.load %arg8[%c0_39, %c0_40, %c0_41] : memref<16x64x128xbf16, #tpu.memory_space<vmem>>, vector<1x64x128xbf16>
    %51 = vector.shape_cast %50 : vector<1x64x128xbf16> to vector<64x128xbf16>
    %cst_42 = arith.constant dense<0.000000e+00> : vector<128x128xf32>
    %52 = tpu.matmul %49, %51, %cst_42 {dimension_numbers = #tpu.dot_dimension_numbers<[1], [0], [0], [1], [0, 0, 1, 1], [], []>} : vector<128x64xbf16>, vector<64x128xbf16>, vector<128x128xf32> -> vector<128x128xf32>
    %53 = arith.addf %48, %52 : vector<128x128xf32>
    %c0_43 = arith.constant 0 : index
    %c0_44 = arith.constant 0 : index
    %54 = vector.load %arg16[%c0_43, %c0_44] : memref<160x64xbf16, #tpu.memory_space<vmem>>, vector<128x64xbf16>
    %c1 = arith.constant 1 : index
    %c0_45 = arith.constant 0 : index
    %c0_46 = arith.constant 0 : index
    %55 = vector.load %arg8[%c1, %c0_45, %c0_46] : memref<16x64x128xbf16, #tpu.memory_space<vmem>>, vector<1x64x128xbf16>
    %56 = vector.shape_cast %55 : vector<1x64x128xbf16> to vector<64x128xbf16>
    %cst_47 = arith.constant dense<0.000000e+00> : vector<128x128xf32>
    %57 = tpu.matmul %54, %56, %cst_47 {dimension_numbers = #tpu.dot_dimension_numbers<[1], [0], [0], [1], [0, 0, 1, 1], [], []>} : vector<128x64xbf16>, vector<64x128xbf16>, vector<128x128xf32> -> vector<128x128xf32>
    %58 = arith.addf %53, %57 : vector<128x128xf32>
    %c1_48 = arith.constant 1 : index
    %c0_49 = arith.constant 0 : index
    %59 = vector.load %arg15[%c1_48, %c0_49] : memref<160x64xbf16, #tpu.memory_space<vmem>>, vector<128x64xbf16>
    %c2 = arith.constant 2 : index
    %c0_50 = arith.constant 0 : index
    %c0_51 = arith.constant 0 : index
    %60 = vector.load %arg8[%c2, %c0_50, %c0_51] : memref<16x64x128xbf16, #tpu.memory_space<vmem>>, vector<1x64x128xbf16>
    %61 = vector.shape_cast %60 : vector<1x64x128xbf16> to vector<64x128xbf16>
    %cst_52 = arith.constant dense<0.000000e+00> : vector<128x128xf32>
    %62 = tpu.matmul %59, %61, %cst_52 {dimension_numbers = #tpu.dot_dimension_numbers<[1], [0], [0], [1], [0, 0, 1, 1], [], []>} : vector<128x64xbf16>, vector<64x128xbf16>, vector<128x128xf32> -> vector<128x128xf32>
    %63 = arith.addf %58, %62 : vector<128x128xf32>
    %c1_53 = arith.constant 1 : index
    %c0_54 = arith.constant 0 : index
    %64 = vector.load %arg16[%c1_53, %c0_54] : memref<160x64xbf16, #tpu.memory_space<vmem>>, vector<128x64xbf16>
    %c3 = arith.constant 3 : index
    %c0_55 = arith.constant 0 : index
    %c0_56 = arith.constant 0 : index
    %65 = vector.load %arg8[%c3, %c0_55, %c0_56] : memref<16x64x128xbf16, #tpu.memory_space<vmem>>, vector<1x64x128xbf16>
    %66 = vector.shape_cast %65 : vector<1x64x128xbf16> to vector<64x128xbf16>
    %cst_57 = arith.constant dense<0.000000e+00> : vector<128x128xf32>
    %67 = tpu.matmul %64, %66, %cst_57 {dimension_numbers = #tpu.dot_dimension_numbers<[1], [0], [0], [1], [0, 0, 1, 1], [], []>} : vector<128x64xbf16>, vector<64x128xbf16>, vector<128x128xf32> -> vector<128x128xf32>
    %68 = arith.addf %63, %67 : vector<128x128xf32>
    %c8 = arith.constant 8 : index
    %c0_58 = arith.constant 0 : index
    %69 = vector.load %arg15[%c8, %c0_58] : memref<160x64xbf16, #tpu.memory_space<vmem>>, vector<128x64xbf16>
    %c4 = arith.constant 4 : index
    %c0_59 = arith.constant 0 : index
    %c0_60 = arith.constant 0 : index
    %70 = vector.load %arg8[%c4, %c0_59, %c0_60] : memref<16x64x128xbf16, #tpu.memory_space<vmem>>, vector<1x64x128xbf16>
    %71 = vector.shape_cast %70 : vector<1x64x128xbf16> to vector<64x128xbf16>
    %cst_61 = arith.constant dense<0.000000e+00> : vector<128x128xf32>
    %72 = tpu.matmul %69, %71, %cst_61 {dimension_numbers = #tpu.dot_dimension_numbers<[1], [0], [0], [1], [0, 0, 1, 1], [], []>} : vector<128x64xbf16>, vector<64x128xbf16>, vector<128x128xf32> -> vector<128x128xf32>
    %73 = arith.addf %68, %72 : vector<128x128xf32>
    %c8_62 = arith.constant 8 : index
    %c0_63 = arith.constant 0 : index
    %74 = vector.load %arg16[%c8_62, %c0_63] : memref<160x64xbf16, #tpu.memory_space<vmem>>, vector<128x64xbf16>
    %c5 = arith.constant 5 : index
    %c0_64 = arith.constant 0 : index
    %c0_65 = arith.constant 0 : index
    %75 = vector.load %arg8[%c5, %c0_64, %c0_65] : memref<16x64x128xbf16, #tpu.memory_space<vmem>>, vector<1x64x128xbf16>
    %76 = vector.shape_cast %75 : vector<1x64x128xbf16> to vector<64x128xbf16>
    %cst_66 = arith.constant dense<0.000000e+00> : vector<128x128xf32>
    %77 = tpu.matmul %74, %76, %cst_66 {dimension_numbers = #tpu.dot_dimension_numbers<[1], [0], [0], [1], [0, 0, 1, 1], [], []>} : vector<128x64xbf16>, vector<64x128xbf16>, vector<128x128xf32> -> vector<128x128xf32>
    %78 = arith.addf %73, %77 : vector<128x128xf32>
    %c9 = arith.constant 9 : index
    %c0_67 = arith.constant 0 : index
    %79 = vector.load %arg15[%c9, %c0_67] : memref<160x64xbf16, #tpu.memory_space<vmem>>, vector<128x64xbf16>
    %c6 = arith.constant 6 : index
    %c0_68 = arith.constant 0 : index
    %c0_69 = arith.constant 0 : index
    %80 = vector.load %arg8[%c6, %c0_68, %c0_69] : memref<16x64x128xbf16, #tpu.memory_space<vmem>>, vector<1x64x128xbf16>
    %81 = vector.shape_cast %80 : vector<1x64x128xbf16> to vector<64x128xbf16>
    %cst_70 = arith.constant dense<0.000000e+00> : vector<128x128xf32>
    %82 = tpu.matmul %79, %81, %cst_70 {dimension_numbers = #tpu.dot_dimension_numbers<[1], [0], [0], [1], [0, 0, 1, 1], [], []>} : vector<128x64xbf16>, vector<64x128xbf16>, vector<128x128xf32> -> vector<128x128xf32>
    %83 = arith.addf %78, %82 : vector<128x128xf32>
    %c9_71 = arith.constant 9 : index
    %c0_72 = arith.constant 0 : index
    %84 = vector.load %arg16[%c9_71, %c0_72] : memref<160x64xbf16, #tpu.memory_space<vmem>>, vector<128x64xbf16>
    %c7 = arith.constant 7 : index
    %c0_73 = arith.constant 0 : index
    %c0_74 = arith.constant 0 : index
    %85 = vector.load %arg8[%c7, %c0_73, %c0_74] : memref<16x64x128xbf16, #tpu.memory_space<vmem>>, vector<1x64x128xbf16>
    %86 = vector.shape_cast %85 : vector<1x64x128xbf16> to vector<64x128xbf16>
    %cst_75 = arith.constant dense<0.000000e+00> : vector<128x128xf32>
    %87 = tpu.matmul %84, %86, %cst_75 {dimension_numbers = #tpu.dot_dimension_numbers<[1], [0], [0], [1], [0, 0, 1, 1], [], []>} : vector<128x64xbf16>, vector<64x128xbf16>, vector<128x128xf32> -> vector<128x128xf32>
    %88 = arith.addf %83, %87 : vector<128x128xf32>
    %c16 = arith.constant 16 : index
    %c0_76 = arith.constant 0 : index
    %89 = vector.load %arg15[%c16, %c0_76] : memref<160x64xbf16, #tpu.memory_space<vmem>>, vector<128x64xbf16>
    %c8_77 = arith.constant 8 : index
    %c0_78 = arith.constant 0 : index
    %c0_79 = arith.constant 0 : index
    %90 = vector.load %arg8[%c8_77, %c0_78, %c0_79] : memref<16x64x128xbf16, #tpu.memory_space<vmem>>, vector<1x64x128xbf16>
    %91 = vector.shape_cast %90 : vector<1x64x128xbf16> to vector<64x128xbf16>
    %cst_80 = arith.constant dense<0.000000e+00> : vector<128x128xf32>
    %92 = tpu.matmul %89, %91, %cst_80 {dimension_numbers = #tpu.dot_dimension_numbers<[1], [0], [0], [1], [0, 0, 1, 1], [], []>} : vector<128x64xbf16>, vector<64x128xbf16>, vector<128x128xf32> -> vector<128x128xf32>
    %93 = arith.addf %88, %92 : vector<128x128xf32>
    %c16_81 = arith.constant 16 : index
    %c0_82 = arith.constant 0 : index
    %94 = vector.load %arg16[%c16_81, %c0_82] : memref<160x64xbf16, #tpu.memory_space<vmem>>, vector<128x64xbf16>
    %c9_83 = arith.constant 9 : index
    %c0_84 = arith.constant 0 : index
    %c0_85 = arith.constant 0 : index
    %95 = vector.load %arg8[%c9_83, %c0_84, %c0_85] : memref<16x64x128xbf16, #tpu.memory_space<vmem>>, vector<1x64x128xbf16>
    %96 = vector.shape_cast %95 : vector<1x64x128xbf16> to vector<64x128xbf16>
    %cst_86 = arith.constant dense<0.000000e+00> : vector<128x128xf32>
    %97 = tpu.matmul %94, %96, %cst_86 {dimension_numbers = #tpu.dot_dimension_numbers<[1], [0], [0], [1], [0, 0, 1, 1], [], []>} : vector<128x64xbf16>, vector<64x128xbf16>, vector<128x128xf32> -> vector<128x128xf32>
    %98 = arith.addf %93, %97 : vector<128x128xf32>
    %c17 = arith.constant 17 : index
    %c0_87 = arith.constant 0 : index
    %99 = vector.load %arg15[%c17, %c0_87] : memref<160x64xbf16, #tpu.memory_space<vmem>>, vector<128x64xbf16>
    %c10 = arith.constant 10 : index
    %c0_88 = arith.constant 0 : index
    %c0_89 = arith.constant 0 : index
    %100 = vector.load %arg8[%c10, %c0_88, %c0_89] : memref<16x64x128xbf16, #tpu.memory_space<vmem>>, vector<1x64x128xbf16>
    %101 = vector.shape_cast %100 : vector<1x64x128xbf16> to vector<64x128xbf16>
    %cst_90 = arith.constant dense<0.000000e+00> : vector<128x128xf32>
    %102 = tpu.matmul %99, %101, %cst_90 {dimension_numbers = #tpu.dot_dimension_numbers<[1], [0], [0], [1], [0, 0, 1, 1], [], []>} : vector<128x64xbf16>, vector<64x128xbf16>, vector<128x128xf32> -> vector<128x128xf32>
    %103 = arith.addf %98, %102 : vector<128x128xf32>
    %c17_91 = arith.constant 17 : index
    %c0_92 = arith.constant 0 : index
    %104 = vector.load %arg16[%c17_91, %c0_92] : memref<160x64xbf16, #tpu.memory_space<vmem>>, vector<128x64xbf16>
    %c11 = arith.constant 11 : index
    %c0_93 = arith.constant 0 : index
    %c0_94 = arith.constant 0 : index
    %105 = vector.load %arg8[%c11, %c0_93, %c0_94] : memref<16x64x128xbf16, #tpu.memory_space<vmem>>, vector<1x64x128xbf16>
    %106 = vector.shape_cast %105 : vector<1x64x128xbf16> to vector<64x128xbf16>
    %cst_95 = arith.constant dense<0.000000e+00> : vector<128x128xf32>
    %107 = tpu.matmul %104, %106, %cst_95 {dimension_numbers = #tpu.dot_dimension_numbers<[1], [0], [0], [1], [0, 0, 1, 1], [], []>} : vector<128x64xbf16>, vector<64x128xbf16>, vector<128x128xf32> -> vector<128x128xf32>
    %108 = arith.addf %103, %107 : vector<128x128xf32>
    %c24 = arith.constant 24 : index
    %c0_96 = arith.constant 0 : index
    %109 = vector.load %arg15[%c24, %c0_96] : memref<160x64xbf16, #tpu.memory_space<vmem>>, vector<128x64xbf16>
    %c12 = arith.constant 12 : index
    %c0_97 = arith.constant 0 : index
    %c0_98 = arith.constant 0 : index
    %110 = vector.load %arg8[%c12, %c0_97, %c0_98] : memref<16x64x128xbf16, #tpu.memory_space<vmem>>, vector<1x64x128xbf16>
    %111 = vector.shape_cast %110 : vector<1x64x128xbf16> to vector<64x128xbf16>
    %cst_99 = arith.constant dense<0.000000e+00> : vector<128x128xf32>
    %112 = tpu.matmul %109, %111, %cst_99 {dimension_numbers = #tpu.dot_dimension_numbers<[1], [0], [0], [1], [0, 0, 1, 1], [], []>} : vector<128x64xbf16>, vector<64x128xbf16>, vector<128x128xf32> -> vector<128x128xf32>
    %113 = arith.addf %108, %112 : vector<128x128xf32>
    %c24_100 = arith.constant 24 : index
    %c0_101 = arith.constant 0 : index
    %114 = vector.load %arg16[%c24_100, %c0_101] : memref<160x64xbf16, #tpu.memory_space<vmem>>, vector<128x64xbf16>
    %c13 = arith.constant 13 : index
    %c0_102 = arith.constant 0 : index
    %c0_103 = arith.constant 0 : index
    %115 = vector.load %arg8[%c13, %c0_102, %c0_103] : memref<16x64x128xbf16, #tpu.memory_space<vmem>>, vector<1x64x128xbf16>
    %116 = vector.shape_cast %115 : vector<1x64x128xbf16> to vector<64x128xbf16>
    %cst_104 = arith.constant dense<0.000000e+00> : vector<128x128xf32>
    %117 = tpu.matmul %114, %116, %cst_104 {dimension_numbers = #tpu.dot_dimension_numbers<[1], [0], [0], [1], [0, 0, 1, 1], [], []>} : vector<128x64xbf16>, vector<64x128xbf16>, vector<128x128xf32> -> vector<128x128xf32>
    %118 = arith.addf %113, %117 : vector<128x128xf32>
    %c25 = arith.constant 25 : index
    %c0_105 = arith.constant 0 : index
    %119 = vector.load %arg15[%c25, %c0_105] : memref<160x64xbf16, #tpu.memory_space<vmem>>, vector<128x64xbf16>
    %c14 = arith.constant 14 : index
    %c0_106 = arith.constant 0 : index
    %c0_107 = arith.constant 0 : index
    %120 = vector.load %arg8[%c14, %c0_106, %c0_107] : memref<16x64x128xbf16, #tpu.memory_space<vmem>>, vector<1x64x128xbf16>
    %121 = vector.shape_cast %120 : vector<1x64x128xbf16> to vector<64x128xbf16>
    %cst_108 = arith.constant dense<0.000000e+00> : vector<128x128xf32>
    %122 = tpu.matmul %119, %121, %cst_108 {dimension_numbers = #tpu.dot_dimension_numbers<[1], [0], [0], [1], [0, 0, 1, 1], [], []>} : vector<128x64xbf16>, vector<64x128xbf16>, vector<128x128xf32> -> vector<128x128xf32>
    %123 = arith.addf %118, %122 : vector<128x128xf32>
    %c25_109 = arith.constant 25 : index
    %c0_110 = arith.constant 0 : index
    %124 = vector.load %arg16[%c25_109, %c0_110] : memref<160x64xbf16, #tpu.memory_space<vmem>>, vector<128x64xbf16>
    %c15 = arith.constant 15 : index
    %c0_111 = arith.constant 0 : index
    %c0_112 = arith.constant 0 : index
    %125 = vector.load %arg8[%c15, %c0_111, %c0_112] : memref<16x64x128xbf16, #tpu.memory_space<vmem>>, vector<1x64x128xbf16>
    %126 = vector.shape_cast %125 : vector<1x64x128xbf16> to vector<64x128xbf16>
    %cst_113 = arith.constant dense<0.000000e+00> : vector<128x128xf32>
    %127 = tpu.matmul %124, %126, %cst_113 {dimension_numbers = #tpu.dot_dimension_numbers<[1], [0], [0], [1], [0, 0, 1, 1], [], []>} : vector<128x64xbf16>, vector<64x128xbf16>, vector<128x128xf32> -> vector<128x128xf32>
    %128 = arith.addf %123, %127 : vector<128x128xf32>
    %c0_114 = arith.constant 0 : index
    %c0_115 = arith.constant 0 : index
    %129 = vector.load %arg9[%c0_114, %c0_115] : memref<1x128xf32, #tpu.memory_space<vmem>>, vector<1x128xf32>
    %130 = vector.broadcast %129 : vector<1x128xf32> to vector<128x128xf32>
    %131 = arith.addf %128, %130 : vector<128x128xf32>
    %cst_116 = arith.constant 0.000000e+00 : f32
    %132 = vector.broadcast %cst_116 : f32 to vector<128x128xf32>
    %133 = arith.cmpf ogt, %131, %132 : vector<128x128xf32>
    %cst_117 = arith.constant 2.000000e-01 : f32
    %134 = vector.broadcast %cst_117 : f32 to vector<128x128xf32>
    %135 = arith.mulf %134, %131 : vector<128x128xf32>
    %136 = arith.select %133, %131, %135 : vector<128x128xi1>, vector<128x128xf32>
    %c0_118 = arith.constant 0 : index
    %c0_119 = arith.constant 0 : index
    %137 = vector.load %arg5[%c0_118, %c0_119] : memref<128x1xf32, #tpu.memory_space<vmem>>, vector<128x1xf32>
    %cst_120 = arith.constant 5.000000e-01 : f32
    %138 = vector.broadcast %cst_120 : f32 to vector<128x1xf32>
    %139 = arith.cmpf ogt, %137, %138 : vector<128x1xf32>
    %cst_121 = arith.constant 0.000000e+00 : f32
    %140 = vector.shape_cast %139 : vector<128x1xi1> to vector<128x1xi1>
    %141 = vector.broadcast %140 : vector<128x1xi1> to vector<128x128xi1>
    %142 = vector.broadcast %cst_121 : f32 to vector<128x128xf32>
    %143 = arith.select %141, %136, %142 : vector<128x128xi1>, vector<128x128xf32>
    %144 = arith.truncf %143 : vector<128x128xf32> to vector<128x128xbf16>
    %c24_122 = arith.constant 24 : index
    %c0_123 = arith.constant 0 : index
    %145 = vector.load %arg17[%c24_122, %c0_123] : memref<176x128xbf16, #tpu.memory_space<vmem>>, vector<128x128xbf16>
    tpu.vector_store %arg17[%c24_122, %c0_123], %144 {strides = array<i32>} : memref<176x128xbf16, #tpu.memory_space<vmem>>, vector<128x128xbf16>,
    %cst_124 = arith.constant 0.000000e+00 : f32
    %146 = vector.broadcast %cst_124 : f32 to vector<128x256xf32>
    %c7_125 = arith.constant 7 : index
    %c0_126 = arith.constant 0 : index
    %147 = vector.load %arg17[%c7_125, %c0_126] : memref<176x128xbf16, #tpu.memory_space<vmem>>, vector<128x128xbf16>
    %c0_127 = arith.constant 0 : index
    %c0_128 = arith.constant 0 : index
    %c0_129 = arith.constant 0 : index
    %148 = vector.load %arg10[%c0_127, %c0_128, %c0_129] : memref<9x128x256xbf16, #tpu.memory_space<vmem>>, vector<1x128x256xbf16>
    %149 = vector.shape_cast %148 : vector<1x128x256xbf16> to vector<128x256xbf16>
    %cst_130 = arith.constant dense<0.000000e+00> : vector<128x256xf32>
    %150 = tpu.matmul %147, %149, %cst_130 {dimension_numbers = #tpu.dot_dimension_numbers<[1], [0], [0], [1], [0, 0, 1, 1], [], []>} : vector<128x128xbf16>, vector<128x256xbf16>, vector<128x256xf32> -> vector<128x256xf32>
    %151 = arith.addf %146, %150 : vector<128x256xf32>
    %c8_131 = arith.constant 8 : index
    %c0_132 = arith.constant 0 : index
    %152 = vector.load %arg17[%c8_131, %c0_132] : memref<176x128xbf16, #tpu.memory_space<vmem>>, vector<128x128xbf16>
    %c1_133 = arith.constant 1 : index
    %c0_134 = arith.constant 0 : index
    %c0_135 = arith.constant 0 : index
    %153 = vector.load %arg10[%c1_133, %c0_134, %c0_135] : memref<9x128x256xbf16, #tpu.memory_space<vmem>>, vector<1x128x256xbf16>
    %154 = vector.shape_cast %153 : vector<1x128x256xbf16> to vector<128x256xbf16>
    %cst_136 = arith.constant dense<0.000000e+00> : vector<128x256xf32>
    %155 = tpu.matmul %152, %154, %cst_136 {dimension_numbers = #tpu.dot_dimension_numbers<[1], [0], [0], [1], [0, 0, 1, 1], [], []>} : vector<128x128xbf16>, vector<128x256xbf16>, vector<128x256xf32> -> vector<128x256xf32>
    %156 = arith.addf %151, %155 : vector<128x256xf32>
    %c9_137 = arith.constant 9 : index
    %c0_138 = arith.constant 0 : index
    %157 = vector.load %arg17[%c9_137, %c0_138] : memref<176x128xbf16, #tpu.memory_space<vmem>>, vector<128x128xbf16>
    %c2_139 = arith.constant 2 : index
    %c0_140 = arith.constant 0 : index
    %c0_141 = arith.constant 0 : index
    %158 = vector.load %arg10[%c2_139, %c0_140, %c0_141] : memref<9x128x256xbf16, #tpu.memory_space<vmem>>, vector<1x128x256xbf16>
    %159 = vector.shape_cast %158 : vector<1x128x256xbf16> to vector<128x256xbf16>
    %cst_142 = arith.constant dense<0.000000e+00> : vector<128x256xf32>
    %160 = tpu.matmul %157, %159, %cst_142 {dimension_numbers = #tpu.dot_dimension_numbers<[1], [0], [0], [1], [0, 0, 1, 1], [], []>} : vector<128x128xbf16>, vector<128x256xbf16>, vector<128x256xf32> -> vector<128x256xf32>
    %161 = arith.addf %156, %160 : vector<128x256xf32>
    %c23 = arith.constant 23 : index
    %c0_143 = arith.constant 0 : index
    %162 = vector.load %arg17[%c23, %c0_143] : memref<176x128xbf16, #tpu.memory_space<vmem>>, vector<128x128xbf16>
    %c3_144 = arith.constant 3 : index
    %c0_145 = arith.constant 0 : index
    %c0_146 = arith.constant 0 : index
    %163 = vector.load %arg10[%c3_144, %c0_145, %c0_146] : memref<9x128x256xbf16, #tpu.memory_space<vmem>>, vector<1x128x256xbf16>
    %164 = vector.shape_cast %163 : vector<1x128x256xbf16> to vector<128x256xbf16>
    %cst_147 = arith.constant dense<0.000000e+00> : vector<128x256xf32>
    %165 = tpu.matmul %162, %164, %cst_147 {dimension_numbers = #tpu.dot_dimension_numbers<[1], [0], [0], [1], [0, 0, 1, 1], [], []>} : vector<128x128xbf16>, vector<128x256xbf16>, vector<128x256xf32> -> vector<128x256xf32>
    %166 = arith.addf %161, %165 : vector<128x256xf32>
    %c24_148 = arith.constant 24 : index
    %c0_149 = arith.constant 0 : index
    %167 = vector.load %arg17[%c24_148, %c0_149] : memref<176x128xbf16, #tpu.memory_space<vmem>>, vector<128x128xbf16>
    %c4_150 = arith.constant 4 : index
    %c0_151 = arith.constant 0 : index
    %c0_152 = arith.constant 0 : index
    %168 = vector.load %arg10[%c4_150, %c0_151, %c0_152] : memref<9x128x256xbf16, #tpu.memory_space<vmem>>, vector<1x128x256xbf16>
    %169 = vector.shape_cast %168 : vector<1x128x256xbf16> to vector<128x256xbf16>
    %cst_153 = arith.constant dense<0.000000e+00> : vector<128x256xf32>
    %170 = tpu.matmul %167, %169, %cst_153 {dimension_numbers = #tpu.dot_dimension_numbers<[1], [0], [0], [1], [0, 0, 1, 1], [], []>} : vector<128x128xbf16>, vector<128x256xbf16>, vector<128x256xf32> -> vector<128x256xf32>
    %171 = arith.addf %166, %170 : vector<128x256xf32>
    %c25_154 = arith.constant 25 : index
    %c0_155 = arith.constant 0 : index
    %172 = vector.load %arg17[%c25_154, %c0_155] : memref<176x128xbf16, #tpu.memory_space<vmem>>, vector<128x128xbf16>
    %c5_156 = arith.constant 5 : index
    %c0_157 = arith.constant 0 : index
    %c0_158 = arith.constant 0 : index
    %173 = vector.load %arg10[%c5_156, %c0_157, %c0_158] : memref<9x128x256xbf16, #tpu.memory_space<vmem>>, vector<1x128x256xbf16>
    %174 = vector.shape_cast %173 : vector<1x128x256xbf16> to vector<128x256xbf16>
    %cst_159 = arith.constant dense<0.000000e+00> : vector<128x256xf32>
    %175 = tpu.matmul %172, %174, %cst_159 {dimension_numbers = #tpu.dot_dimension_numbers<[1], [0], [0], [1], [0, 0, 1, 1], [], []>} : vector<128x128xbf16>, vector<128x256xbf16>, vector<128x256xf32> -> vector<128x256xf32>
    %176 = arith.addf %171, %175 : vector<128x256xf32>
    %c39 = arith.constant 39 : index
    %c0_160 = arith.constant 0 : index
    %177 = vector.load %arg17[%c39, %c0_160] : memref<176x128xbf16, #tpu.memory_space<vmem>>, vector<128x128xbf16>
    %c6_161 = arith.constant 6 : index
    %c0_162 = arith.constant 0 : index
    %c0_163 = arith.constant 0 : index
    %178 = vector.load %arg10[%c6_161, %c0_162, %c0_163] : memref<9x128x256xbf16, #tpu.memory_space<vmem>>, vector<1x128x256xbf16>
    %179 = vector.shape_cast %178 : vector<1x128x256xbf16> to vector<128x256xbf16>
    %cst_164 = arith.constant dense<0.000000e+00> : vector<128x256xf32>
    %180 = tpu.matmul %177, %179, %cst_164 {dimension_numbers = #tpu.dot_dimension_numbers<[1], [0], [0], [1], [0, 0, 1, 1], [], []>} : vector<128x128xbf16>, vector<128x256xbf16>, vector<128x256xf32> -> vector<128x256xf32>
    %181 = arith.addf %176, %180 : vector<128x256xf32>
    %c40 = arith.constant 40 : index
    %c0_165 = arith.constant 0 : index
    %182 = vector.load %arg17[%c40, %c0_165] : memref<176x128xbf16, #tpu.memory_space<vmem>>, vector<128x128xbf16>
    %c7_166 = arith.constant 7 : index
    %c0_167 = arith.constant 0 : index
    %c0_168 = arith.constant 0 : index
    %183 = vector.load %arg10[%c7_166, %c0_167, %c0_168] : memref<9x128x256xbf16, #tpu.memory_space<vmem>>, vector<1x128x256xbf16>
    %184 = vector.shape_cast %183 : vector<1x128x256xbf16> to vector<128x256xbf16>
    %cst_169 = arith.constant dense<0.000000e+00> : vector<128x256xf32>
    %185 = tpu.matmul %182, %184, %cst_169 {dimension_numbers = #tpu.dot_dimension_numbers<[1], [0], [0], [1], [0, 0, 1, 1], [], []>} : vector<128x128xbf16>, vector<128x256xbf16>, vector<128x256xf32> -> vector<128x256xf32>
    %186 = arith.addf %181, %185 : vector<128x256xf32>
    %c41 = arith.constant 41 : index
    %c0_170 = arith.constant 0 : index
    %187 = vector.load %arg17[%c41, %c0_170] : memref<176x128xbf16, #tpu.memory_space<vmem>>, vector<128x128xbf16>
    %c8_171 = arith.constant 8 : index
    %c0_172 = arith.constant 0 : index
    %c0_173 = arith.constant 0 : index
    %188 = vector.load %arg10[%c8_171, %c0_172, %c0_173] : memref<9x128x256xbf16, #tpu.memory_space<vmem>>, vector<1x128x256xbf16>
    %189 = vector.shape_cast %188 : vector<1x128x256xbf16> to vector<128x256xbf16>
    %cst_174 = arith.constant dense<0.000000e+00> : vector<128x256xf32>
    %190 = tpu.matmul %187, %189, %cst_174 {dimension_numbers = #tpu.dot_dimension_numbers<[1], [0], [0], [1], [0, 0, 1, 1], [], []>} : vector<128x128xbf16>, vector<128x256xbf16>, vector<128x256xf32> -> vector<128x256xf32>
    %191 = arith.addf %186, %190 : vector<128x256xf32>
    %c0_175 = arith.constant 0 : index
    %c0_176 = arith.constant 0 : index
    %192 = vector.load %arg11[%c0_175, %c0_176] : memref<1x256xf32, #tpu.memory_space<vmem>>, vector<1x256xf32>
    %193 = vector.broadcast %192 : vector<1x256xf32> to vector<128x256xf32>
    %194 = arith.addf %191, %193 : vector<128x256xf32>
    %cst_177 = arith.constant 0.000000e+00 : f32
    %195 = vector.broadcast %cst_177 : f32 to vector<128x256xf32>
    %196 = arith.cmpf ogt, %194, %195 : vector<128x256xf32>
    %cst_178 = arith.constant 2.000000e-01 : f32
    %197 = vector.broadcast %cst_178 : f32 to vector<128x256xf32>
    %198 = arith.mulf %197, %194 : vector<128x256xf32>
    %199 = arith.select %196, %194, %198 : vector<128x256xi1>, vector<128x256xf32>
    %c0_179 = arith.constant 0 : index
    %c0_180 = arith.constant 0 : index
    %200 = vector.load %arg12[%c0_179, %c0_180] : memref<128x256xf32, #tpu.memory_space<vmem>>, vector<128x256xf32>
    %201 = arith.mulf %199, %200 : vector<128x256xf32>
    %cst_181 = arith.constant dense<0.000000e+00> : vector<128xf32>
    %202 = vector.multi_reduction <add>, %201, %cst_181 [1] : vector<128x256xf32> to vector<128xf32>
    %203 = vector.shape_cast %202 : vector<128xf32> to vector<128x1xf32>
    %cst_182 = arith.constant dense<0.000000e+00> : vector<1xf32>
    %204 = vector.multi_reduction <add>, %203, %cst_182 [0] : vector<128x1xf32> to vector<1xf32>
    %205 = vector.shape_cast %204 : vector<1xf32> to vector<1x1xf32>
    %c0_183 = arith.constant 0 : index
    %c0_184 = arith.constant 0 : index
    %206 = vector.load %arg13[%c0_183, %c0_184] : memref<1x1xf32, #tpu.memory_space<vmem>>, vector<1x1xf32>
    %207 = arith.addf %205, %206 : vector<1x1xf32>
    %208 = vector.shape_cast %207 : vector<1x1xf32> to vector<1x1xf32>
    %209 = vector.broadcast %208 : vector<1x1xf32> to vector<1x128xf32>
    %c0_185 = arith.constant 0 : index
    %c0_186 = arith.constant 0 : index
    %c0_187 = arith.constant 0 : index
    %210 = vector.load %arg14[%c0_185, %c0_186, %c0_187] : memref<1x1x128xf32, #tpu.memory_space<vmem>>, vector<1x1x128xf32>
    %211 = vector.shape_cast %210 : vector<1x1x128xf32> to vector<1x128xf32>
    %212 = vector.shape_cast %209 : vector<1x128xf32> to vector<1x1x128xf32>
    tpu.vector_store %arg14[%c0_185, %c0_186, %c0_187], %212 {strides = array<i32>} : memref<1x1x128xf32, #tpu.memory_space<vmem>>, vector<1x1x128xf32>,
    return
  }
  func.func @transform_0(%arg0: i32) -> (i32, i32, i32) {
    %c0_i32 = arith.constant 0 : i32
    %c0_i32_0 = arith.constant 0 : i32
    %c0_i32_1 = arith.constant 0 : i32
    return %arg0, %c0_i32, %c0_i32_0 : i32, i32, i32
  }
  func.func @transform_1(%arg0: i32) -> (i32, i32, i32) {
    %c0_i32 = arith.constant 0 : i32
    %c0_i32_0 = arith.constant 0 : i32
    %c0_i32_1 = arith.constant 0 : i32
    return %arg0, %c0_i32, %c0_i32_0 : i32, i32, i32
  }
  func.func @transform_2(%arg0: i32) -> (i32, i32) {
    %c0_i32 = arith.constant 0 : i32
    %c0_i32_0 = arith.constant 0 : i32
    %c0_i32_1 = arith.constant 0 : i32
    return %c0_i32, %c0_i32_0 : i32, i32
  }
  func.func @transform_3(%arg0: i32) -> (i32, i32) {
    %c0_i32 = arith.constant 0 : i32
    %c0_i32_0 = arith.constant 0 : i32
    %c0_i32_1 = arith.constant 0 : i32
    return %c0_i32, %c0_i32_0 : i32, i32
  }
  func.func @transform_4(%arg0: i32) -> (i32, i32) {
    %c0_i32 = arith.constant 0 : i32
    %c0_i32_0 = arith.constant 0 : i32
    %c0_i32_1 = arith.constant 0 : i32
    return %c0_i32, %c0_i32_0 : i32, i32
  }
  func.func @transform_5(%arg0: i32) -> (i32, i32) {
    %c0_i32 = arith.constant 0 : i32
    %c0_i32_0 = arith.constant 0 : i32
    %c0_i32_1 = arith.constant 0 : i32
    return %c0_i32, %c0_i32_0 : i32, i32
  }
  func.func @transform_6(%arg0: i32) -> (i32, i32) {
    %c0_i32 = arith.constant 0 : i32
    %c0_i32_0 = arith.constant 0 : i32
    %c0_i32_1 = arith.constant 0 : i32
    return %c0_i32, %c0_i32_0 : i32, i32
  }
  func.func @transform_7(%arg0: i32) -> (i32, i32, i32) {
    %c0_i32 = arith.constant 0 : i32
    %c0_i32_0 = arith.constant 0 : i32
    %c0_i32_1 = arith.constant 0 : i32
    %c0_i32_2 = arith.constant 0 : i32
    return %c0_i32, %c0_i32_0, %c0_i32_1 : i32, i32, i32
  }
  func.func @transform_8(%arg0: i32) -> (i32, i32) {
    %c0_i32 = arith.constant 0 : i32
    %c0_i32_0 = arith.constant 0 : i32
    %c0_i32_1 = arith.constant 0 : i32
    return %c0_i32, %c0_i32_0 : i32, i32
  }
  func.func @transform_9(%arg0: i32) -> (i32, i32, i32) {
    %c0_i32 = arith.constant 0 : i32
    %c0_i32_0 = arith.constant 0 : i32
    %c0_i32_1 = arith.constant 0 : i32
    %c0_i32_2 = arith.constant 0 : i32
    return %c0_i32, %c0_i32_0, %c0_i32_1 : i32, i32, i32
  }
  func.func @transform_10(%arg0: i32) -> (i32, i32) {
    %c0_i32 = arith.constant 0 : i32
    %c0_i32_0 = arith.constant 0 : i32
    %c0_i32_1 = arith.constant 0 : i32
    return %c0_i32, %c0_i32_0 : i32, i32
  }
  func.func @transform_11(%arg0: i32) -> (i32, i32) {
    %c0_i32 = arith.constant 0 : i32
    %c0_i32_0 = arith.constant 0 : i32
    %c0_i32_1 = arith.constant 0 : i32
    return %c0_i32, %c0_i32_0 : i32, i32
  }
  func.func @transform_12(%arg0: i32) -> (i32, i32) {
    %c0_i32 = arith.constant 0 : i32
    %c0_i32_0 = arith.constant 0 : i32
    %c0_i32_1 = arith.constant 0 : i32
    return %c0_i32, %c0_i32_0 : i32, i32
  }
  func.func @transform_13(%arg0: i32) -> (i32, i32, i32) {
    %c0_i32 = arith.constant 0 : i32
    %c0_i32_0 = arith.constant 0 : i32
    %c0_i32_1 = arith.constant 0 : i32
    return %arg0, %c0_i32, %c0_i32_0 : i32, i32, i32
  }
}

</mosaic_0001>

<bundles_post_ra>
// kernel: cgan_cnn_discriminator.1
= control target key start
LH: loop header
LB: loop body
LE: loop exit
PB: predicated region body
PF: predicated region fallthrough
CT: control target
= control target key end

     0   :  { %s9968_s27 = smov 0   ;;  %s12623_s0 = inlined_call_operand.vmem [shape: bf16[4,128,32], index: 0, kind: input, shape index: {}]   ;;  %s12624_s1 = inlined_call_operand.vmem [shape: bf16[4,128,32], index: 1, kind: input, shape index: {}]   ;;  %s12625_s2 = inlined_call_operand.vmem [shape: f32[128,1], index: 2, kind: input, shape index: {}]   ;;  %s12626_s3 = inlined_call_operand.vmem [shape: f32[128,1], index: 3, kind: input, shape index: {}]   ;;  %s12627_s4 = inlined_call_operand.vmem [shape: f32[128,1], index: 4, kind: input, shape index: {}]   ;;  %s12628_s5 = inlined_call_operand.vmem [shape: bf16[32,64], index: 5, kind: input, shape index: {}]   ;;  %s12629_s6 = inlined_call_operand.vmem [shape: f32[1,64], index: 6, kind: input, shape index: {}]   ;;  %s12630_s7 = inlined_call_operand.vmem [shape: bf16[16,64,128], index: 7, kind: input, shape index: {}]   ;;  %s12631_s8 = inlined_call_operand.vmem [shape: f32[1,128], index: 8, kind: input, shape index: {}]   ;;  %s12632_s9 = inlined_call_operand.vmem [shape: bf16[9,128,256], index: 9, kind: input, shape index: {}]   ;;  %s12633_s10 = inlined_call_operand.vmem [shape: f32[1,256], index: 10, kind: input, shape index: {}]   ;;  %s12634_s11 = inlined_call_operand.vmem [shape: f32[128,256], index: 11, kind: input, shape index: {}]   ;;  %s12635_s12 = inlined_call_operand.<no memory space> [shape: f32[1,1], index: 12, kind: input, shape index: {}]   ;;  %s12636_s13 = inlined_call_operand.vmem [shape: f32[4,1,128], index: 13, kind: output, shape index: {}]  }
   0x1   :  { %v18_v0 = vstv %s12635_s12 }
   0x2   :  { %19 = vst [vmem:[#allocation5] sm:$0x1] %v18_v0 }
   0x3 LB: > { %s7793_s28 = sadd.s32 4294967295, %s9892_s27   ;;  %p7797_p0 = scmp.ge.s32.totalorder %s9892_s27, 1  ;;  %s9892_s27 = sphi %s9968_s27, %s25_s27  }
   0x4   : > { %p399_p1 = scmp.lt.s32.totalorder %s9892_s27, 5 }
   0x6   : > { %p400_p2 = pnand %p7797_p0, %p399_p1 }
   0x8   : > { %403 = sbr.rel (%p400_p2) target bundleno = 2052 (0x804), region = 72 }
   0xf   : > { %v9585_v1 = vld [vmem:[%s12628_s5] sm:$0xff]   ;;  %v9894_v2 = vmov 0   ;;  %p446_p3 = scmp.lt.s32.totalorder %s7793_s28, 3  ;;  %v9586_v4 = vld [vmem:[%s12628_s5 + $0x8] sm:$0xff]   ;;  %v1089_v5 = vld [vmem:[%s12626_s3 + $0x10] sm:$0xff]  ;;  %vm548_vm5 = vcmask 261120  }
  0x10   : > { %9583 = vset.pattern.permute.xlu0 %v9894_v2  ;;  %465 = vst [vmem:[#allocation4] sm:$0xff] %v9894_v2  ;;  %466 = vst [vmem:[#allocation4 + $0x8] sm:$0xf] %v9894_v2  ;;  %9584 = vset.pattern.permute.xlu1 %v9894_v2  ;;  %v1087_v3 = vld [vmem:[%s12626_s3] sm:$0xff]  ;;  %v1088_v6 = vld [vmem:[%s12626_s3 + $0x8] sm:$0xff]  ;;  %vm1105_vm1 = vcmp.gt.f32.partialorder %v1089_v5, 0.5 }
  0x11   : > { %467 = vst [vmem:[#allocation4 + $0x48] sm:$0xf0] %v9894_v2  ;;  %468 = vst [vmem:[#allocation4 + $0x50] sm:$0xff] %v9894_v2  ;;  %8638 = vmatprep.subr.bf16.mxu0 %v9585_v1  ;;  %8658 = vmatprep.subr.bf16.mxu1 %v9585_v1  ;;  %vm1103_vm0 = vcmp.gt.f32.partialorder %v1087_v3, 0.5  ;;  %vm1104_vm2 = vcmp.gt.f32.partialorder %v1088_v6, 0.5  ;;  %s12775_s28 = smov (!%p446_p3, %s7793_s28), 3 }
  0x12   : > { %8639 = vmatpush3.bf16.msra.mxu0 %v9585_v1  ;;  %8659 = vmatpush3.bf16.msra.mxu1 %v9585_v1  ;;  %v1119_v7 = vsel %vm1103_vm0, 1, %v9894_v2  ;;  %v1090_v8 = vld [vmem:[%s12626_s3 + $0x18] sm:$0xff]  ;;  %v1091_v9 = vld [vmem:[%s12626_s3 + $0x20] sm:$0xff]  ;;  %v1121_v10 = vsel %vm1105_vm1, 1, %v9894_v2  ;;  %v1092_v11 = vld [vmem:[%s12626_s3 + $0x28] sm:$0xff]  ;;  %v1120_v13 = vsel %vm1104_vm2, 1, %v9894_v2  ;;  %s458_s20 = scalar_lea.vmem %s12636_s13, %s12775_s28 }
  0x13   : > { %1136 = vperm.xlu0 %9583, %v1119_v7   ;;  %8640 = vmatprep.subr.bf16.mxu0 %v9586_v4  ;;  %vm1106_vm3 = vcmp.gt.f32.partialorder %v1090_v8, 0.5  ;;  %v1093_v12 = vld [vmem:[%s12626_s3 + $0x30] sm:$0xff]  ;;  %s8424_s12 = sshll.u32 %s12775_s28, 6  ;;  %vm1107_vm4 = vcmp.gt.f32.partialorder %v1091_v9, 0.5  ;;  %vm1108_vm6 = vcmp.gt.f32.partialorder %v1092_v11, 0.5  ;;  %v1094_v15 = vld [vmem:[%s12626_s3 + $0x38] sm:$0xff] }
  0x14   : > { %8660 = vmatprep.subr.bf16.mxu1 %v9586_v4  ;;  %1142 = vperm.xlu1 %9584, %v1121_v10   ;;  %s10018_s16 = scalar_lea.vmem %s12623_s0, %s8424_s12  ;;  %s10023_s19 = scalar_lea.vmem %s12624_s1, %s8424_s12  ;;  %v1122_v14 = vsel %vm1106_vm3, 1, %v9894_v2  ;;  %vm1109_vm7 = vcmp.gt.f32.partialorder %v1093_v12, 0.5  ;;  %v1095_v17 = vld [vmem:[%s12626_s3 + $0x40] sm:$0xff]  ;;  %v1123_v19 = vsel %vm1107_vm4, 1, %v9894_v2  ;;  %v1096_v20 = vld [vmem:[%s12626_s3 + $0x48] sm:$0xff]  ;;  %v1124_v22 = vsel %vm1108_vm6, 1, %v9894_v2 }
  0x15   : > { %v9587_v16 = vld [vmem:[%s10018_s16] sm:$0xff]   ;;  %v9589_v21 = vld [vmem:[%s10018_s16 + $0x8] sm:$0xff]   ;;  %v1125_v24 = vsel %vm1109_vm7, 1, %v9894_v2  ;;  %v9591_v25 = vld [vmem:[%s10018_s16 + $0x10] sm:$0xff]   ;;  %vm1110_vm8 = vcmp.gt.f32.partialorder %v1094_v15, 0.5  ;;  %vm1111_vm9 = vcmp.gt.f32.partialorder %v1095_v17, 0.5 }
  0x16   : > { %8641 = vmatpush3.bf16.msra.mxu0 %v9586_v4  ;;  %8661 = vmatpush3.bf16.msra.mxu1 %v9586_v4  ;;  %v9588_v18 = vld [vmem:[%s10023_s19] sm:$0xff]   ;;  %v9590_v23 = vld [vmem:[%s10023_s19 + $0x8] sm:$0xff]   ;;  %v9592_v26 = vld [vmem:[%s10023_s19 + $0x10] sm:$0xff]   ;;  %vm1112_vm10 = vcmp.gt.f32.partialorder %v1096_v20, 0.5  ;;  %v1126_v28 = vsel %vm1110_vm8, 1, %v9894_v2  ;;  %v1127_v31 = vsel %vm1111_vm9, 1, %v9894_v2 }
  0x17   : > { %1139 = vperm.xlu0 %9583, %v1120_v13   ;;  %8642 = vmatprep.mubr.msk.bf16.mxu0 %vm548_vm5, %v9587_v16  ;;  %v1097_v27 = vld [vmem:[%s12626_s3 + $0x50] sm:$0xff]  ;;  %v9593_v29 = vld [vmem:[%s10018_s16 + $0x18] sm:$0xff]   ;;  %v1128_v32 = vsel %vm1112_vm10, 1, %v9894_v2  ;;  %v9595_v33 = vld [vmem:[%s10018_s16 + $0x20] sm:$0xff]  }
  0x18   : > { %1145 = vperm.xlu1 %9584, %v1122_v14   ;;  %8662 = vmatprep.mubr.msk.bf16.mxu1 %vm548_vm5, %v9588_v18  ;;  %v9594_v30 = vld [vmem:[%s10023_s19 + $0x18] sm:$0xff]   ;;  %vm1113_vm11 = vcmp.gt.f32.partialorder %v1097_v27, 0.5  ;;  %v9596_v35 = vld [vmem:[%s10023_s19 + $0x20] sm:$0xff]   ;;  %v1100_v37 = vld [vmem:[%s12626_s3 + $0x68] sm:$0xff] }
  0x19   : > { %8643 = vmatmul.mubr.msk.bf16.vlgmr.msra.gmra.mrb[0].mxu0 %vm548_vm5, %v9589_v21  ;;  %8663 = vmatmul.mubr.msk.bf16.vlgmr.msra.gmra.mrb[0].mxu1 %vm548_vm5, %v9590_v23  ;;  %v1098_v34 = vld [vmem:[%s12626_s3 + $0x58] sm:$0xff]  ;;  %v1099_v36 = vld [vmem:[%s12626_s3 + $0x60] sm:$0xff]  ;;  %v1129_v38 = vsel %vm1113_vm11, 1, %v9894_v2  ;;  %v9597_v40 = vld [vmem:[%s10018_s16 + $0x28] sm:$0xff]   ;;  %vm1116_vm14 = vcmp.gt.f32.partialorder %v1100_v37, 0.5 }
  0x1a   : > { %8646 = vmatprep.mubr.msk.bf16.mxu0 %vm548_vm5, %v9591_v25  ;;  %8666 = vmatprep.mubr.msk.bf16.mxu1 %vm548_vm5, %v9592_v26  ;;  %vm1114_vm12 = vcmp.gt.f32.partialorder %v1098_v34, 0.5  ;;  %v9598_v41 = vld [vmem:[%s10023_s19 + $0x28] sm:$0xff]   ;;  %vm1115_vm13 = vcmp.gt.f32.partialorder %v1099_v36, 0.5  ;;  %v1101_v42 = vld [vmem:[%s12626_s3 + $0x70] sm:$0xff]  ;;  %v1102_v44 = vld [vmem:[%s12626_s3 + $0x78] sm:$0xff]  ;;  %v1132_v50 = vsel %vm1116_vm14, 1, %v9894_v2 }
  0x1b   : > { %1148 = vperm.xlu0 %9583, %v1123_v19   ;;  %v1130_v39 = vsel %vm1114_vm12, 1, %v9894_v2  ;;  %v9599_v43 = vld [vmem:[%s10018_s16 + $0x30] sm:$0xff]   ;;  %v1131_v46 = vsel %vm1115_vm13, 1, %v9894_v2  ;;  %v718_v47 = vld [vmem:[%s12625_s2] sm:$0xff]  ;;  %v719_v48 = vld [vmem:[%s12625_s2 + $0x8] sm:$0xff]  ;;  %vm1117_vm15 = vcmp.gt.f32.partialorder %v1101_v42, 0.5 }
  0x1c   : > { %1151 = vperm.xlu1 %9584, %v1124_v22   ;;  %v9600_v45 = vld [vmem:[%s10023_s19 + $0x30] sm:$0xff]   ;;  %vm1118_vm0 = vcmp.gt.f32.partialorder %v1102_v44, 0.5  ;;  %v721_v51 = vld [vmem:[%s12625_s2 + $0x18] sm:$0xff]  ;;  %v722_v52 = vld [vmem:[%s12625_s2 + $0x20] sm:$0xff]  ;;  %vm734_vm1 = vcmp.gt.f32.partialorder %v718_v47, 0.5  ;;  %vm735_vm2 = vcmp.gt.f32.partialorder %v719_v48, 0.5 }
  0x1d   : > { %v720_v49 = vld [vmem:[%s12625_s2 + $0x10] sm:$0xff]  ;;  %v723_v53 = vld [vmem:[%s12625_s2 + $0x28] sm:$0xff]  ;;  %vm737_vm4 = vcmp.gt.f32.partialorder %v721_v51, 0.5  ;;  %v725_v55 = vld [vmem:[%s12625_s2 + $0x38] sm:$0xff]  ;;  %v1133_v58 = vsel %vm1117_vm15, 1, %v9894_v2  ;;  %v1134_v59 = vsel %vm1118_vm0, 1, %v9894_v2 }
  0x1e   : > { %vm736_vm3 = vcmp.gt.f32.partialorder %v720_v49, 0.5  ;;  %v724_v54 = vld [vmem:[%s12625_s2 + $0x30] sm:$0xff]  ;;  %v726_v56 = vld [vmem:[%s12625_s2 + $0x40] sm:$0xff]  ;;  %v727_v57 = vld [vmem:[%s12625_s2 + $0x48] sm:$0xff]  ;;  %vm738_vm6 = vcmp.gt.f32.partialorder %v722_v52, 0.5  ;;  %vm739_vm7 = vcmp.gt.f32.partialorder %v723_v53, 0.5 }
  0x1f   : > { %1154 = vperm.xlu0 %9583, %v1125_v24   ;;  %v728_v60 = vld [vmem:[%s12625_s2 + $0x50] sm:$0xff]  ;;  %v729_v61 = vld [vmem:[%s12625_s2 + $0x58] sm:$0xff]  ;;  %v750_v62 = vsel %vm734_vm1, 1, %v9894_v2  ;;  %v751_v63 = vsel %vm735_vm2, 1, %v9894_v2  ;;  %v752_v0 = vsel %vm736_vm3, 1, %v9894_v2  ;;  %vm740_vm8 = vcmp.gt.f32.partialorder %v724_v54, 0.5 }
  0x20   : > { %1157 = vperm.xlu1 %9584, %v1126_v28   ;;  %v730_v1 = vld [vmem:[%s12625_s2 + $0x60] sm:$0xff]  ;;  %v731_v3 = vld [vmem:[%s12625_s2 + $0x68] sm:$0xff]  ;;  %v9601_v4 = vld [vmem:[%s10018_s16 + $0x38] sm:$0xff]   ;;  %v753_v5 = vsel %vm737_vm4, 1, %v9894_v2  ;;  %vm741_vm9 = vcmp.gt.f32.partialorder %v725_v55, 0.5  ;;  %vm742_vm10 = vcmp.gt.f32.partialorder %v726_v56, 0.5 }
  0x21   : > { %8647 = vmatmul.mubr.msk.bf16.gmra.mrb[4].mxu0 %vm548_vm5, %v9593_v29  ;;  %8667 = vmatmul.mubr.msk.bf16.gmra.mrb[4].mxu1 %vm548_vm5, %v9594_v30  ;;  %vm743_vm11 = vcmp.gt.f32.partialorder %v727_v57, 0.5  ;;  %v9602_v6 = vld [vmem:[%s10023_s19 + $0x38] sm:$0xff]   ;;  %v754_v7 = vsel %vm738_vm6, 1, %v9894_v2  ;;  %v755_v8 = vsel %vm739_vm7, 1, %v9894_v2  ;;  %vm744_vm12 = vcmp.gt.f32.partialorder %v728_v60, 0.5  ;;  %v732_v9 = vld [vmem:[%s12625_s2 + $0x70] sm:$0xff] }
  0x22   : > { %8650 = vmatprep.mubr.msk.bf16.mxu0 %vm548_vm5, %v9595_v33  ;;  %8670 = vmatprep.mubr.msk.bf16.mxu1 %vm548_vm5, %v9596_v35  ;;  %vm745_vm13 = vcmp.gt.f32.partialorder %v729_v61, 0.5  ;;  %v756_v10 = vsel %vm740_vm8, 1, %v9894_v2  ;;  %vm746_vm14 = vcmp.gt.f32.partialorder %v730_v1, 0.5  ;;  %vm747_vm15 = vcmp.gt.f32.partialorder %v731_v3, 0.5  ;;  %v733_v11 = vld [vmem:[%s12625_s2 + $0x78] sm:$0xff]  ;;  %v4604_v12 = vld [vmem:[%s12627_s4 + $0x20] sm:$0xff] }
  0x23   : > { %1160 = vperm.xlu0 %9583, %v1127_v31   ;;  %v4605_v13 = vld [vmem:[%s12627_s4 + $0x28] sm:$0xff]  ;;  %v757_v14 = vsel %vm741_vm9, 1, %v9894_v2  ;;  %v758_v15 = vsel %vm742_vm10, 1, %v9894_v2  ;;  %v759_v16 = vsel %vm743_vm11, 1, %v9894_v2  ;;  %v4606_v17 = vld [vmem:[%s12627_s4 + $0x30] sm:$0xff]  ;;  %v4607_v18 = vld [vmem:[%s12627_s4 + $0x38] sm:$0xff] }
  0x24   : > { %1163 = vperm.xlu1 %9584, %v1128_v32   ;;  %v4608_v19 = vld [vmem:[%s12627_s4 + $0x40] sm:$0xff]  ;;  %v760_v20 = vsel %vm744_vm12, 1, %v9894_v2  ;;  %v761_v21 = vsel %vm745_vm13, 1, %v9894_v2  ;;  %vm748_vm0 = vcmp.gt.f32.partialorder %v732_v9, 0.5  ;;  %v4609_v22 = vld [vmem:[%s12627_s4 + $0x48] sm:$0xff]  ;;  %v4610_v23 = vld [vmem:[%s12627_s4 + $0x50] sm:$0xff] }
  0x25   : > { %v4611_v24 = vld [vmem:[%s12627_s4 + $0x58] sm:$0xff]  ;;  %v762_v25 = vsel %vm746_vm14, 1, %v9894_v2  ;;  %v763_v26 = vsel %vm747_vm15, 1, %v9894_v2  ;;  %vm749_vm1 = vcmp.gt.f32.partialorder %v733_v11, 0.5  ;;  %vm4620_vm2 = vcmp.gt.f32.partialorder %v4604_v12, 0.5  ;;  %v4612_v27 = vld [vmem:[%s12627_s4 + $0x60] sm:$0xff] }
  0x26   : > { %v4613_v28 = vld [vmem:[%s12627_s4 + $0x68] sm:$0xff]  ;;  %vm4621_vm3 = vcmp.gt.f32.partialorder %v4605_v13, 0.5  ;;  %vm4623_vm4 = vcmp.gt.f32.partialorder %v4607_v18, 0.5  ;;  %vm4624_vm6 = vcmp.gt.f32.partialorder %v4608_v19, 0.5  ;;  %vm4625_vm7 = vcmp.gt.f32.partialorder %v4609_v22, 0.5  ;;  %v4615_v42 = vld [vmem:[%s12627_s4 + $0x78] sm:$0xff] }
  0x27   : > { %1166 = vperm.xlu0 %9583, %v1129_v38   ;;  %vm4626_vm8 = vcmp.gt.f32.partialorder %v4610_v23, 0.5  ;;  %vm4627_vm9 = vcmp.gt.f32.partialorder %v4611_v24, 0.5  ;;  %vm4628_vm10 = vcmp.gt.f32.partialorder %v4612_v27, 0.5  ;;  %v764_v29 = vsel %vm748_vm0, 1, %v9894_v2  ;;  %v4600_v44 = vld [vmem:[%s12627_s4] sm:$0xff]  ;;  %v4602_v47 = vld [vmem:[%s12627_s4 + $0x10] sm:$0xff] }
  0x28   : > { %1169 = vperm.xlu1 %9584, %v1130_v39   ;;  %v765_v30 = vsel %vm749_vm1, 1, %v9894_v2  ;;  %v4636_v31 = vsel %vm4620_vm2, 1, %v9894_v2  ;;  %vm4629_vm11 = vcmp.gt.f32.partialorder %v4613_v28, 0.5  ;;  %v4637_v32 = vsel %vm4621_vm3, 1, %v9894_v2  ;;  %v4603_v49 = vld [vmem:[%s12627_s4 + $0x18] sm:$0xff]  ;;  %v9604_v51 = vld [vmem:[%s12630_s7 + $0x28] sm:$0xff]  }
  0x29   : > { %8651 = vmatmul.mubr.msk.bf16.gmra.mrb[8].mxu0 %vm548_vm5, %v9597_v40  ;;  %8671 = vmatmul.mubr.msk.bf16.gmra.mrb[8].mxu1 %vm548_vm5, %v9598_v41  ;;  %v4639_v34 = vsel %vm4623_vm4, 1, %v9894_v2  ;;  %v4640_v35 = vsel %vm4624_vm6, 1, %v9894_v2  ;;  %v4641_v36 = vsel %vm4625_vm7, 1, %v9894_v2  ;;  %v4642_v37 = vsel %vm4626_vm8, 1, %v9894_v2  ;;  %v4614_v41 = vld [vmem:[%s12627_s4 + $0x70] sm:$0xff]  ;;  %v9606_v56 = vld [vmem:[%s12630_s7 + $0x38] sm:$0xff]  }
  0x2a   : > { %8654 = vmatprep.mubr.msk.bf16.mxu0 %vm548_vm5, %v9599_v43  ;;  %8674 = vmatprep.mubr.msk.bf16.mxu1 %vm548_vm5, %v9600_v45  ;;  %v4643_v38 = vsel %vm4627_vm9, 1, %v9894_v2  ;;  %v4644_v39 = vsel %vm4628_vm10, 1, %v9894_v2  ;;  %v4645_v40 = vsel %vm4629_vm11, 1, %v9894_v2  ;;  %vm4630_vm12 = vcmp.gt.f32.partialorder %v4614_v41, 0.5  ;;  %v9603_v43 = vld [vmem:[%s12630_s7 + $0x20] sm:$0xff]   ;;  %v4601_v45 = vld [vmem:[%s12627_s4 + $0x8] sm:$0xff] }
  0x2b   : > { %1172 = vperm.xlu0 %9583, %v1131_v46   ;;  %vm4631_vm13 = vcmp.gt.f32.partialorder %v4615_v42, 0.5  ;;  %8678 = vmatprep.subr.bf16.mxu0 %v9603_v43  ;;  %v4646_v46 = vsel %vm4630_vm12, 1, %v9894_v2  ;;  %vm4616_vm14 = vcmp.gt.f32.partialorder %v4600_v44, 0.5  ;;  %vm4617_vm15 = vcmp.gt.f32.partialorder %v4601_v45, 0.5  ;;  %v9605_v55 = vld [vmem:[%s12630_s7 + $0x30] sm:$0xff]   ;;  %v10266_v57 = vld [vmem:[%s12630_s7] sm:$0xff]  }
  0x2c   : > { %1175 = vperm.xlu1 %9584, %v1132_v50   ;;  %8679 = vmatpush3.bf16.msra.mxu0 %v9603_v43  ;;  %v4647_v48 = vsel %vm4631_vm13, 1, %v9894_v2  ;;  %v4632_v50 = vsel %vm4616_vm14, 1, %v9894_v2  ;;  %v4633_v52 = vsel %vm4617_vm15, 1, %v9894_v2  ;;  %vm4618_vm0 = vcmp.gt.f32.partialorder %v4602_v47, 0.5 }
  0x2d   : > { %vm4619_vm1 = vcmp.gt.f32.partialorder %v4603_v49, 0.5  ;;  %8680 = vmatprep.subr.bf16.mxu0 %v9604_v51  ;;  %v4634_v53 = vsel %vm4618_vm0, 1, %v9894_v2  ;;  %vm460_vm2 = vcmask 523264  }
  0x2e   : > { %v4635_v54 = vsel %vm4619_vm1, 1, %v9894_v2  ;;  %461 = vst.msk [vmem:[#allocation2 + $0x40] sm:$0xff] %vm460_vm2, %v9894_v2  ;;  %462 = vst.msk [vmem:[#allocation2 + $0x48] sm:$0xff] %vm460_vm2, %v9894_v2 }
  0x2f   : > { %1178 = vperm.xlu0 %9583, %v1133_v58   ;;  %463 = vst.msk [vmem:[#allocation3 + $0x40] sm:$0xff] %vm460_vm2, %v9894_v2  ;;  %464 = vst.msk [vmem:[#allocation3 + $0x48] sm:$0xff] %vm460_vm2, %v9894_v2 }
  0x30   : > { %1181 = vperm.xlu1 %9584, %v1134_v59   ;;  %8681 = vmatpush3.bf16.msra.mxu0 %v9604_v51 }
  0x31   : > { %8655 = vmatmul.mubr.msk.bf16.gmra.mrb[12].mxu0 %vm548_vm5, %v9601_v4  ;;  %8675 = vmatmul.mubr.msk.bf16.gmra.mrb[12].mxu1 %vm548_vm5, %v9602_v6  ;;  %vm4622_vm5 = vcmp.gt.f32.partialorder %v4606_v17, 0.5 }
  0x32   : > { %5006 = vmatprep.mubr.bf16.mxu1 %v9894_v2  ;;  %v4638_v33 = vsel %vm4622_vm5, 1, %v9894_v2  ;;  %8682 = vmatprep.subr.bf16.mxu0 %v9605_v55 }
  0x33   : > { %767 = vperm.xlu0 %9583, %v750_v62  }
  0x34   : > { %770 = vperm.xlu1 %9584, %v751_v63   ;;  %8683 = vmatpush3.bf16.msra.mxu0 %v9605_v55 }
  0x35   : > { %8684 = vmatprep.subr.bf16.mxu0 %v9606_v56 }
  0x37   : > { %773 = vperm.xlu0 %9583, %v752_v0  }
  0x38   : > { %776 = vperm.xlu1 %9584, %v753_v5   ;;  %8685 = vmatpush3.bf16.msra.mxu0 %v9606_v56 }
  0x39   : > { %8702 = vmatprep.subr.bf16.mxu0 %v10266_v57 }
  0x3b   : > { %779 = vperm.xlu0 %9583, %v754_v7  }
  0x3c   : > { %782 = vperm.xlu1 %9584, %v755_v8  }
  0x3f   : > { %785 = vperm.xlu0 %9583, %v756_v10  }
  0x40   : > { %788 = vperm.xlu1 %9584, %v757_v14  }
  0x43   : > { %791 = vperm.xlu0 %9583, %v758_v15   ;;  %v10308_v15 = vld [vmem:[%s12629_s6] ss:$0 sm:$0xff] }
  0x44   : > { %794 = vperm.xlu1 %9584, %v759_v16  }
  0x47   : > { %797 = vperm.xlu0 %9583, %v760_v20  }
  0x48   : > { %800 = vperm.xlu1 %9584, %v761_v21  }
  0x4b   : > { %803 = vperm.xlu0 %9583, %v762_v25  }
  0x4c   : > { %806 = vperm.xlu1 %9584, %v763_v26  }
  0x4f   : > { %809 = vperm.xlu0 %9583, %v764_v29  }
  0x50   : > { %812 = vperm.xlu1 %9584, %v765_v30  }
  0x53   : > { %4661 = vperm.xlu0 %9583, %v4636_v31  }
  0x54   : > { %4664 = vperm.xlu1 %9584, %v4637_v32  }
  0x57   : > { %4667 = vperm.xlu0 %9583, %v4638_v33  }
  0x58   : > { %4670 = vperm.xlu1 %9584, %v4639_v34  }
  0x5b   : > { %4673 = vperm.xlu0 %9583, %v4640_v35  }
  0x5c   : > { %4676 = vperm.xlu1 %9584, %v4641_v36  }
  0x5f   : > { %4679 = vperm.xlu0 %9583, %v4642_v37  }
  0x60   : > { %4682 = vperm.xlu1 %9584, %v4643_v38  }
  0x63   : > { %4685 = vperm.xlu0 %9583, %v4644_v39  }
  0x64   : > { %4688 = vperm.xlu1 %9584, %v4645_v40  }
  0x67   : > { %4691 = vperm.xlu0 %9583, %v4646_v46  }
  0x68   : > { %4694 = vperm.xlu1 %9584, %v4647_v48  }
  0x6b   : > { %4649 = vperm.xlu0 %9583, %v4632_v50  }
  0x6c   : > { %4652 = vperm.xlu1 %9584, %v4633_v52  }
  0x6f   : > { %4655 = vperm.xlu0 %9583, %v4634_v53  }
  0x70   : > { %4658 = vperm.xlu1 %9584, %v4635_v54  }
  0x92   : > { %v10269_v2 = vpop.permute.xlu0 %1136 }
  0x93   : > { %v10271_v58 = vpop.permute.xlu1 %1142  ;;  %vm1183_vm3 = vcmp.eq.s32.totalorder %v10269_v2, 1 }
  0x94   : > { %vm1185_vm5 = vcmp.eq.s32.totalorder %v10271_v58, 1 }
  0x96   : > { %v10273_v59 = vpop.permute.xlu0 %1139 }
  0x97   : > { %v10275_v60 = vpop.permute.xlu1 %1145  ;;  %vm1184_vm11 = vcmp.eq.s32.totalorder %v10273_v59, 1 }
  0x98   : > { %vm1186_vm7 = vcmp.eq.s32.totalorder %v10275_v60, 1 }
  0x9a   : > { %v10277_v61 = vpop.permute.xlu0 %1148 }
  0x9b   : > { %v10279_v62 = vpop.permute.xlu1 %1151 }
  0x9e   : > { %v10281_v63 = vpop.permute.xlu0 %1154 }
  0x9f   : > { %v10283_v0 = vpop.permute.xlu1 %1157  ;;  %vm1189_vm1 = vcmp.eq.s32.totalorder %v10281_v63, 1 }
  0xa2   : > { %v10285_v1 = vpop.permute.xlu0 %1160 }
  0xa3   : > { %v10287_v3 = vpop.permute.xlu1 %1163 }
  0xa6   : > { %v10289_v4 = vpop.permute.xlu0 %1166 }
  0xa7   : > { %v10291_v5 = vpop.permute.xlu1 %1169 }
  0xaa   : > { %v10293_v6 = vpop.permute.xlu0 %1172 }
  0xab   : > { %v10295_v7 = vpop.permute.xlu1 %1175 }
  0xae   : > { %v10297_v8 = vpop.permute.xlu0 %1178 }
  0xaf   : > { %v10299_v9 = vpop.permute.xlu1 %1181 }
  0xb2   : > { %v768_v10 = vpop.permute.xlu0 %767 }
  0xb3   : > { %v10301_v11 = vpop.permute.xlu1 %770  ;;  %vm814_vm4 = vcmp.eq.s32.totalorder %v768_v10, 1 }
  0xb4   : > { %vm815_vm14 = vcmp.eq.s32.totalorder %v10301_v11, 1 }
  0xb6   : > { %v774_v12 = vpop.permute.xlu0 %773 }
  0xb7   : > { %v777_v13 = vpop.permute.xlu1 %776  ;;  %vm816_vm6 = vcmp.eq.s32.totalorder %v774_v12, 1 }
  0xb8   : > { %vm817_vm15 = vcmp.eq.s32.totalorder %v777_v13, 1 }
  0xba   : > { %v10303_v14 = vpop.permute.xlu0 %779 }
  0xbb   : > { %v10310_v16 = vpop.permute.xlu1 %782 }
  0xbe   : > { %v10312_v17 = vpop.permute.xlu0 %785 }
  0xbf   : > { %v10324_v39 = vpop.permute.xlu1 %788  ;;  %vm820_vm0 = vcmp.eq.s32.totalorder %v10312_v17, 1 }
  0xc2   : > { %v10329_v43 = vpop.permute.xlu0 %791 }
  0xec   : > { %v8644_v18 = vpop.f32.mrb[0].mxu0  ;;  %v8664_v20 = vpop.f32.mrb[0].mxu1 }
  0xed   : > { %v616_v19 = vadd.f32 %v8644_v18, %v10308_v15  ;;  %v607_v21 = vpop.f32.mrb[1].mxu0  ;;  %v985_v22 = vadd.f32 %v8664_v20, %v10308_v15  ;;  %v976_v24 = vpop.f32.mrb[1].mxu1 }
  0xee   : > { %v608_v23 = vadd.f32 %v10308_v15, %v607_v21  ;;  %v8645_v25 = vpop.f32.mrb[2].mxu0  ;;  %v977_v27 = vadd.f32 %v10308_v15, %v976_v24  ;;  %v8665_v29 = vpop.f32.mrb[2].mxu1 }
  0xef   : > { %vm672_vm8 = vcmp.gt.f32.partialorder %v616_v19, 0.0  ;;  %v688_v26 = vmul.f32 0.2, %v616_v19  ;;  %v619_v28 = vadd.f32 %v8645_v25, %v10308_v15  ;;  %vm1041_vm9 = vcmp.gt.f32.partialorder %v985_v22, 0.0  ;;  %v610_v34 = vpop.f32.mrb[3].mxu0  ;;  %v979_v35 = vpop.f32.mrb[3].mxu1 }
  0xf0   : > { %v1057_v30 = vmul.f32 0.2, %v985_v22  ;;  %vm670_vm10 = vcmp.gt.f32.partialorder %v608_v23, 0.0  ;;  %v686_v31 = vmul.f32 0.2, %v608_v23  ;;  %vm1039_vm12 = vcmp.gt.f32.partialorder %v977_v27, 0.0 }
  0xf1   : > { %v704_v32 = vsel %vm672_vm8, %v616_v19, %v688_v26  ;;  %v1055_v33 = vmul.f32 0.2, %v977_v27  ;;  %vm673_vm13 = vcmp.gt.f32.partialorder %v619_v28, 0.0  ;;  %v689_v38 = vmul.f32 0.2, %v619_v28 }
  0xf2   : > { %v1073_v36 = vsel %vm1041_vm9, %v985_v22, %v1057_v30  ;;  %v702_v37 = vsel %vm670_vm10, %v608_v23, %v686_v31  ;;  %v832_v40 = vsel %vm816_vm6, %v704_v32, 0.0  ;;  %v988_v42 = vadd.f32 %v8665_v29, %v10308_v15  ;;  %v10356_v30 = vpop.permute.xlu1 %794 }
  0xf3   : > { %v1071_v41 = vsel %vm1039_vm12, %v977_v27, %v1055_v33  ;;  %v1201_v44 = vsel %vm1185_vm5, %v1073_v36, 0.0  ;;  %v830_v45 = vsel %vm814_vm4, %v702_v37, 0.0  ;;  %v705_v46 = vsel %vm673_vm13, %v619_v28, %v689_v38  ;;  %v10359_v33 = vpop.permute.xlu0 %797 }
  0xf4   : > { %v611_v47 = vadd.f32 %v10308_v15, %v610_v34  ;;  %v8648_v48 = vpop.f32.mrb[4].mxu0  ;;  %vm818_vm6 = vcmp.eq.s32.totalorder %v10303_v14, 1  ;;  %v833_v49 = vsel %vm817_vm15, %v705_v46, 0.0  ;;  %vm1042_vm8 = vcmp.gt.f32.partialorder %v988_v42, 0.0  ;;  %v8668_v52 = vpop.f32.mrb[4].mxu1 }
  0xf5   : > { %v1058_v50 = vmul.f32 0.2, %v988_v42  ;;  %v980_v51 = vadd.f32 %v10308_v15, %v979_v35  ;;  %v623_v53 = vpop.f32.mrb[5].mxu0  ;;  %v1199_v54 = vsel %vm1183_vm3, %v1071_v41, 0.0  ;;  %v847_v55 = vpack.c.bf16 %v833_v49, %v832_v40  ;;  %v992_v58 = vpop.f32.mrb[5].mxu1 }
  0xf6   : > { %vm671_vm5 = vcmp.gt.f32.partialorder %v611_v47, 0.0  ;;  %v687_v56 = vmul.f32 0.2, %v611_v47  ;;  %v8649_v10 = vpop.f32.mrb[6].mxu0  ;;  %v632_v18 = vadd.f32 %v8648_v48, %v10308_v15  ;;  %v8669_v19 = vpop.f32.mrb[6].mxu1  ;;  %vm1187_vm9 = vcmp.eq.s32.totalorder %v10277_v61, 1 }
  0xf7   : > { %v1074_v12 = vsel %vm1042_vm8, %v988_v42, %v1058_v50  ;;  %vm1040_vm4 = vcmp.gt.f32.partialorder %v980_v51, 0.0  ;;  %v1056_v13 = vmul.f32 0.2, %v980_v51  ;;  %v626_v20 = vpop.f32.mrb[7].mxu0  ;;  %855 = vst.msk [vmem:[#allocation2 + $0x8] sm:$0xff] %vm460_vm2, %v847_v55  ;;  %v1001_v22 = vadd.f32 %v8668_v52, %v10308_v15  ;;  %v995_v24 = vpop.f32.mrb[7].mxu1 }
  0xf8   : > { %v1202_v2 = vsel %vm1186_vm7, %v1074_v12, 0.0  ;;  %v703_v21 = vsel %vm671_vm5, %v611_v47, %v687_v56  ;;  %v624_v23 = vadd.f32 %v10308_v15, %v623_v53  ;;  %vm1190_vm3 = vcmp.eq.s32.totalorder %v10283_v0, 1 }
  0xf9   : > { %vm821_vm10 = vcmp.eq.s32.totalorder %v10324_v39, 1  ;;  %v1216_v25 = vpack.c.bf16 %v1202_v2, %v1201_v44  ;;  %v831_v26 = vsel %vm815_vm14, %v703_v21, 0.0  ;;  %v1072_v27 = vsel %vm1040_vm4, %v980_v51, %v1056_v13  ;;  %v10387_v13 = vpop.permute.xlu1 %800 }
  0xfa   : > { %vm676_vm12 = vcmp.gt.f32.partialorder %v632_v18, 0.0  ;;  %vm819_vm13 = vcmp.eq.s32.totalorder %v10310_v16, 1  ;;  %v846_v60 = vpack.c.bf16 %v831_v26, %v830_v45  ;;  %v1200_v28 = vsel %vm1184_vm11, %v1072_v27, 0.0  ;;  %v9608_v26 = vld [vmem:[%s12630_s7 + $0x8] sm:$0xff]  }
  0xfb   : > { %v692_v29 = vmul.f32 0.2, %v632_v18  ;;  %vm1045_vm7 = vcmp.gt.f32.partialorder %v1001_v22, 0.0  ;;  %1224 = vst.msk [vmem:[#allocation3 + $0x8] sm:$0xff] %vm460_vm2, %v1216_v25  ;;  %v1215_v31 = vpack.c.bf16 %v1200_v28, %v1199_v54  ;;  %v1061_v32 = vmul.f32 0.2, %v1001_v22 }
  0xfc   : > { %vm674_vm15 = vcmp.gt.f32.partialorder %v624_v23, 0.0  ;;  %v690_v11 = vmul.f32 0.2, %v624_v23  ;;  %854 = vst.msk [vmem:[#allocation2] sm:$0xff] %vm460_vm2, %v846_v60  ;;  %v993_v35 = vadd.f32 %v10308_v15, %v992_v58  ;;  %v635_v59 = vadd.f32 %v8649_v10, %v10308_v15  ;;  %v8652_v37 = vpop.f32.mrb[8].mxu0  ;;  %v8672_v44 = vpop.f32.mrb[8].mxu1 }
  0xfd   : > { %v708_v34 = vsel %vm676_vm12, %v632_v18, %v692_v29  ;;  %v1004_v36 = vadd.f32 %v8669_v19, %v10308_v15  ;;  %vm1188_vm11 = vcmp.eq.s32.totalorder %v10279_v62, 1  ;;  %1223 = vst.msk [vmem:[#allocation3] sm:$0xff] %vm460_vm2, %v1215_v31  ;;  %v1077_v40 = vsel %vm1045_vm7, %v1001_v22, %v1061_v32  ;;  %v639_v45 = vpop.f32.mrb[9].mxu0  ;;  %v1008_v49 = vpop.f32.mrb[9].mxu1 }
  0xfe   : > { %v836_v38 = vsel %vm820_vm0, %v708_v34, 0.0  ;;  %v706_v41 = vsel %vm674_vm15, %v624_v23, %v690_v11  ;;  %v627_v42 = vadd.f32 %v10308_v15, %v626_v20  ;;  %vm824_vm14 = vcmp.eq.s32.totalorder %v10359_v33, 1  ;;  %v8653_v54 = vpop.f32.mrb[10].mxu0  ;;  %v10378_v63 = vpop.f32.mrb[10].mxu1  ;;  %v9609_v33 = vld [vmem:[%s12630_s7 + $0x10] sm:$0xff]  }
  0xff   : > { %v1205_v46 = vsel %vm1189_vm1, %v1077_v40, 0.0  ;;  %v834_v47 = vsel %vm818_vm6, %v706_v41, 0.0  ;;  %vm1043_vm8 = vcmp.gt.f32.partialorder %v993_v35, 0.0  ;;  %v1059_v48 = vmul.f32 0.2, %v993_v35  ;;  %v10384_v10 = vpop.f32.mrb[11].mxu0 }
 0x100   : > { %vm677_vm5 = vcmp.gt.f32.partialorder %v635_v59, 0.0  ;;  %v693_v17 = vmul.f32 0.2, %v635_v59  ;;  %vm1046_vm0 = vcmp.gt.f32.partialorder %v1004_v36, 0.0  ;;  %v1062_v50 = vmul.f32 0.2, %v1004_v36 }
 0x101   : > { %vm1193_vm4 = vcmp.eq.s32.totalorder %v10289_v4, 1  ;;  %v1075_v51 = vsel %vm1043_vm8, %v993_v35, %v1059_v48  ;;  %vm675_vm12 = vcmp.gt.f32.partialorder %v627_v42, 0.0  ;;  %v691_v52 = vmul.f32 0.2, %v627_v42  ;;  %v1011_v12 = vpop.f32.mrb[11].mxu1 }
 0x102   : > { %v996_v53 = vadd.f32 %v10308_v15, %v995_v24  ;;  %vm822_vm1 = vcmp.eq.s32.totalorder %v10329_v43, 1  ;;  %v1203_v14 = vsel %vm1187_vm9, %v1075_v51, 0.0  ;;  %v709_v55 = vsel %vm677_vm5, %v635_v59, %v693_v17  ;;  %v10414_v29 = vld [vmem:[#allocation3 + $0x8] sm:$0xff] }
 0x103   : > { %v1078_v56 = vsel %vm1046_vm0, %v1004_v36, %v1062_v50  ;;  %v648_v58 = vadd.f32 %v8652_v37, %v10308_v15  ;;  %vm1191_vm6 = vcmp.eq.s32.totalorder %v10285_v1, 1  ;;  %v837_v18 = vsel %vm821_vm10, %v709_v55, 0.0  ;;  %v9610_v1 = vld [vmem:[%s12630_s7 + $0x18] sm:$0xff]  }
 0x104   : > { %v1206_v19 = vsel %vm1190_vm3, %v1078_v56, 0.0  ;;  %v707_v61 = vsel %vm675_vm12, %v627_v42, %v691_v52  ;;  %vm1044_vm9 = vcmp.gt.f32.partialorder %v996_v53, 0.0  ;;  %vm825_vm7 = vcmp.eq.s32.totalorder %v10387_v13, 1  ;;  %v10398_v25 = vld [vmem:[#allocation3] sm:$0xff]  ;;  %v10400_v0 = vpop.f32.mrb[12].mxu0  ;;  %v8676_v31 = vpop.f32.mrb[12].mxu1 }
 0x105   : > { %v849_v20 = vpack.c.bf16 %v837_v18, %v836_v38  ;;  %v1218_v2 = vpack.c.bf16 %v1206_v19, %v1205_v46  ;;  %v835_v21 = vsel %vm819_vm13, %v707_v61, 0.0  ;;  %v1060_v22 = vmul.f32 0.2, %v996_v53  ;;  %8686 = vmatprep.mubr.msk.bf16.mxu0 %vm460_vm2, %v10398_v25  ;;  %v655_v32 = vpop.f32.mrb[13].mxu0  ;;  %v10423_v59 = vpop.f32.mrb[13].mxu1 }
 0x106   : > { %v848_v23 = vpack.c.bf16 %v835_v21, %v834_v47  ;;  %vm680_vm15 = vcmp.gt.f32.partialorder %v648_v58, 0.0  ;;  %v696_v24 = vmul.f32 0.2, %v648_v58  ;;  %v1017_v39 = vadd.f32 %v8672_v44, %v10308_v15  ;;  %8687 = vmatmul.mubr.msk.bf16.vlgmr.msra.gmra.mrb[16].mxu0 %vm460_vm2, %v10414_v29  ;;  %v10425_v36 = vpop.f32.mrb[14].mxu0  ;;  %v10431_v40 = vpop.f32.mrb[14].mxu1 }
 0x107   : > { %vm1194_vm3 = vcmp.eq.s32.totalorder %v10291_v5, 1  ;;  %857 = vst.msk [vmem:[#allocation2 + $0x18] sm:$0xff] %vm460_vm2, %v849_v20  ;;  %1226 = vst.msk [vmem:[#allocation3 + $0x18] sm:$0xff] %vm460_vm2, %v1218_v2  ;;  %v1076_v16 = vsel %vm1044_vm9, %v996_v53, %v1060_v22  ;;  %v640_v27 = vadd.f32 %v10308_v15, %v639_v45  ;;  %v1009_v60 = vadd.f32 %v10308_v15, %v1008_v49  ;;  %v10433_v41 = vpop.f32.mrb[15].mxu0  ;;  %v10435_v45 = vpop.f32.mrb[15].mxu1 }
 0x108   : > { %v651_v28 = vadd.f32 %v8653_v54, %v10308_v15  ;;  %vm823_vm10 = vcmp.eq.s32.totalorder %v10356_v30, 1  ;;  %856 = vst.msk [vmem:[#allocation2 + $0x10] sm:$0xff] %vm460_vm2, %v848_v23  ;;  %v1204_v11 = vsel %vm1188_vm11, %v1076_v16, 0.0  ;;  %v712_v34 = vsel %vm680_vm15, %v648_v58, %v696_v24  ;;  %8703 = vmatpush3.bf16.msra.mxu0 %v10266_v57  ;;  %v10452_v54 = vpop.permute.xlu0 %803  ;;  %v10482_v30 = vld [vmem:[%s12630_s7 + $0x40] sm:$0xff]  }
 0x109   : > { %vm1049_vm13 = vcmp.gt.f32.partialorder %v1017_v39, 0.0  ;;  %v1065_v35 = vmul.f32 0.2, %v1017_v39  ;;  %vm1192_vm8 = vcmp.eq.s32.totalorder %v10287_v3, 1  ;;  %v1217_v37 = vpack.c.bf16 %v1204_v11, %v1203_v14  ;;  %8704 = vmatprep.subr.bf16.mxu0 %v9608_v26  ;;  %v10454_v14 = vpop.permute.xlu1 %806 }
 0x10a   : > { %v840_v38 = vsel %vm824_vm14, %v712_v34, 0.0  ;;  %vm678_vm5 = vcmp.gt.f32.partialorder %v640_v27, 0.0  ;;  %v694_v62 = vmul.f32 0.2, %v640_v27  ;;  %vm1047_vm11 = vcmp.gt.f32.partialorder %v1009_v60, 0.0 }
 0x10b   : > { %v1081_v42 = vsel %vm1049_vm13, %v1017_v39, %v1065_v35  ;;  %v1063_v44 = vmul.f32 0.2, %v1009_v60  ;;  %vm681_vm0 = vcmp.gt.f32.partialorder %v651_v28, 0.0  ;;  %1225 = vst.msk [vmem:[#allocation3 + $0x10] sm:$0xff] %vm460_vm2, %v1217_v37  ;;  %v697_v47 = vmul.f32 0.2, %v651_v28 }
 0x10c   : > { %v1209_v57 = vsel %vm1193_vm4, %v1081_v42, 0.0  ;;  %v710_v46 = vsel %vm678_vm5, %v640_v27, %v694_v62  ;;  %v1020_v48 = vadd.f32 %v10378_v63, %v10308_v15  ;;  %v643_v50 = vadd.f32 %v10308_v15, %v10384_v10  ;;  %8705 = vmatpush3.bf16.msra.mxu0 %v9608_v26  ;;  %v810_v26 = vpop.permute.xlu0 %809 }
 0x10d   : > { %v838_v49 = vsel %vm822_vm1, %v710_v46, 0.0  ;;  %v1079_v17 = vsel %vm1047_vm11, %v1009_v60, %v1063_v44  ;;  %v1012_v51 = vadd.f32 %v10308_v15, %v1011_v12  ;;  %v713_v53 = vsel %vm681_vm0, %v651_v28, %v697_v47  ;;  %8706 = vmatprep.subr.bf16.mxu0 %v9609_v33  ;;  %v813_v16 = vpop.permute.xlu1 %812 }
 0x10e   : > { %v1207_v52 = vsel %vm1191_vm6, %v1079_v17, 0.0  ;;  %vm1050_vm14 = vcmp.gt.f32.partialorder %v1020_v48, 0.0  ;;  %v1066_v4 = vmul.f32 0.2, %v1020_v48  ;;  %v841_v43 = vsel %vm825_vm7, %v713_v53, 0.0  ;;  %v10487_v3 = vld [vmem:[#allocation3 + $0x18] sm:$0xff] }
 0x10f   : > { %vm679_vm4 = vcmp.gt.f32.partialorder %v643_v50, 0.0  ;;  %v695_v63 = vmul.f32 0.2, %v643_v50  ;;  %vm1048_vm12 = vcmp.gt.f32.partialorder %v1012_v51, 0.0  ;;  %vm1197_vm1 = vcmp.eq.s32.totalorder %v10297_v8, 1 }
 0x110   : > { %v851_v55 = vpack.c.bf16 %v841_v43, %v840_v38  ;;  %v1082_v56 = vsel %vm1050_vm14, %v1020_v48, %v1066_v4  ;;  %v1064_v58 = vmul.f32 0.2, %v1012_v51  ;;  %v664_v10 = vadd.f32 %v10400_v0, %v10308_v15  ;;  %8707 = vmatpush3.bf16.msra.mxu0 %v9609_v33  ;;  %v10538_v4 = vld [vmem:[#allocation2] sm:$0xff]  ;;  %v9612_v43 = vld [vmem:[%s12630_s7 + $0x48] sm:$0xff]  }
 0x111   : > { %vm826_vm6 = vcmp.eq.s32.totalorder %v10452_v54, 1  ;;  %v1210_v12 = vsel %vm1194_vm3, %v1082_v56, 0.0  ;;  %v711_v13 = vsel %vm679_vm4, %v643_v50, %v695_v63  ;;  %v1033_v18 = vadd.f32 %v8676_v31, %v10308_v15  ;;  %8708 = vmatprep.subr.bf16.mxu0 %v9610_v1  ;;  %v10542_v54 = vld [vmem:[#allocation2 + $0x8] sm:$0xff] }
 0x112   : > { %v656_v19 = vadd.f32 %v10308_v15, %v655_v32  ;;  %vm1198_vm9 = vcmp.eq.s32.totalorder %v10299_v9, 1  ;;  %859 = vst.msk [vmem:[#allocation2 + $0x28] sm:$0xff] %vm460_vm2, %v851_v55  ;;  %v1220_v61 = vpack.c.bf16 %v1210_v12, %v1209_v57  ;;  %v839_v20 = vsel %vm823_vm10, %v711_v13, 0.0  ;;  %v10477_v23 = vld [vmem:[#allocation3 + $0x10] sm:$0xff]  ;;  %v10553_v55 = vld [vmem:[#allocation2 + $0x18] sm:$0xff] }
 0x113   : > { %v1080_v2 = vsel %vm1048_vm12, %v1012_v51, %v1064_v58  ;;  %vm684_vm7 = vcmp.gt.f32.partialorder %v664_v10, 0.0  ;;  %vm827_vm15 = vcmp.eq.s32.totalorder %v10454_v14, 1  ;;  %v850_v5 = vpack.c.bf16 %v839_v20, %v838_v49  ;;  %8690 = vmatprep.mubr.msk.bf16.mxu0 %vm460_vm2, %v10477_v23  ;;  %v10544_v14 = vld [vmem:[#allocation2 + $0x10] sm:$0xff] }
 0x114   : > { %v1208_v21 = vsel %vm1192_vm8, %v1080_v2, 0.0  ;;  %v700_v22 = vmul.f32 0.2, %v664_v10  ;;  %vm1053_vm3 = vcmp.gt.f32.partialorder %v1033_v18, 0.0  ;;  %1228 = vst.msk [vmem:[#allocation3 + $0x28] sm:$0xff] %vm460_vm2, %v1220_v61  ;;  %vm682_vm10 = vcmp.gt.f32.partialorder %v656_v19, 0.0  ;;  %8691 = vmatmul.mubr.msk.bf16.gmra.mrb[20].mxu0 %vm460_vm2, %v10487_v3 }
 0x115   : > { %v1219_v24 = vpack.c.bf16 %v1208_v21, %v1207_v52  ;;  %v1069_v39 = vmul.f32 0.2, %v1033_v18  ;;  %v698_v0 = vmul.f32 0.2, %v656_v19  ;;  %858 = vst.msk [vmem:[#allocation2 + $0x20] sm:$0xff] %vm460_vm2, %v850_v5  ;;  %v1025_v60 = vadd.f32 %v10308_v15, %v10423_v59  ;;  %8709 = vmatpush3.bf16.msra.mxu0 %v9610_v1 }
 0x116   : > { %v716_v27 = vsel %vm684_vm7, %v664_v10, %v700_v22  ;;  %v667_v28 = vadd.f32 %v10425_v36, %v10308_v15  ;;  %v1036_v31 = vadd.f32 %v10431_v40, %v10308_v15  ;;  %vm828_vm13 = vcmp.eq.s32.totalorder %v810_v26, 1  ;;  %8726 = vmatprep.subr.bf16.mxu0 %v10482_v30  ;;  %v9613_v10 = vld [vmem:[%s12630_s7 + $0x50] sm:$0xff]  }
 0x117   : > { %vm829_vm8 = vcmp.eq.s32.totalorder %v813_v16, 1  ;;  %1227 = vst.msk [vmem:[#allocation3 + $0x20] sm:$0xff] %vm460_vm2, %v1219_v24  ;;  %v1085_v32 = vsel %vm1053_vm3, %v1033_v18, %v1069_v39  ;;  %v659_v11 = vadd.f32 %v10308_v15, %v10433_v41  ;;  %v844_v34 = vsel %vm828_vm13, %v716_v27, 0.0 }
 0x118   : > { %v714_v35 = vsel %vm682_vm10, %v656_v19, %v698_v0  ;;  %vm1051_vm5 = vcmp.gt.f32.partialorder %v1025_v60, 0.0  ;;  %v1067_v59 = vmul.f32 0.2, %v1025_v60  ;;  %vm685_vm11 = vcmp.gt.f32.partialorder %v667_v28, 0.0 }
 0x119   : > { %v701_v36 = vmul.f32 0.2, %v667_v28  ;;  %vm1054_vm0 = vcmp.gt.f32.partialorder %v1036_v31, 0.0  ;;  %v1070_v37 = vmul.f32 0.2, %v1036_v31  ;;  %v1213_v38 = vsel %vm1197_vm1, %v1085_v32, 0.0 }
 0x11a   : > { %vm683_vm14 = vcmp.gt.f32.partialorder %v659_v11, 0.0  ;;  %v699_v62 = vmul.f32 0.2, %v659_v11  ;;  %v1028_v40 = vadd.f32 %v10308_v15, %v10435_v45  ;;  %v842_v41 = vsel %vm826_vm6, %v714_v35, 0.0  ;;  %v10564_v12 = vld [vmem:[#allocation2 + $0x28] sm:$0xff] }
 0x11b   : > { %v1083_v42 = vsel %vm1051_vm5, %v1025_v60, %v1067_v59  ;;  %v717_v44 = vsel %vm685_vm11, %v667_v28, %v701_v36  ;;  %v1086_v33 = vsel %vm1054_vm0, %v1036_v31, %v1070_v37  ;;  %vm1195_vm12 = vcmp.eq.s32.totalorder %v10293_v6, 1  ;;  %v10524_v50 = vld [vmem:[#allocation3 + $0x28] sm:$0xff] }
 0x11c   : > { %v845_v57 = vsel %vm829_vm8, %v717_v44, 0.0  ;;  %v1214_v46 = vsel %vm1198_vm9, %v1086_v33, 0.0  ;;  %v715_v47 = vsel %vm683_vm14, %v659_v11, %v699_v62  ;;  %vm1052_vm4 = vcmp.gt.f32.partialorder %v1028_v40, 0.0  ;;  %v10559_v58 = vld [vmem:[#allocation2 + $0x20] sm:$0xff]  ;;  %v9614_v28 = vld [vmem:[%s12630_s7 + $0x58] sm:$0xff]  }
 0x11d   : > { %v853_v8 = vpack.c.bf16 %v845_v57, %v844_v34  ;;  %v1222_v48 = vpack.c.bf16 %v1214_v46, %v1213_v38  ;;  %v843_v49 = vsel %vm827_vm15, %v715_v47, 0.0  ;;  %v1068_v17 = vmul.f32 0.2, %v1028_v40  ;;  %v10620_v46 = vld [vmem:[%s12630_s7 + $0x60] sm:$0xff]  }
 0x11e   : > { %v852_v15 = vpack.c.bf16 %v843_v49, %v842_v41  ;;  %v10516_v45 = vld [vmem:[#allocation3 + $0x20] sm:$0xff]  ;;  %vm1196_vm1 = vcmp.eq.s32.totalorder %v10295_v7, 1  ;;  %v1211_v51 = vsel %vm1195_vm12, %v1083_v42, 0.0  ;;  %v1576_v63 = vshll.u32 %v10538_v4, 16 }
 0x11f   : > { %861 = vst.msk [vmem:[#allocation2 + $0x38] sm:$0xff] %vm460_vm2, %v853_v8  ;;  %1230 = vst.msk [vmem:[#allocation3 + $0x38] sm:$0xff] %vm460_vm2, %v1222_v48  ;;  %v1084_v9 = vsel %vm1052_vm4, %v1028_v40, %v1068_v17  ;;  %8694 = vmatprep.mubr.msk.bf16.mxu0 %vm460_vm2, %v10516_v45  ;;  %v1581_v1 = vshll.u32 %v10542_v54, 16  ;;  %v1593_v56 = vshrl.u32 %v10544_v14, 16  ;;  %v1574_v13 = vshrl.u32 %v10538_v4, 16 }
 0x120   : > { %860 = vst.msk [vmem:[#allocation2 + $0x30] sm:$0xff] %vm460_vm2, %v852_v15  ;;  %v1212_v52 = vsel %vm1196_vm1, %v1084_v9, 0.0  ;;  %8695 = vmatmul.mubr.msk.bf16.gmra.mrb[24].mxu0 %vm460_vm2, %v10524_v50  ;;  %v1585_v18 = vshrl.u32 %v10542_v54, 16  ;;  %v1589_v19 = vshll.u32 %v10544_v14, 16  ;;  %v10573_v2 = vrot.slane %v1576_v63, 1 }
 0x121   : > { %v1221_v6 = vpack.c.bf16 %v1212_v52, %v1211_v51  ;;  %v10575_v5 = vrot.slane %v1581_v1, 1  ;;  %v1597_v21 = vshll.u32 %v10553_v55, 16  ;;  %v12638_v22 = vshrl.u32 %v10477_v23, 16 }
 0x122   : > { %vm2456_vm6 = vsmask.f32 3328  ;;  %v1601_v24 = vshrl.u32 %v10553_v55, 16  ;;  %v1605_v39 = vshll.u32 %v10559_v58, 16  ;;  %v1609_v0 = vshrl.u32 %v10559_v58, 16 }
 0x123   : > { %1229 = vst.msk [vmem:[#allocation3 + $0x30] sm:$0xff] %vm460_vm2, %v1221_v6  ;;  %v1613_v26 = vshll.u32 %v10564_v12, 16  ;;  %v12656_v16 = vshrl.u32 %v10564_v12, 16  ;;  %v12641_v27 = vshll.u32 %v10414_v29, 16  ;;  %v12637_v60 = vshrl.u32 %v10414_v29, 16 }
 0x124   : > { %v12640_v34 = vshll.u32 %v10477_v23, 16  ;;  %v12644_v59 = vshll.u32 %v10487_v3, 16  ;;  %v2685_v36 = vrot.slane %v12638_v22, 4  ;;  %v12639_v37 = vshrl.u32 %v10487_v3, 16 }
 0x125   : > { %v12643_v38 = vshll.u32 %v10516_v45, 16  ;;  %v2465_v62 = vrot.slane %v1585_v18, 4  ;;  %v2466_v40 = vrot.slane %v1581_v1, 5  ;;  %v2470_v41 = vrot.slane %v1589_v19, 5 }
 0x126   : > { %v10534_v53 = vld [vmem:[#allocation3 + $0x38] sm:$0xff]  ;;  %v10571_v20 = vld [vmem:[#allocation2 + $0x38] sm:$0xff]  ;;  %v2473_v42 = vrot.slane %v1601_v24, 4  ;;  %v2474_v44 = vrot.slane %v1597_v21, 5  ;;  %v2477_v33 = vrot.slane %v1609_v0, 4  ;;  %v2478_v57 = vrot.slane %v1605_v39, 5 }
 0x127   : > { %v10569_v61 = vld [vmem:[#allocation2 + $0x30] sm:$0xff]  ;;  %v12653_v32 = vshll.u32 %v10571_v20, 16  ;;  %v12651_v11 = vshrl.u32 %v10571_v20, 16  ;;  %v12642_v47 = vshrl.u32 %v10516_v45, 16  ;;  %v10623_v8 = vor.u32 %v2466_v40, %v2465_v62 }
 0x128   : > { %v1621_v31 = vshll.u32 %v10569_v61, 16  ;;  %v12654_v35 = vshrl.u32 %v10569_v61, 16  ;;  %v2481_v49 = vrot.slane %v12656_v16, 4  ;;  %v2475_v17 = vor.u32 %v2474_v44, %v2473_v42 }
 0x129   : > { %v2479_v15 = vor.u32 %v2478_v57, %v2477_v33  ;;  %v2482_v9 = vrot.slane %v1613_v26, 5  ;;  %v12650_v52 = vshll.u32 %v10524_v50, 16  ;;  %v2489_v63 = vrot.slane %v12651_v11, 4 }
 0x12a   : > { %v10530_v7 = vld [vmem:[#allocation3 + $0x30] sm:$0xff]  ;;  %v2485_v51 = vrot.slane %v12654_v35, 4  ;;  %vm1572_vm9 = vsmask.f32 7424  ;;  %v2490_v62 = vrot.slane %v12653_v32, 5  ;;  %v12645_v40 = vshrl.u32 %v10524_v50, 16 }
 0x12b   : > { %8698 = vmatprep.mubr.msk.bf16.mxu0 %vm460_vm2, %v10530_v7  ;;  %v2682_v57 = vrot.slane %v12641_v27, 5  ;;  %v1591_v22 = vrot.slane %v1589_v19, 1  ;;  %vm2069_vm7 = vcmask 1043456  }
 0x12c   : > { %8699 = vmatmul.mubr.msk.bf16.gmra.mrb[28].mxu0 %vm460_vm2, %v10534_v53  ;;  %v10660_v33 = vor.u32 %v2490_v62, %v2489_v63 }
 0x12d   : > { %8710 = vmatprep.mubr.msk.bf16.mxu0 %vm460_vm2, %v10538_v4 }
 0x134   : > { %8711 = vmatmul.mubr.msk.bf16.vlgmr.msra.gmra.mrb[16].mxu0 %vm460_vm2, %v10542_v54 }
 0x135   : > { %8727 = vmatpush3.bf16.msra.mxu0 %v10482_v30  ;;  %8714 = vmatprep.mubr.msk.bf16.mxu0 %vm460_vm2, %v10544_v14  ;;  %v2469_v30 = vrot.slane %v1593_v56, 4 }
 0x136   : > { %8728 = vmatprep.subr.bf16.mxu0 %v9612_v43 }
 0x137   : > { %v10625_v48 = vor.u32 %v2470_v41, %v2469_v30  ;;  %v2483_v30 = vor.u32 %v2482_v9, %v2481_v49  ;;  %v12646_v41 = vshrl.u32 %v10530_v7, 16  ;;  %v2686_v49 = vrot.slane %v12640_v34, 5 }
 0x138   : > { %v12648_v9 = vshll.u32 %v10534_v53, 16  ;;  %v2694_v34 = vrot.slane %v12643_v38, 5 }
 0x139   : > { %8729 = vmatpush3.bf16.msra.mxu0 %v9612_v43  ;;  %12681 = vst [vmem:[#allocation6_spill] sm:$0xff] %v10625_v48  ;;  %v10637_v6 = vsel %vm2456_vm6, %v10623_v8, %v10625_v48  ;;  %v2486_v43 = vrot.slane %v1621_v31, 5  ;;  %v10645_v1 = vsel %vm2456_vm6, %v10625_v48, %v2475_v17  ;;  %v10658_v44 = vsel %vm2456_vm6, %v2479_v15, %v2483_v30  ;;  %v1562_v48 = vld [vmem:[#allocation2 + $0x40] sm:$0x1] }
 0x13a   : > { %8730 = vmatprep.subr.bf16.mxu0 %v9613_v10  ;;  %v2701_v19 = vrot.slane %v12646_v41, 4  ;;  %v3231_v41 = vor.u32 %v1585_v18, %v10575_v5 }
 0x13b   : > { %v2487_v42 = vor.u32 %v2486_v43, %v2485_v51  ;;  %v12647_v43 = vshrl.u32 %v10534_v53, 16 }
 0x13c   : > { %8715 = vmatmul.mubr.msk.bf16.gmra.mrb[20].mxu0 %vm460_vm2, %v10553_v55 }
 0x13d   : > { %8718 = vmatprep.mubr.msk.bf16.mxu0 %vm460_vm2, %v10559_v58  ;;  %8731 = vmatpush3.bf16.msra.mxu0 %v9613_v10  ;;  %v10648_v10 = vsel %vm2456_vm6, %v2475_v17, %v2479_v15  ;;  %v12649_v17 = vshll.u32 %v10530_v7, 16  ;;  %v10671_v51 = vsel %vm2456_vm6, %v2483_v30, %v2487_v42  ;;  %v2689_v15 = vrot.slane %v12639_v37, 4 }
 0x13e   : > { %8732 = vmatprep.subr.bf16.mxu0 %v9614_v28  ;;  %v10680_v63 = vsel %vm2456_vm6, %v2487_v42, %v10660_v33  ;;  %v2690_v30 = vrot.slane %v12644_v59, 5  ;;  %v2693_v37 = vrot.slane %v12642_v47, 4  ;;  %v2697_v42 = vrot.slane %v12645_v40, 4 }
 0x13f   : > { %v2702_v47 = vrot.slane %v12649_v17, 5  ;;  %v2705_v59 = vrot.slane %v12647_v43, 4  ;;  %v2706_v40 = vrot.slane %v12648_v9, 5 }
 0x141   : > { %8733 = vmatpush3.bf16.msra.mxu0 %v9614_v28  ;;  %v2681_v28 = vrot.slane %v12637_v60, 4  ;;  %v2687_v60 = vor.u32 %v2686_v49, %v2685_v36  ;;  %v2698_v36 = vrot.slane %v12650_v52, 5  ;;  %v2695_v49 = vor.u32 %v2694_v34, %v2693_v37 }
 0x142   : > { %8750 = vmatprep.subr.bf16.mxu0 %v10620_v46  ;;  %v10723_v37 = vor.u32 %v2706_v40, %v2705_v59  ;;  %v1595_v59 = vor.u32 %v1593_v56, %v1591_v22  ;;  %v1599_v40 = vrot.slane %v1597_v21, 1 }
 0x143   : > { %v10682_v62 = vor.u32 %v2682_v57, %v2681_v28  ;;  %v1579_v28 = vor.u32 %v10573_v2, %v1574_v13  ;;  %v2691_v57 = vor.u32 %v2690_v30, %v2689_v15  ;;  %v2699_v38 = vor.u32 %v2698_v36, %v2697_v42  ;;  %v10751_v30 = vld [vmem:[#allocation3 + $0x18] sm:$0xff]  ;;  %v10753_v42 = vld [vmem:[#allocation3 + $0x20] sm:$0xff] }
 0x144   : > { %8719 = vmatmul.mubr.msk.bf16.gmra.mrb[24].mxu0 %vm460_vm2, %v10564_v12  ;;  %v2703_v2 = vor.u32 %v2702_v47, %v2701_v19  ;;  %v10726_v15 = vsel %vm1572_vm9, %v3231_v41, %v1591_v22  ;;  %v1607_v41 = vrot.slane %v1605_v39, 1  ;;  %12682 = vst [vmem:[#allocation7_spill] sm:$0xff] %v10751_v30  ;;  %12683 = vst [vmem:[#allocation8_spill] sm:$0xff] %v10753_v42  ;;  %v10762_v22 = vld [vmem:[#allocation3 + $0x28] sm:$0xff]  ;;  %v10764_v39 = vld [vmem:[#allocation3 + $0x30] sm:$0xff]  ;;  %v1615_v19 = vrot.slane %v1613_v26, 1 }
 0x145   : > { %8722 = vmatprep.mubr.msk.bf16.mxu0 %vm460_vm2, %v10569_v61  ;;  %v10694_v27 = vsel %vm2456_vm6, %v10682_v62, %v2687_v60  ;;  %v10715_v4 = vsel %vm2456_vm6, %v2687_v60, %v2691_v57  ;;  %v10718_v13 = vsel %vm2456_vm6, %v2691_v57, %v2695_v49  ;;  %v10721_v34 = vsel %vm2456_vm6, %v2695_v49, %v2699_v38 }
 0x146   : > { %v1584_v18 = vsel %vm1572_vm9, %v1579_v28, %v10575_v5  ;;  %v10733_v60 = vsel %vm2456_vm6, %v2699_v38, %v2703_v2  ;;  %v10738_v47 = vsel %vm2456_vm6, %v2703_v2, %v10723_v37  ;;  %v9616_v5 = vld [vmem:[%s12630_s7 + $0x68] sm:$0xff]   ;;  %v10749_v38 = vld [vmem:[#allocation3 + $0x10] sm:$0xff]  ;;  %v10758_v56 = vsel %vm1572_vm9, %v1595_v59, %v1599_v40  ;;  %12684 = vst [vmem:[#allocation9_spill] sm:$0xff] %v10762_v22 }
 0x147   : > { %v1603_v21 = vor.u32 %v1601_v24, %v1599_v40  ;;  %v1611_v36 = vor.u32 %v1609_v0, %v1607_v41  ;;  %v10773_v28 = vld [vmem:[#allocation3 + $0x38] sm:$0xff]  ;;  %v12652_v24 = vrot.slane %v10749_v38, 4  ;;  %v12655_v49 = vshrl.u32 %v10751_v30, 16 }
 0x148   : > { %v3922_v0 = vrot.slane %v10751_v30, 4  ;;  %v3924_v2 = vrot.slane %v10753_v42, 4  ;;  %v12659_v26 = vshll.u32 %v10749_v38, 16  ;;  %v3926_v59 = vrot.slane %v10762_v22, 4 }
 0x149   : > { %v10777_v57 = vsel %vm1572_vm9, %v1603_v21, %v1607_v41  ;;  %v3928_v40 = vrot.slane %v10764_v39, 4  ;;  %v12660_v41 = vshll.u32 %v10751_v30, 16  ;;  %v12657_v9 = vrot.slane %v10773_v28, 4 }
 0x14a   : > { %v10793_v21 = vsel %vm2069_vm7, %v12652_v24, %v3922_v0  ;;  %v10796_v43 = vsel %vm2069_vm7, %v3922_v0, %v3924_v2  ;;  %v10800_v17 = vsel %vm1572_vm9, %v1611_v36, %v1615_v19  ;;  %v10803_v52 = vsel %vm2069_vm7, %v3924_v2, %v3926_v59  ;;  %v9618_v0 = vld [vmem:[%s12630_s7 + $0x78] sm:$0xff]  }
 0x14b   : > { %12685 = vst [vmem:[#allocation10_spill] sm:$0xff] %v10793_v21  ;;  %12686 = vst [vmem:[#allocation11_spill] sm:$0xff] %v10796_v43  ;;  %v10806_v11 = vsel %vm2069_vm7, %v3926_v59, %v3928_v40  ;;  %v1623_v24 = vrot.slane %v1621_v31, 1  ;;  %v12662_v36 = vshrl.u32 %v10753_v42, 16  ;;  %v10819_v2 = vsel %vm2069_vm7, %v3928_v40, %v12657_v9 }
 0x14c   : > { %8723 = vmatmul.mubr.msk.bf16.gmra.mrb[28].mxu0 %vm460_vm2, %v10571_v20  ;;  %12687 = vst [vmem:[#allocation12_spill] sm:$0xff] %v10803_v52  ;;  %12688 = vst [vmem:[#allocation13_spill] sm:$0xff] %v10806_v11  ;;  %v4332_v16 = vrot.slane %v12659_v26, 5  ;;  %v4336_v40 = vrot.slane %v12660_v41, 5  ;;  %v12691_v59 = vshrl.u32 %v10564_v12, 16  ;;  %v1823_v9 = vshll.u32 %v10398_v25, 16 }
 0x14d   : > { %8734 = vmatprep.mubr.msk.bf16.mxu0 %vm460_vm2, %v1584_v18  ;;  %v12658_v18 = vshrl.u32 %v10749_v38, 16  ;;  %12689 = vst [vmem:[#allocation14_spill] sm:$0xff] %v10819_v2  ;;  %v4339_v41 = vrot.slane %v12662_v36, 4  ;;  %v12692_v32 = vshll.u32 %v10753_v42, 16  ;;  %v12693_v2 = vshrl.u32 %v10762_v22, 16 }
 0x14e   : > { %v12694_v52 = vshrl.u32 %v10569_v61, 16  ;;  %v1637_v30 = vshll.u32 %v1562_v48, 16 }
 0x14f   : > { %v4340_v31 = vrot.slane %v12692_v32, 5  ;;  %v4343_v11 = vrot.slane %v12693_v2, 4  ;;  %v12698_v32 = vshll.u32 %v10764_v39, 16  ;;  %v12699_v2 = vshrl.u32 %v10773_v28, 16 }
 0x151   : > { %v4341_v36 = vor.u32 %v4340_v31, %v4339_v41  ;;  %v4348_v43 = vrot.slane %v12698_v32, 5  ;;  %v4351_v21 = vrot.slane %v12699_v2, 4  ;;  %v1825_v32 = vrot.slane %v1823_v9, 1 }
 0x152   : > { %v1639_v9 = vrot.slane %v1637_v30, 1  ;;  %v12710_v30 = vshrl.u32 %v10414_v29, 16 }
 0x154   : > { %8735 = vmatmul.mubr.msk.bf16.vlgmr.msra.gmra.mrb[16].mxu0 %vm460_vm2, %v10726_v15 }
 0x155   : > { %8751 = vmatpush3.bf16.msra.mxu0 %v10620_v46  ;;  %8738 = vmatprep.mubr.msk.bf16.mxu0 %vm460_vm2, %v10758_v56  ;;  %v9617_v46 = vld [vmem:[%s12630_s7 + $0x70] sm:$0xff]  }
 0x156   : > { %8752 = vmatprep.subr.bf16.mxu0 %v9616_v5 }
 0x159   : > { %8753 = vmatpush3.bf16.msra.mxu0 %v9616_v5  ;;  %v4335_v5 = vrot.slane %v12655_v49, 4  ;;  %v4331_v49 = vrot.slane %v12658_v18, 4  ;;  %v9619_v18 = vld [vmem:[%s12630_s7 + $0x80] sm:$0xff]  }
 0x15a   : > { %8754 = vmatprep.subr.bf16.mxu0 %v9617_v46 }
 0x15b   : > { %v10841_v35 = vor.u32 %v4332_v16, %v4331_v49  ;;  %v4337_v26 = vor.u32 %v4336_v40, %v4335_v5  ;;  %v1627_v16 = vor.u32 %v12694_v52, %v1623_v24  ;;  %v12696_v5 = vshll.u32 %v10762_v22, 16 }
 0x15c   : > { %8739 = vmatmul.mubr.msk.bf16.gmra.mrb[20].mxu0 %vm460_vm2, %v10777_v57  ;;  %v12700_v52 = vshll.u32 %v10773_v28, 16 }
 0x15d   : > { %8742 = vmatprep.mubr.msk.bf16.mxu0 %vm460_vm2, %v10800_v17  ;;  %8755 = vmatpush3.bf16.msra.mxu0 %v9617_v46  ;;  %12690 = vst [vmem:[#allocation15_spill] sm:$0xff] %v10841_v35  ;;  %v1619_v46 = vor.u32 %v12691_v59, %v1615_v19  ;;  %v10856_v49 = vsel %vm2456_vm6, %v10841_v35, %v4337_v26  ;;  %v4344_v40 = vrot.slane %v12696_v5, 5  ;;  %v12697_v19 = vshrl.u32 %v10764_v39, 16 }
 0x15e   : > { %8756 = vmatprep.subr.bf16.mxu0 %v9618_v0  ;;  %12695 = vst [vmem:[#allocation16_spill] sm:$0xff] %v10856_v49  ;;  %v4352_v42 = vrot.slane %v12700_v52, 5  ;;  %v12701_v35 = vshll.u32 %v10571_v20, 16  ;;  %v10874_v41 = vsel %vm2456_vm6, %v4337_v26, %v4341_v36  ;;  %v12711_v52 = vshll.u32 %v10487_v3, 16 }
 0x15f   : > { %v4347_v59 = vrot.slane %v12697_v19, 4  ;;  %v4345_v5 = vor.u32 %v4344_v40, %v4343_v11  ;;  %v10871_v22 = vsel %vm1572_vm9, %v1619_v46, %v1623_v24  ;;  %v12708_v40 = vshll.u32 %v10477_v23, 16 }
 0x160   : > { %v1631_v49 = vrot.slane %v12701_v35, 1  ;;  %v10876_v31 = vor.u32 %v4352_v42, %v4351_v21  ;;  %v12706_v42 = vshrl.u32 %v10571_v20, 16  ;;  %v12707_v21 = vshll.u32 %v10414_v29, 16 }
 0x161   : > { %8757 = vmatpush3.bf16.msra.mxu0 %v9618_v0  ;;  %v4349_v0 = vor.u32 %v4348_v43, %v4347_v59  ;;  %v10884_v35 = vsel %vm2456_vm6, %v4341_v36, %v4345_v5  ;;  %v1821_v43 = vshrl.u32 %v10398_v25, 16  ;;  %v1838_v59 = vrot.slane %v12708_v40, 1 }
 0x162   : > { %8774 = vmatprep.subr.bf16.mxu0 %v9619_v18  ;;  %12702 = vst [vmem:[#allocation17_spill] sm:$0xff] %v10876_v31  ;;  %v10881_v19 = vsel %vm1572_vm9, %v1627_v16, %v1631_v49  ;;  %12703 = vst [vmem:[#allocation18_spill] sm:$0xff] %v10884_v35  ;;  %v10898_v24 = vor.u32 %v12706_v42, %v1631_v49  ;;  %v1830_v36 = vrot.slane %v12707_v21, 1  ;;  %v12709_v25 = vshrl.u32 %v10477_v23, 16 }
 0x163   : > { %v10889_v11 = vsel %vm2456_vm6, %v4345_v5, %v4349_v0  ;;  %v10893_v48 = vsel %vm2456_vm6, %v4349_v0, %v10876_v31  ;;  %v1826_v26 = vor.u32 %v1825_v32, %v1821_v43  ;;  %v1846_v5 = vrot.slane %v12711_v52, 1  ;;  %v9620_v0 = vld [vmem:[%s12630_s7 + $0x88] sm:$0xff]   ;;  %v9623_v52 = vld [vmem:[%s12630_s7 + $0xa0] sm:$0xff]  }
 0x164   : > { %8743 = vmatmul.mubr.msk.bf16.gmra.mrb[24].mxu0 %vm460_vm2, %v10871_v22  ;;  %12704 = vst [vmem:[#allocation19_spill] sm:$0xff] %v10889_v11  ;;  %12705 = vst [vmem:[#allocation20_spill] sm:$0xff] %v10893_v48  ;;  %v1640_v46 = vsel %vm1572_vm9, %v10898_v24, %v1639_v9  ;;  %v1842_v49 = vor.u32 %v12709_v25, %v1838_v59  ;;  %v1834_v2 = vor.u32 %v12710_v30, %v1830_v36 }
 0x165   : > { %8746 = vmatprep.mubr.msk.bf16.mxu0 %vm460_vm2, %v10881_v19  ;;  %v1831_v16 = vsel %vm1572_vm9, %v1826_v26, %v1830_v36  ;;  %v12712_v42 = vshll.u32 %v10516_v45, 16  ;;  %v9621_v26 = vld [vmem:[%s12630_s7 + $0x90] sm:$0xff]   ;;  %v12713_v21 = vshrl.u32 %v10516_v45, 16  ;;  %v12715_v40 = vshll.u32 %v10524_v50, 16 }
 0x166   : > { %v1839_v32 = vsel %vm1572_vm9, %v1834_v2, %v1838_v59  ;;  %v1847_v43 = vsel %vm1572_vm9, %v1842_v49, %v1846_v5  ;;  %v12716_v30 = vshll.u32 %v10530_v7, 16 }
 0x167   : > { %v1854_v9 = vrot.slane %v12712_v42, 1  ;;  %v1862_v59 = vrot.slane %v12715_v40, 1  ;;  %v12720_v40 = vshrl.u32 %v10534_v53, 16 }
 0x168   : > { %v1870_v2 = vrot.slane %v12716_v30, 1 }
 0x169   : > { %v1858_v36 = vor.u32 %v12713_v21, %v1854_v9 }
 0x16b   : > { %v1863_v49 = vsel %vm1572_vm9, %v1858_v36, %v1862_v59 }
 0x16c   : > { %8747 = vmatmul.mubr.msk.bf16.gmra.mrb[28].mxu0 %vm460_vm2, %v1640_v46  ;;  %v12714_v46 = vshrl.u32 %v10487_v3, 16 }
 0x16d   : > { %8758 = vmatprep.mubr.msk.bf16.mxu0 %vm460_vm2, %v1831_v16 }
 0x16e   : > { %v1850_v16 = vor.u32 %v12714_v46, %v1846_v5  ;;  %v12717_v5 = vshrl.u32 %v10530_v7, 16 }
 0x170   : > { %v1855_v25 = vsel %vm1572_vm9, %v1850_v16, %v1854_v9  ;;  %v12719_v9 = vshll.u32 %v10534_v53, 16  ;;  %v10955_v16 = vld [vmem:[#allocation2] sm:$0xf0] }
 0x172   : > { %v1878_v21 = vrot.slane %v12719_v9, 1  ;;  %v9625_v9 = vld [vmem:[%s12630_s7 + $0xb0] sm:$0xff]  }
 0x174   : > { %8759 = vmatmul.mubr.msk.bf16.vlgmr.msra.gmra.mrb[16].mxu0 %vm460_vm2, %v1839_v32  ;;  %v1810_v32 = vld [vmem:[#allocation3 + $0x40] sm:$0x1] }
 0x175   : > { %8775 = vmatpush3.bf16.msra.mxu0 %v9619_v18  ;;  %8762 = vmatprep.mubr.msk.bf16.mxu0 %vm460_vm2, %v1847_v43  ;;  %v9622_v18 = vld [vmem:[%s12630_s7 + $0x98] sm:$0xff]   ;;  %v12718_v43 = vshrl.u32 %v10524_v50, 16 }
 0x176   : > { %8776 = vmatprep.subr.bf16.mxu0 %v9620_v0 }
 0x177   : > { %v1866_v42 = vor.u32 %v12718_v43, %v1862_v59 }
 0x179   : > { %8777 = vmatpush3.bf16.msra.mxu0 %v9620_v0  ;;  %v1874_v0 = vor.u32 %v12717_v5, %v1870_v2  ;;  %v1871_v36 = vsel %vm1572_vm9, %v1866_v42, %v1870_v2  ;;  %v10966_v5 = vrot.slane %v10544_v14, 4 }
 0x17a   : > { %8778 = vmatprep.subr.bf16.mxu0 %v9621_v26 }
 0x17b   : > { %v1879_v46 = vsel %vm1572_vm9, %v1874_v0, %v1878_v21  ;;  %v2075_v0 = vrot.slane %v10553_v55, 4 }
 0x17c   : > { %8763 = vmatmul.mubr.msk.bf16.gmra.mrb[20].mxu0 %vm460_vm2, %v1855_v25  ;;  %v1882_v25 = vor.u32 %v12720_v40, %v1878_v21  ;;  %v2077_v21 = vrot.slane %v10559_v58, 4  ;;  %v9627_v40 = vld [vmem:[%s12630_s7 + $0xc0] sm:$0xff]  }
 0x17d   : > { %8766 = vmatprep.mubr.msk.bf16.mxu0 %vm460_vm2, %v1863_v49  ;;  %8779 = vmatpush3.bf16.msra.mxu0 %v9621_v26  ;;  %v1884_v26 = vshll.u32 %v1810_v32, 16  ;;  %v2071_v49 = vrot.slane %v10542_v54, 4  ;;  %v9624_v32 = vld [vmem:[%s12630_s7 + $0xa8] sm:$0xff]   ;;  %v10977_v42 = vsel %vm2069_vm7, %v10966_v5, %v2075_v0 }
 0x17e   : > { %8780 = vmatprep.subr.bf16.mxu0 %v9622_v18 }
 0x17f   : > { %v1886_v59 = vrot.slane %v1884_v26, 1  ;;  %v2074_v43 = vsel %vm2069_vm7, %v2071_v49, %v10966_v5  ;;  %v9626_v26 = vld [vmem:[%s12630_s7 + $0xb8] sm:$0xff]  }
 0x181   : > { %8781 = vmatpush3.bf16.msra.mxu0 %v9622_v18  ;;  %v2070_v18 = vrot.slane %v10955_v16, 4  ;;  %v1887_v30 = vsel %vm1572_vm9, %v1882_v25, %v1886_v59  ;;  %v2081_v25 = vrot.slane %v10569_v61, 4  ;;  %v11004_v59 = vrot.slane %v10571_v20, 4 }
 0x182   : > { %8798 = vmatprep.subr.bf16.mxu0 %v9623_v52 }
 0x183   : > { %v2072_v2 = vsel %vm2069_vm7, %v2070_v18, %v2071_v49  ;;  %v11013_v49 = vsel %vm2069_vm7, %v2081_v25, %v11004_v59 }
 0x184   : > { %8767 = vmatmul.mubr.msk.bf16.gmra.mrb[24].mxu0 %vm460_vm2, %v1871_v36  ;;  %v2079_v36 = vrot.slane %v10564_v12, 4 }
 0x185   : > { %8770 = vmatprep.mubr.msk.bf16.mxu0 %vm460_vm2, %v1879_v46 }
 0x186   : > { %v10995_v46 = vsel %vm2069_vm7, %v2077_v21, %v2079_v36  ;;  %v11007_v18 = vsel %vm2069_vm7, %v2079_v36, %v2081_v25  ;;  %v2271_v36 = vrot.slane %v10477_v23, 4  ;;  %v9628_v25 = vld [vmem:[%s12630_s7 + $0xc8] sm:$0xff]  }
 0x18c   : > { %8771 = vmatmul.mubr.msk.bf16.gmra.mrb[28].mxu0 %vm460_vm2, %v1887_v30  ;;  %v2050_v30 = vld [vmem:[#allocation2 + $0x40] sm:$0xf] }
 0x18d   : > { %8782 = vmatprep.mubr.msk.bf16.mxu0 %vm460_vm2, %v2072_v2  ;;  %v11017_v2 = vld [vmem:[#allocation3] sm:$0xf0] }
 0x194   : > { %8783 = vmatmul.mubr.msk.bf16.vlgmr.msra.gmra.mrb[16].mxu0 %vm460_vm2, %v2074_v43  ;;  %v2269_v43 = vrot.slane %v10414_v29, 4 }
 0x195   : > { %8799 = vmatpush3.bf16.msra.mxu0 %v9623_v52  ;;  %8786 = vmatprep.mubr.msk.bf16.mxu0 %vm460_vm2, %v10977_v42  ;;  %v10990_v52 = vsel %vm2069_vm7, %v2075_v0, %v2077_v21  ;;  %v2085_v0 = vrot.slane %v2050_v30, 4 }
 0x196   : > { %8800 = vmatprep.subr.bf16.mxu0 %v9624_v32  ;;  %v2272_v30 = vsel %vm2069_vm7, %v2269_v43, %v2271_v36 }
 0x199   : > { %8801 = vmatpush3.bf16.msra.mxu0 %v9624_v32  ;;  %v2268_v32 = vrot.slane %v11017_v2, 4 }
 0x19a   : > { %8802 = vmatprep.subr.bf16.mxu0 %v9625_v9 }
 0x19b   : > { %v2270_v21 = vsel %vm2069_vm7, %v2268_v32, %v2269_v43  ;;  %v2275_v32 = vrot.slane %v10516_v45, 4  ;;  %v9630_v43 = vld [vmem:[%s12630_s7 + $0xd8] sm:$0xff]  }
 0x19c   : > { %8787 = vmatmul.mubr.msk.bf16.gmra.mrb[20].mxu0 %vm460_vm2, %v10990_v52 }
 0x19d   : > { %8790 = vmatprep.mubr.msk.bf16.mxu0 %vm460_vm2, %v10995_v46  ;;  %8803 = vmatpush3.bf16.msra.mxu0 %v9625_v9  ;;  %v2086_v9 = vsel %vm2069_vm7, %v11004_v59, %v2085_v0  ;;  %v9629_v0 = vld [vmem:[%s12630_s7 + $0xd0] sm:$0xff]  }
 0x19e   : > { %8804 = vmatprep.subr.bf16.mxu0 %v9626_v26 }
 0x1a1   : > { %8805 = vmatpush3.bf16.msra.mxu0 %v9626_v26  ;;  %v2273_v26 = vrot.slane %v10487_v3, 4 }
 0x1a2   : > { %8822 = vmatprep.subr.bf16.mxu0 %v9627_v40 }
 0x1a3   : > { %v2274_v29 = vsel %vm2069_vm7, %v2271_v36, %v2273_v26  ;;  %v9631_v36 = vld [vmem:[%s12630_s7 + $0xe0] sm:$0xff]  }
 0x1a4   : > { %8791 = vmatmul.mubr.msk.bf16.gmra.mrb[24].mxu0 %vm460_vm2, %v11007_v18 }
 0x1a5   : > { %8794 = vmatprep.mubr.msk.bf16.mxu0 %vm460_vm2, %v11013_v49 }
 0x1ac   : > { %8795 = vmatmul.mubr.msk.bf16.gmra.mrb[28].mxu0 %vm460_vm2, %v2086_v9  ;;  %v2277_v9 = vrot.slane %v10524_v50, 4 }
 0x1ad   : > { %8806 = vmatprep.mubr.msk.bf16.mxu0 %vm460_vm2, %v2270_v21  ;;  %v2276_v21 = vsel %vm2069_vm7, %v2273_v26, %v2275_v32  ;;  %v2461_v26 = vshll.u32 %v10955_v16, 16 }
 0x1af   : > { %v2463_v31 = vrot.slane %v2461_v26, 5 }
 0x1b4   : > { %8807 = vmatmul.mubr.msk.bf16.vlgmr.msra.gmra.mrb[16].mxu0 %vm460_vm2, %v2272_v30  ;;  %v2281_v30 = vrot.slane %v10534_v53, 4 }
 0x1b5   : > { %8823 = vmatpush3.bf16.msra.mxu0 %v9627_v40  ;;  %8810 = vmatprep.mubr.msk.bf16.mxu0 %vm460_vm2, %v2274_v29  ;;  %v2278_v40 = vsel %vm2069_vm7, %v2275_v32, %v2277_v9  ;;  %v2458_v29 = vshrl.u32 %v10955_v16, 16 }
 0x1b6   : > { %8824 = vmatprep.subr.bf16.mxu0 %v9628_v25 }
 0x1b9   : > { %8825 = vmatpush3.bf16.msra.mxu0 %v9628_v25  ;;  %v2279_v25 = vrot.slane %v10530_v7, 4 }
 0x1ba   : > { %8826 = vmatprep.subr.bf16.mxu0 %v9629_v0 }
 0x1bb   : > { %v2280_v32 = vsel %vm2069_vm7, %v2277_v9, %v2279_v25  ;;  %v9632_v9 = vld [vmem:[%s12630_s7 + $0xe8] sm:$0xff]  }
 0x1bc   : > { %8811 = vmatmul.mubr.msk.bf16.gmra.mrb[20].mxu0 %vm460_vm2, %v2276_v21  ;;  %v2249_v21 = vld [vmem:[#allocation3 + $0x40] sm:$0xf] }
 0x1bd   : > { %8814 = vmatprep.mubr.msk.bf16.mxu0 %vm460_vm2, %v2278_v40  ;;  %8827 = vmatpush3.bf16.msra.mxu0 %v9629_v0  ;;  %v2282_v0 = vsel %vm2069_vm7, %v2279_v25, %v2281_v30  ;;  %v2460_v40 = vrot.slane %v2458_v29, 4  ;;  %v2283_v48 = vrot.slane %v2249_v21, 4 }
 0x1be   : > { %8828 = vmatprep.subr.bf16.mxu0 %v9630_v43 }
 0x1bf   : > { %v2464_v11 = vor.u32 %v2463_v31, %v2460_v40  ;;  %v2284_v35 = vsel %vm2069_vm7, %v2281_v30, %v2283_v48  ;;  %v9633_v31 = vld [vmem:[%s12630_s7 + $0xf0] sm:$0xff]   ;;  %v9636_v40 = vld [vmem:[%s12630_s7 + $0x108] sm:$0xff]  }
 0x1c1   : > { %8829 = vmatpush3.bf16.msra.mxu0 %v9630_v43  ;;  %v2468_v16 = vsel %vm2456_vm6, %v2464_v11, %v10623_v8  ;;  %v9634_v8 = vld [vmem:[%s12630_s7 + $0xf8] sm:$0xff]   ;;  %v2674_v43 = vshrl.u32 %v11017_v2, 16 }
 0x1c2   : > { %8846 = vmatprep.subr.bf16.mxu0 %v9631_v36 }
 0x1c3   : > { %v2676_v29 = vrot.slane %v2674_v43, 4 }
 0x1c4   : > { %8815 = vmatmul.mubr.msk.bf16.gmra.mrb[24].mxu0 %vm460_vm2, %v2280_v32 }
 0x1c5   : > { %8818 = vmatprep.mubr.msk.bf16.mxu0 %vm460_vm2, %v2282_v0 }
 0x1cc   : > { %8819 = vmatmul.mubr.msk.bf16.gmra.mrb[28].mxu0 %vm460_vm2, %v2284_v35  ;;  %v2446_v35 = vld [vmem:[#allocation2 + $0x40] sm:$0x1f] }
 0x1cd   : > { %8830 = vmatprep.mubr.msk.bf16.mxu0 %vm460_vm2, %v2468_v16  ;;  %v2494_v11 = vshrl.u32 %v2446_v35, 16  ;;  %v2497_v48 = vshll.u32 %v2446_v35, 16  ;;  %v9637_v16 = vld [vmem:[%s12630_s7 + $0x110] sm:$0xff]  }
 0x1cf   : > { %v2496_v25 = vrot.slane %v2494_v11, 4  ;;  %v2499_v30 = vrot.slane %v2497_v48, 5 }
 0x1d1   : > { %v2500_v32 = vor.u32 %v2499_v30, %v2496_v25  ;;  %v12721_v30 = vshll.u32 %v10749_v38, 16 }
 0x1d3   : > { %v2501_v21 = vsel %vm2456_vm6, %v10660_v33, %v2500_v32 }
 0x1d4   : > { %8831 = vmatmul.mubr.msk.bf16.vlgmr.msra.gmra.mrb[16].mxu0 %vm460_vm2, %v10637_v6  ;;  %v9635_v6 = vld [vmem:[%s12630_s7 + $0x100] sm:$0xff]  }
 0x1d5   : > { %8847 = vmatpush3.bf16.msra.mxu0 %v9631_v36  ;;  %8834 = vmatprep.mubr.msk.bf16.mxu0 %vm460_vm2, %v10645_v1  ;;  %v2677_v36 = vshll.u32 %v11017_v2, 16 }
 0x1d6   : > { %8848 = vmatprep.subr.bf16.mxu0 %v9632_v9 }
 0x1d7   : > { %v2679_v26 = vrot.slane %v2677_v36, 5 }
 0x1d9   : > { %8849 = vmatpush3.bf16.msra.mxu0 %v9632_v9  ;;  %v2680_v0 = vor.u32 %v2679_v26, %v2676_v29  ;;  %v2663_v9 = vld [vmem:[#allocation3 + $0x40] sm:$0x1f]  ;;  %v3482_v29 = vrot.slane %v12721_v30, 1 }
 0x1da   : > { %8850 = vmatprep.subr.bf16.mxu0 %v9633_v31 }
 0x1db   : > { %v2684_v2 = vsel %vm2456_vm6, %v2680_v0, %v10682_v62  ;;  %v9638_v62 = vld [vmem:[%s12630_s7 + $0x118] sm:$0xff]  }
 0x1dc   : > { %8835 = vmatmul.mubr.msk.bf16.gmra.mrb[20].mxu0 %vm460_vm2, %v10648_v10 }
 0x1dd   : > { %8838 = vmatprep.mubr.msk.bf16.mxu0 %vm460_vm2, %v10658_v44  ;;  %8851 = vmatpush3.bf16.msra.mxu0 %v9633_v31  ;;  %v2713_v31 = vshll.u32 %v2663_v9, 16 }
 0x1de   : > { %8852 = vmatprep.subr.bf16.mxu0 %v9634_v8 }
 0x1df   : > { %v2715_v35 = vrot.slane %v2713_v31, 5  ;;  %v9652_v31 = vld [vmem:[%s12630_s7 + $0x188] sm:$0xff]  }
 0x1e1   : > { %8853 = vmatpush3.bf16.msra.mxu0 %v9634_v8 }
 0x1e2   : > { %8870 = vmatprep.subr.bf16.mxu0 %v9635_v6 }
 0x1e4   : > { %8839 = vmatmul.mubr.msk.bf16.gmra.mrb[24].mxu0 %vm460_vm2, %v10671_v51 }
 0x1e5   : > { %8842 = vmatprep.mubr.msk.bf16.mxu0 %vm460_vm2, %v10680_v63 }
 0x1ec   : > { %8843 = vmatmul.mubr.msk.bf16.gmra.mrb[28].mxu0 %vm460_vm2, %v2501_v21 }
 0x1ed   : > { %8854 = vmatprep.mubr.msk.bf16.mxu0 %vm460_vm2, %v2684_v2  ;;  %v12724_v2 = vshrl.u32 %v10749_v38, 16 }
 0x1f4   : > { %8855 = vmatmul.mubr.msk.bf16.vlgmr.msra.gmra.mrb[16].mxu0 %vm460_vm2, %v10694_v27  ;;  %v9639_v27 = vld [vmem:[%s12630_s7 + $0x120] sm:$0xff]  }
 0x1f5   : > { %8871 = vmatpush3.bf16.msra.mxu0 %v9635_v6  ;;  %8858 = vmatprep.mubr.msk.bf16.mxu0 %vm460_vm2, %v10715_v4  ;;  %v2710_v4 = vshrl.u32 %v2663_v9, 16  ;;  %v9640_v6 = vld [vmem:[%s12630_s7 + $0x128] sm:$0xff]  }
 0x1f6   : > { %8872 = vmatprep.subr.bf16.mxu0 %v9636_v40 }
 0x1f7   : > { %v2712_v8 = vrot.slane %v2710_v4, 4 }
 0x1f9   : > { %8873 = vmatpush3.bf16.msra.mxu0 %v9636_v40  ;;  %v3486_v40 = vor.u32 %v12724_v2, %v3482_v29  ;;  %v11288_v2 = vld [vmem:[%s12632_s9 + $0x80] ss:$8 sps:$4 sm:$0xff]  }
 0x1fa   : > { %8874 = vmatprep.subr.bf16.mxu0 %v9637_v16 }
 0x1fc   : > { %8859 = vmatmul.mubr.msk.bf16.gmra.mrb[20].mxu0 %vm460_vm2, %v10718_v13  ;;  %v2716_v13 = vor.u32 %v2715_v35, %v2712_v8 }
 0x1fd   : > { %8862 = vmatprep.mubr.msk.bf16.mxu0 %vm460_vm2, %v10721_v34  ;;  %8875 = vmatpush3.bf16.msra.mxu0 %v9637_v16  ;;  %v12725_v16 = vld [vmem:[#allocation8_spill] sm:$0xff] }
 0x1fe   : > { %8876 = vmatprep.subr.bf16.mxu0 %v9638_v62  ;;  %v2717_v34 = vsel %vm2456_vm6, %v10723_v37, %v2716_v13  ;;  %v9641_v37 = vld [vmem:[%s12630_s7 + $0x130] sm:$0xff]  }
 0x1ff   : > { %v12728_v13 = vld [vmem:[#allocation9_spill] sm:$0xff] }
 0x201   : > { %8877 = vmatpush3.bf16.msra.mxu0 %v9638_v62  ;;  %v12726_v62 = vshll.u32 %v12725_v16, 16 }
 0x202   : > { %8894 = vmatprep.subr.bf16.mxu0 %v9639_v27 }
 0x203   : > { %v3498_v9 = vrot.slane %v12726_v62, 1  ;;  %v9657_v62 = vld [vmem:[%s12630_s7 + $0x1b0] sm:$0xff]  }
 0x204   : > { %8863 = vmatmul.mubr.msk.bf16.gmra.mrb[24].mxu0 %vm460_vm2, %v10733_v60  ;;  %v9651_v60 = vld [vmem:[%s12630_s7 + $0x180] sm:$0xff]  }
 0x205   : > { %8866 = vmatprep.mubr.msk.bf16.mxu0 %vm460_vm2, %v10738_v47  ;;  %v3454_v47 = vld [vmem:[#allocation3 + $0x8] sm:$0xff] }
 0x206   : > { %v3475_v11 = vshll.u32 %v3454_v47, 16  ;;  %v3473_v25 = vshrl.u32 %v3454_v47, 16  ;;  %v3462_v47 = vld [vmem:[#allocation3 + $0x48] sm:$0x1] }
 0x208   : > { %v3477_v36 = vrot.slane %v3475_v11, 1 }
 0x20a   : > { %v3478_v32 = vor.u32 %v3477_v36, %v3473_v25  ;;  %v3536_v36 = vshll.u32 %v3462_v47, 16 }
 0x20c   : > { %8867 = vmatmul.mubr.msk.bf16.gmra.mrb[28].mxu0 %vm460_vm2, %v2717_v34  ;;  %v12729_v34 = vshll.u32 %v12728_v13, 16 }
 0x20d   : > { %8878 = vmatprep.mubr.msk.bf16.mxu0 %vm460_vm2, %v10542_v54  ;;  %v9642_v54 = vld [vmem:[%s12630_s7 + $0x138] sm:$0xff]  }
 0x214   : > { %8879 = vmatmul.mubr.msk.bf16.vlgmr.msra.gmra.mrb[16].mxu0 %vm460_vm2, %v10544_v14  ;;  %v9643_v14 = vld [vmem:[%s12630_s7 + $0x140] sm:$0xff]  }
 0x215   : > { %8895 = vmatpush3.bf16.msra.mxu0 %v9639_v27  ;;  %8882 = vmatprep.mubr.msk.bf16.mxu0 %vm460_vm2, %v10553_v55  ;;  %v11148_v55 = vld [vmem:[#allocation2 + $0x40] sm:$0xff] }
 0x216   : > { %8896 = vmatprep.subr.bf16.mxu0 %v9640_v6 }
 0x219   : > { %8897 = vmatpush3.bf16.msra.mxu0 %v9640_v6  ;;  %v3506_v6 = vrot.slane %v12729_v34, 1  ;;  %v12738_v34 = vld [vmem:[#allocation11_spill] sm:$0xff] }
 0x21a   : > { %8898 = vmatprep.subr.bf16.mxu0 %v9641_v37 }
 0x21c   : > { %8883 = vmatmul.mubr.msk.bf16.gmra.mrb[20].mxu0 %vm460_vm2, %v10559_v58  ;;  %v9883_v58 = vld [vmem:[#allocation3 + $0x8] sm:$0xff] }
 0x21d   : > { %8886 = vmatprep.mubr.msk.bf16.mxu0 %vm460_vm2, %v10564_v12  ;;  %8899 = vmatpush3.bf16.msra.mxu0 %v9641_v37  ;;  %v9644_v12 = vld [vmem:[%s12630_s7 + $0x148] sm:$0xff]   ;;  %v9653_v37 = vld [vmem:[%s12630_s7 + $0x190] sm:$0xff]  }
 0x21e   : > { %8900 = vmatprep.subr.bf16.mxu0 %v9642_v54 }
 0x221   : > { %8901 = vmatpush3.bf16.msra.mxu0 %v9642_v54  ;;  %v12730_v54 = vshrl.u32 %v12725_v16, 16  ;;  %v9656_v16 = vld [vmem:[%s12630_s7 + $0x1a8] sm:$0xff]  }
 0x222   : > { %8918 = vmatprep.subr.bf16.mxu0 %v9643_v14 }
 0x224   : > { %8887 = vmatmul.mubr.msk.bf16.gmra.mrb[24].mxu0 %vm460_vm2, %v10569_v61  ;;  %v9645_v61 = vld [vmem:[%s12630_s7 + $0x150] sm:$0xff]  }
 0x225   : > { %8890 = vmatprep.mubr.msk.bf16.mxu0 %vm460_vm2, %v10571_v20  ;;  %v9646_v20 = vld [vmem:[%s12630_s7 + $0x158] sm:$0xff]  }
 0x22c   : > { %8891 = vmatmul.mubr.msk.bf16.gmra.mrb[28].mxu0 %vm460_vm2, %v11148_v55 }
 0x22d   : > { %8902 = vmatprep.mubr.msk.bf16.mxu0 %vm460_vm2, %v9883_v58  ;;  %v12731_v58 = vshll.u32 %v10764_v39, 16 }
 0x234   : > { %8903 = vmatmul.mubr.msk.bf16.vlgmr.msra.gmra.mrb[16].mxu0 %vm460_vm2, %v10477_v23  ;;  %v9647_v23 = vld [vmem:[%s12630_s7 + $0x160] sm:$0xff]  }
 0x235   : > { %8919 = vmatpush3.bf16.msra.mxu0 %v9643_v14  ;;  %8906 = vmatprep.mubr.msk.bf16.mxu0 %vm460_vm2, %v10487_v3  ;;  %v11177_v3 = vld [vmem:[#allocation3 + $0x40] sm:$0xff]  ;;  %v3502_v14 = vor.u32 %v12730_v54, %v3498_v9 }
 0x236   : > { %8920 = vmatprep.subr.bf16.mxu0 %v9644_v12  ;;  %v3532_v30 = vshrl.u32 %v11177_v3, 16  ;;  %v12740_v54 = vld [vmem:[#allocation13_spill] sm:$0xff] }
 0x239   : > { %8921 = vmatpush3.bf16.msra.mxu0 %v9644_v12  ;;  %v3514_v12 = vrot.slane %v12731_v58, 1  ;;  %v3932_v58 = vrot.slane %v11177_v3, 4 }
 0x23a   : > { %8922 = vmatprep.subr.bf16.mxu0 %v9645_v61 }
 0x23c   : > { %8907 = vmatmul.mubr.msk.bf16.gmra.mrb[20].mxu0 %vm460_vm2, %v10516_v45  ;;  %v9648_v45 = vld [vmem:[%s12630_s7 + $0x168] sm:$0xff]  }
 0x23d   : > { %8910 = vmatprep.mubr.msk.bf16.mxu0 %vm460_vm2, %v10524_v50  ;;  %8923 = vmatpush3.bf16.msra.mxu0 %v9645_v61  ;;  %v9649_v50 = vld [vmem:[%s12630_s7 + $0x170] sm:$0xff]   ;;  %v12732_v61 = vshrl.u32 %v12728_v13, 16 }
 0x23e   : > { %8924 = vmatprep.subr.bf16.mxu0 %v9646_v20 }
 0x241   : > { %8925 = vmatpush3.bf16.msra.mxu0 %v9646_v20  ;;  %v3510_v20 = vor.u32 %v12732_v61, %v3506_v6 }
 0x242   : > { %8942 = vmatprep.subr.bf16.mxu0 %v9647_v23 }
 0x244   : > { %8911 = vmatmul.mubr.msk.bf16.gmra.mrb[24].mxu0 %vm460_vm2, %v10530_v7  ;;  %v9650_v7 = vld [vmem:[%s12630_s7 + $0x178] sm:$0xff]  }
 0x245   : > { %8914 = vmatprep.mubr.msk.bf16.mxu0 %vm460_vm2, %v10534_v53  ;;  %v3281_v53 = vshll.u32 %v11148_v55, 16 }
 0x24c   : > { %8915 = vmatmul.mubr.msk.bf16.gmra.mrb[28].mxu0 %vm460_vm2, %v11177_v3 }
 0x24d   : > { %8926 = vmatprep.mubr.msk.bf16.mxu0 %vm460_vm2, %v10726_v15  ;;  %v3215_v15 = vld [vmem:[#allocation2 + $0x48] sm:$0x1] }
 0x254   : > { %8927 = vmatmul.mubr.msk.bf16.vlgmr.msra.gmra.mrb[16].mxu0 %vm460_vm2, %v10758_v56  ;;  %v3283_v56 = vrot.slane %v3281_v53, 1 }
 0x255   : > { %8943 = vmatpush3.bf16.msra.mxu0 %v9647_v23  ;;  %8930 = vmatprep.mubr.msk.bf16.mxu0 %vm460_vm2, %v10777_v57  ;;  %v3289_v57 = vshll.u32 %v3215_v15, 16  ;;  %v9654_v23 = vld [vmem:[%s12630_s7 + $0x198] sm:$0xff]  }
 0x256   : > { %8944 = vmatprep.subr.bf16.mxu0 %v9648_v45 }
 0x257   : > { %v3291_v43 = vrot.slane %v3289_v57, 1  ;;  %v12734_v57 = vshrl.u32 %v10764_v39, 16 }
 0x259   : > { %8945 = vmatpush3.bf16.msra.mxu0 %v9648_v45  ;;  %v3507_v45 = vsel %vm1572_vm9, %v3502_v14, %v3506_v6  ;;  %v3518_v11 = vor.u32 %v12734_v57, %v3514_v12  ;;  %v9662_v6 = vld [vmem:[%s12630_s7 + $0x1d8] sm:$0xff]   ;;  %v9663_v14 = vld [vmem:[%s12630_s7 + $0x1e0] sm:$0xff]  }
 0x25a   : > { %8946 = vmatprep.subr.bf16.mxu0 %v9649_v50 }
 0x25c   : > { %8931 = vmatmul.mubr.msk.bf16.gmra.mrb[20].mxu0 %vm460_vm2, %v10800_v17  ;;  %v3285_v17 = vshrl.u32 %v11148_v55, 16 }
 0x25d   : > { %8934 = vmatprep.mubr.msk.bf16.mxu0 %vm460_vm2, %v10871_v22  ;;  %8947 = vmatpush3.bf16.msra.mxu0 %v9649_v50  ;;  %v3284_v22 = vsel %vm1572_vm9, %v10898_v24, %v3283_v56  ;;  %v12722_v24 = vld [vmem:[#allocation7_spill] sm:$0xff]  ;;  %v3515_v50 = vsel %vm1572_vm9, %v3510_v20, %v3514_v12  ;;  %v3900_v12 = vld [vmem:[#allocation3 + $0x48] sm:$0xf] }
 0x25e   : > { %8948 = vmatprep.subr.bf16.mxu0 %v9650_v7  ;;  %v3287_v48 = vor.u32 %v3285_v17, %v3283_v56  ;;  %v12723_v0 = vshll.u32 %v12722_v24, 16  ;;  %v12727_v27 = vshrl.u32 %v12722_v24, 16  ;;  %v9655_v56 = vld [vmem:[%s12630_s7 + $0x1a0] sm:$0xff]  }
 0x260   : > { %v3292_v26 = vsel %vm1572_vm9, %v3287_v48, %v3291_v43  ;;  %v3490_v21 = vrot.slane %v12723_v0, 1 }
 0x261   : > { %8949 = vmatpush3.bf16.msra.mxu0 %v9650_v7  ;;  %v12733_v7 = vshll.u32 %v10773_v28, 16 }
 0x262   : > { %8966 = vmatprep.subr.bf16.mxu0 %v9651_v60  ;;  %v3494_v4 = vor.u32 %v12727_v27, %v3490_v21  ;;  %v3491_v8 = vsel %vm1572_vm9, %v3486_v40, %v3490_v21  ;;  %v11282_v21 = vld [vmem:[%s12632_s9 + $0x84] ss:$8 sps:$4 sm:$0xff]   ;;  %v11293_v40 = vld [vmem:[%s12632_s9 + $0x94] ss:$8 sps:$4 sm:$0xff]   ;;  %v3702_v27 = vld [vmem:[#allocation2 + $0x48] sm:$0xf] }
 0x263   : > { %v3522_v15 = vrot.slane %v12733_v7, 1  ;;  %9062 = vmatprep.subr.bf16.mxu1 %v11282_v21  ;;  %v3934_v7 = vrot.slane %v3900_v12, 4  ;;  %v11471_v12 = vpop.permute.xlu0 %4661 }
 0x264   : > { %8935 = vmatmul.mubr.msk.bf16.gmra.mrb[24].mxu0 %vm460_vm2, %v10881_v19  ;;  %v3483_v19 = vsel %vm1572_vm9, %v3478_v32, %v3482_v29  ;;  %v3499_v35 = vsel %vm1572_vm9, %v3494_v4, %v3498_v9  ;;  %v11272_v32 = vld [vmem:[#allocation2 + $0x8] sm:$0xf0]  ;;  %9070 = vmatpush1.bf16.msra.mxu1 %v11288_v2  ;;  %v9658_v9 = vld [vmem:[%s12630_s7 + $0x1b8] sm:$0xff]   ;;  %vm4700_vm14 = vcmp.eq.s32.totalorder %v11471_v12, 1 }
 0x265   : > { %8938 = vmatprep.mubr.msk.bf16.mxu0 %vm460_vm2, %v3284_v22  ;;  %v12735_v22 = vshrl.u32 %v10773_v28, 16  ;;  %v3523_v25 = vsel %vm1572_vm9, %v3518_v11, %v3522_v15  ;;  %v3721_v24 = vrot.slane %v11272_v32, 4  ;;  %9063 = vmatprep.subr.bf16.mxu1 %v11293_v40  ;;  %v11330_v4 = vld [vmem:[#allocation3 + $0x8] sm:$0xf0]  ;;  %v4108_v61 = vshrl.u32 %v11272_v32, 16 }
 0x266   : > { %v4111_v20 = vshll.u32 %v11272_v32, 16  ;;  %v12743_v11 = vld [vmem:[#allocation6_spill] sm:$0xff] }
 0x267   : > { %v3526_v48 = vor.u32 %v12735_v22, %v3522_v15  ;;  %v3723_v0 = vsel %vm2069_vm7, %v3721_v24, %v10966_v5  ;;  %v11301_v5 = vld [vmem:[%s12632_s9 + $0x90] ss:$8 sps:$4 sm:$0xff]   ;;  %v4110_v15 = vrot.slane %v4108_v61, 4  ;;  %v11473_v61 = vpop.permute.xlu1 %4664 }
 0x268   : > { %9071 = vmatpush1.bf16.msra.mxu1 %v11301_v5  ;;  %v4113_v47 = vrot.slane %v4111_v20, 5  ;;  %v11475_v20 = vpop.permute.xlu0 %4667  ;;  %vm4701_vm4 = vcmp.eq.s32.totalorder %v11473_v61, 1 }
 0x269   : > { %vm4702_vm13 = vcmp.eq.s32.totalorder %v11475_v20, 1 }
 0x26a   : > { %v4114_v57 = vor.u32 %v4113_v47, %v4110_v15 }
 0x26c   : > { %8939 = vmatmul.mubr.msk.bf16.gmra.mrb[28].mxu0 %vm460_vm2, %v3292_v26  ;;  %v3538_v26 = vrot.slane %v3536_v36, 1  ;;  %v4118_v22 = vsel %vm2456_vm6, %v4114_v57, %v12743_v11  ;;  %v4097_v36 = vld [vmem:[#allocation2 + $0x48] sm:$0x1f] }
 0x26d   : > { %8950 = vmatprep.mubr.msk.bf16.mxu0 %vm460_vm2, %v3483_v19 }
 0x274   : > { %8951 = vmatmul.mubr.msk.bf16.vlgmr.msra.gmra.mrb[16].mxu0 %vm460_vm2, %v3491_v8  ;;  %v3919_v8 = vrot.slane %v11330_v4, 4 }
 0x275   : > { %8967 = vmatpush3.bf16.msra.mxu0 %v9651_v60  ;;  %8954 = vmatprep.mubr.msk.bf16.mxu0 %vm460_vm2, %v3499_v35  ;;  %v3528_v60 = vshll.u32 %v11177_v3, 16  ;;  %v12736_v35 = vrot.slane %v10749_v38, 4  ;;  %v9661_v38 = vld [vmem:[%s12630_s7 + $0x1d0] sm:$0xff]  }
 0x276   : > { %8968 = vmatprep.subr.bf16.mxu0 %v9652_v31 }
 0x277   : > { %v3530_v43 = vrot.slane %v3528_v60, 1  ;;  %v3921_v13 = vsel %vm2069_vm7, %v3919_v8, %v12736_v35  ;;  %v9675_v8 = vld [vmem:[%s12632_s9 + $0xa4] ss:$8 sps:$4 sm:$0xff]   ;;  %v9676_v35 = vld [vmem:[%s12632_s9 + $0xb0] ss:$8 sps:$4 sm:$0xff]  }
 0x278   : > { %9064 = vmatprep.subr.bf16.mxu1 %v9675_v8 }
 0x279   : > { %8969 = vmatpush3.bf16.msra.mxu0 %v9652_v31  ;;  %v3531_v29 = vsel %vm1572_vm9, %v3526_v48, %v3530_v43  ;;  %v3534_v39 = vor.u32 %v3532_v30, %v3530_v43  ;;  %v9665_v48 = vld [vmem:[%s12630_s7 + $0x1f0] sm:$0xff]   ;;  %v9666_v43 = vld [vmem:[%s12630_s7 + $0x1f8] sm:$0xff]  }
 0x27a   : > { %8970 = vmatprep.subr.bf16.mxu0 %v9653_v37 }
 0x27b   : > { %v3539_v19 = vsel %vm1572_vm9, %v3534_v39, %v3538_v26 }
 0x27c   : > { %8955 = vmatmul.mubr.msk.bf16.gmra.mrb[20].mxu0 %vm460_vm2, %v3507_v45  ;;  %v12742_v45 = vrot.slane %v10773_v28, 4  ;;  %v9664_v28 = vld [vmem:[%s12630_s7 + $0x1e8] sm:$0xff]  }
 0x27d   : > { %8958 = vmatprep.mubr.msk.bf16.mxu0 %vm460_vm2, %v3515_v50  ;;  %8971 = vmatpush3.bf16.msra.mxu0 %v9653_v37  ;;  %v12739_v37 = vld [vmem:[#allocation12_spill] sm:$0xff] }
 0x27e   : > { %8972 = vmatprep.subr.bf16.mxu0 %v9654_v23  ;;  %v3933_v50 = vsel %vm2069_vm7, %v12742_v45, %v3932_v58  ;;  %v11479_v45 = vpop.permute.xlu0 %4673 }
 0x281   : > { %8973 = vmatpush3.bf16.msra.mxu0 %v9654_v23  ;;  %v12741_v23 = vld [vmem:[#allocation14_spill] sm:$0xff] }
 0x282   : > { %8990 = vmatprep.subr.bf16.mxu0 %v9655_v56 }
 0x284   : > { %8959 = vmatmul.mubr.msk.bf16.gmra.mrb[24].mxu0 %vm460_vm2, %v3523_v25  ;;  %v4144_v25 = vshrl.u32 %v4097_v36, 16 }
 0x285   : > { %8962 = vmatprep.mubr.msk.bf16.mxu0 %vm460_vm2, %v3531_v29  ;;  %v4147_v29 = vshll.u32 %v4097_v36, 16 }
 0x286   : > { %v4146_v26 = vrot.slane %v4144_v25, 4 }
 0x287   : > { %v4149_v32 = vrot.slane %v4147_v29, 5 }
 0x28c   : > { %8963 = vmatmul.mubr.msk.bf16.gmra.mrb[28].mxu0 %vm460_vm2, %v3539_v19  ;;  %v4324_v19 = vshrl.u32 %v11330_v4, 16 }
 0x28d   : > { %8974 = vmatprep.mubr.msk.bf16.mxu0 %vm460_vm2, %v3723_v0 }
 0x294   : > { %8975 = vmatmul.mubr.msk.bf16.vlgmr.msra.gmra.mrb[16].mxu0 %vm460_vm2, %v10977_v42  ;;  %v9659_v42 = vld [vmem:[%s12630_s7 + $0x1c0] sm:$0xff]  }
 0x295   : > { %8991 = vmatpush3.bf16.msra.mxu0 %v9655_v56  ;;  %8978 = vmatprep.mubr.msk.bf16.mxu0 %vm460_vm2, %v10990_v52  ;;  %v3734_v52 = vrot.slane %v11148_v55, 4  ;;  %v3935_v56 = vsel %vm2069_vm7, %v3932_v58, %v3934_v7  ;;  %v4150_v55 = vor.u32 %v4149_v32, %v4146_v26  ;;  %v9693_v58 = vld [vmem:[%s12632_s9 + $0x4] ss:$8 sps:$4 sm:$0xff]   ;;  %v11483_v7 = vpop.permute.xlu0 %4679 }
 0x296   : > { %8992 = vmatprep.subr.bf16.mxu0 %v9656_v16 }
 0x299   : > { %8993 = vmatpush3.bf16.msra.mxu0 %v9656_v16  ;;  %v12744_v16 = vld [vmem:[#allocation15_spill] sm:$0xff]  ;;  %v11487_v47 = vpop.permute.xlu0 %4685 }
 0x29a   : > { %8994 = vmatprep.subr.bf16.mxu0 %v9657_v62 }
 0x29c   : > { %8979 = vmatmul.mubr.msk.bf16.gmra.mrb[20].mxu0 %vm460_vm2, %v10995_v46  ;;  %v3735_v46 = vsel %vm2069_vm7, %v11004_v59, %v3734_v52  ;;  %v9660_v59 = vld [vmem:[%s12630_s7 + $0x1c8] sm:$0xff]  }
 0x29d   : > { %8982 = vmatprep.mubr.msk.bf16.mxu0 %vm460_vm2, %v11007_v18  ;;  %8995 = vmatpush3.bf16.msra.mxu0 %v9657_v62  ;;  %v3736_v18 = vrot.slane %v3702_v27, 4  ;;  %v11491_v57 = vpop.permute.xlu0 %4691 }
 0x29e   : > { %8996 = vmatprep.subr.bf16.mxu0 %v9658_v9 }
 0x29f   : > { %v3737_v31 = vsel %vm2069_vm7, %v3734_v52, %v3736_v18  ;;  %v12747_v52 = vld [vmem:[#allocation19_spill] sm:$0xff]  ;;  %v12748_v18 = vld [vmem:[#allocation20_spill] sm:$0xff] }
 0x2a1   : > { %8997 = vmatpush3.bf16.msra.mxu0 %v9658_v9  ;;  %v4355_v9 = vrot.slane %v3532_v30, 4 }
 0x2a2   : > { %9014 = vmatprep.subr.bf16.mxu0 %v9659_v42 }
 0x2a4   : > { %8983 = vmatmul.mubr.msk.bf16.gmra.mrb[24].mxu0 %vm460_vm2, %v11013_v49  ;;  %v12737_v49 = vld [vmem:[#allocation10_spill] sm:$0xff] }
 0x2a5   : > { %8986 = vmatprep.mubr.msk.bf16.mxu0 %vm460_vm2, %v3735_v46 }
 0x2ac   : > { %8987 = vmatmul.mubr.msk.bf16.gmra.mrb[28].mxu0 %vm460_vm2, %v3737_v31  ;;  %v9673_v31 = vld [vmem:[%s12632_s9 + $0xa0] ss:$8 sps:$4 sm:$0xff]  }
 0x2ad   : > { %8998 = vmatprep.mubr.msk.bf16.mxu0 %vm460_vm2, %v3921_v13  ;;  %9072 = vmatpush1.bf16.msra.mxu1 %v9673_v31  ;;  %v9678_v13 = vld [vmem:[%s12632_s9 + $0xb4] ss:$8 sps:$4 sm:$0xff]  }
 0x2ae   : > { %9065 = vmatprep.subr.bf16.mxu1 %v9678_v13 }
 0x2b1   : > { %9073 = vmatpush1.bf16.msra.mxu1 %v9676_v35 }
 0x2b4   : > { %8999 = vmatmul.mubr.msk.bf16.vlgmr.msra.gmra.mrb[16].mxu0 %vm460_vm2, %v12737_v49  ;;  %v9679_v49 = vld [vmem:[%s12632_s9 + $0xc0] ss:$8 sps:$4 sm:$0xff]  }
 0x2b5   : > { %9015 = vmatpush3.bf16.msra.mxu0 %v9659_v42  ;;  %9002 = vmatprep.mubr.msk.bf16.mxu0 %vm460_vm2, %v12738_v34  ;;  %v4356_v42 = vrot.slane %v3528_v60, 5  ;;  %v11429_v60 = vld [vmem:[#allocation4] sm:$0xff]  ;;  %v9682_v34 = vld [vmem:[%s12632_s9 + $0xd0] ss:$8 sps:$4 sm:$0xff]  }
 0x2b6   : > { %9016 = vmatprep.subr.bf16.mxu0 %v9660_v59 }
 0x2b9   : > { %9017 = vmatpush3.bf16.msra.mxu0 %v9660_v59  ;;  %v9681_v59 = vld [vmem:[%s12632_s9 + $0xc4] ss:$8 sps:$4 sm:$0xff]  }
 0x2ba   : > { %9018 = vmatprep.subr.bf16.mxu0 %v9661_v38  ;;  %9066 = vmatprep.subr.bf16.mxu1 %v9681_v59 }
 0x2bb   : > { %9074 = vmatpush1.bf16.msra.mxu1 %v9679_v49 }
 0x2bc   : > { %9003 = vmatmul.mubr.msk.bf16.gmra.mrb[20].mxu0 %vm460_vm2, %v12739_v37  ;;  %v9685_v37 = vld [vmem:[%s12632_s9 + $0xe0] ss:$8 sps:$4 sm:$0xff]  }
 0x2bd   : > { %9006 = vmatprep.mubr.msk.bf16.mxu0 %vm460_vm2, %v12740_v54  ;;  %9019 = vmatpush3.bf16.msra.mxu0 %v9661_v38  ;;  %v9684_v38 = vld [vmem:[%s12632_s9 + $0xd4] ss:$8 sps:$4 sm:$0xff]   ;;  %v9688_v54 = vld [vmem:[%s12632_s9 + $0xf0] ss:$8 sps:$4 sm:$0xff]  }
 0x2be   : > { %9020 = vmatprep.subr.bf16.mxu0 %v9662_v6  ;;  %9067 = vmatprep.subr.bf16.mxu1 %v9684_v38 }
 0x2bf   : > { %9075 = vmatpush1.bf16.msra.mxu1 %v9682_v34 }
 0x2c1   : > { %9021 = vmatpush3.bf16.msra.mxu0 %v9662_v6  ;;  %v9687_v6 = vld [vmem:[%s12632_s9 + $0xe4] ss:$8 sps:$4 sm:$0xff]  }
 0x2c2   : > { %9038 = vmatprep.subr.bf16.mxu0 %v9663_v14  ;;  %9068 = vmatprep.subr.bf16.mxu1 %v9687_v6 }
 0x2c3   : > { %9076 = vmatpush1.bf16.msra.mxu1 %v9685_v37 }
 0x2c4   : > { %9007 = vmatmul.mubr.msk.bf16.gmra.mrb[24].mxu0 %vm460_vm2, %v12741_v23  ;;  %v11477_v23 = vpop.permute.xlu1 %4670 }
 0x2c5   : > { %9010 = vmatprep.mubr.msk.bf16.mxu0 %vm460_vm2, %v3933_v50  ;;  %vm4703_vm9 = vcmp.eq.s32.totalorder %v11477_v23, 1 }
 0x2c8   : > { %v11481_v50 = vpop.permute.xlu1 %4676 }
 0x2cc   : > { %9011 = vmatmul.mubr.msk.bf16.gmra.mrb[28].mxu0 %vm460_vm2, %v3935_v56  ;;  %v11485_v15 = vpop.permute.xlu1 %4682 }
 0x2cd   : > { %9022 = vmatprep.mubr.msk.bf16.mxu0 %vm460_vm2, %v4118_v22  ;;  %v4650_v22 = vpop.permute.xlu0 %4649 }
 0x2ce   : > { %vm4696_vm8 = vcmp.eq.s32.totalorder %v4650_v22, 1 }
 0x2d0   : > { %v11489_v56 = vpop.permute.xlu1 %4688 }
 0x2d1   : > { %v4656_v32 = vpop.permute.xlu0 %4655 }
 0x2d2   : > { %vm4698_vm5 = vcmp.eq.s32.totalorder %v4656_v32, 1 }
 0x2d4   : > { %9023 = vmatmul.mubr.msk.bf16.vlgmr.msra.gmra.mrb[16].mxu0 %vm460_vm2, %v10645_v1  ;;  %v4139_v1 = vrot.slane %v3285_v17, 4  ;;  %v11493_v11 = vpop.permute.xlu1 %4694 }
 0x2d5   : > { %9039 = vmatpush3.bf16.msra.mxu0 %v9663_v14  ;;  %9026 = vmatprep.mubr.msk.bf16.mxu0 %vm460_vm2, %v10648_v10  ;;  %v4140_v10 = vrot.slane %v3281_v53, 5  ;;  %v4326_v53 = vrot.slane %v4324_v19, 4  ;;  %v9690_v14 = vld [vmem:[%s12632_s9 + $0xf4] ss:$8 sps:$4 sm:$0xff]  }
 0x2d6   : > { %9040 = vmatprep.subr.bf16.mxu0 %v9664_v28  ;;  %9069 = vmatprep.subr.bf16.mxu1 %v9690_v14 }
 0x2d7   : > { %v4141_v39 = vor.u32 %v4140_v10, %v4139_v1  ;;  %9077 = vmatpush1.bf16.msra.mxu1 %v9688_v54 }
 0x2d8   : > { %5216 = vmatprep.subr.bf16.mxu1 %v9693_v58 }
 0x2d9   : > { %9041 = vmatpush3.bf16.msra.mxu0 %v9664_v28  ;;  %v4151_v24 = vsel %vm2456_vm6, %v4141_v39, %v4150_v55  ;;  %v4653_v28 = vpop.permute.xlu1 %4652 }
 0x2da   : > { %9042 = vmatprep.subr.bf16.mxu0 %v9665_v48  ;;  %vm4697_vm0 = vcmp.eq.s32.totalorder %v4653_v28, 1 }
 0x2dc   : > { %9027 = vmatmul.mubr.msk.bf16.gmra.mrb[20].mxu0 %vm460_vm2, %v10658_v44  ;;  %v4327_v44 = vshll.u32 %v11330_v4, 16 }
 0x2dd   : > { %9030 = vmatprep.mubr.msk.bf16.mxu0 %vm460_vm2, %v10671_v51  ;;  %9043 = vmatpush3.bf16.msra.mxu0 %v9665_v48  ;;  %v4142_v51 = vsel %vm2456_vm6, %v10660_v33, %v4141_v39  ;;  %v4313_v33 = vld [vmem:[#allocation3 + $0x48] sm:$0x1f]  ;;  %v11498_v48 = vld [vmem:[%s12631_s8] ss:$0 sm:$0xff]  ;;  %v4659_v19 = vpop.permute.xlu1 %4658 }
 0x2de   : > { %9044 = vmatprep.subr.bf16.mxu0 %v9666_v43  ;;  %v4329_v17 = vrot.slane %v4327_v44, 5  ;;  %v4363_v27 = vshll.u32 %v4313_v33, 16  ;;  %vm4699_vm11 = vcmp.eq.s32.totalorder %v4659_v19, 1 }
 0x2e0   : > { %v4330_v0 = vor.u32 %v4329_v17, %v4326_v53 }
 0x2e1   : > { %9045 = vmatpush3.bf16.msra.mxu0 %v9666_v43 }
 0x2e2   : > { %4934 = vmatprep.subr.bf16.mxu0 %v11282_v21  ;;  %v4334_v62 = vsel %vm2456_vm6, %v4330_v0, %v12744_v16  ;;  %v12745_v21 = vld [vmem:[#allocation16_spill] sm:$0xff]  ;;  %v11505_v16 = vld [vmem:[#allocation4] sm:$0xf0] }
 0x2e4   : > { %9031 = vmatmul.mubr.msk.bf16.gmra.mrb[24].mxu0 %vm460_vm2, %v10680_v63  ;;  %v12746_v63 = vld [vmem:[#allocation18_spill] sm:$0xff] }
 0x2e5   : > { %9034 = vmatprep.mubr.msk.bf16.mxu0 %vm460_vm2, %v4142_v51 }
 0x2ec   : > { %9035 = vmatmul.mubr.msk.bf16.gmra.mrb[28].mxu0 %vm460_vm2, %v4151_v24 }
 0x2ed   : > { %9046 = vmatprep.mubr.msk.bf16.mxu0 %vm460_vm2, %v4334_v62 }
 0x2f4   : > { %9047 = vmatmul.mubr.msk.bf16.vlgmr.msra.gmra.mrb[16].mxu0 %vm460_vm2, %v12745_v21 }
 0x2f5   : > { %9050 = vmatprep.mubr.msk.bf16.mxu0 %vm460_vm2, %v10874_v41  ;;  %4935 = vmatpush1.bf16.msra.mxu0 %v11288_v2  ;;  %v4360_v41 = vshrl.u32 %v4313_v33, 16  ;;  %v4357_v2 = vor.u32 %v4356_v42, %v4355_v9 }
 0x2f6   : > { %4936 = vmatprep.subr.bf16.mxu0 %v11293_v40  ;;  %v4365_v40 = vrot.slane %v4363_v27, 5 }
 0x2f7   : > { %v4362_v46 = vrot.slane %v4360_v41, 4 }
 0x2f9   : > { %4937 = vmatpush1.bf16.msra.mxu0 %v11301_v5  ;;  %v12749_v5 = vld [vmem:[#allocation17_spill] sm:$0xff]  ;;  %v4366_v30 = vor.u32 %v4365_v40, %v4362_v46 }
 0x2fa   : > { %v4358_v4 = vsel %vm2456_vm6, %v12749_v5, %v4357_v2  ;;  %4938 = vmatprep.subr.bf16.mxu0 %v9675_v8  ;;  %v5351_v5 = vshll.u32 %v11505_v16, 16 }
 0x2fb   : > { %v4367_v3 = vsel %vm2456_vm6, %v4357_v2, %v4366_v30 }
 0x2fc   : > { %9051 = vmatmul.mubr.msk.bf16.gmra.mrb[20].mxu0 %vm460_vm2, %v12746_v63 }
 0x2fd   : > { %9054 = vmatprep.mubr.msk.bf16.mxu0 %vm460_vm2, %v12747_v52  ;;  %4939 = vmatpush1.bf16.msra.mxu0 %v9673_v31 }
 0x2fe   : > { %4940 = vmatprep.subr.bf16.mxu0 %v9678_v13 }
 0x301   : > { %4941 = vmatpush1.bf16.msra.mxu0 %v9676_v35 }
 0x302   : > { %4942 = vmatprep.subr.bf16.mxu0 %v9681_v59 }
 0x304   : > { %9055 = vmatmul.mubr.msk.bf16.gmra.mrb[24].mxu0 %vm460_vm2, %v12748_v18  ;;  %v5348_v18 = vshrl.u32 %v11505_v16, 16 }
 0x305   : > { %9058 = vmatprep.mubr.msk.bf16.mxu0 %vm460_vm2, %v4358_v4  ;;  %4943 = vmatpush1.bf16.msra.mxu0 %v9679_v49 }
 0x306   : > { %4944 = vmatprep.subr.bf16.mxu0 %v9684_v38  ;;  %v11519_v38 = vrot.slane %v5348_v18, 4 }
 0x309   : > { %4945 = vmatpush1.bf16.msra.mxu0 %v9682_v34 }
 0x30a   : > { %4946 = vmatprep.subr.bf16.mxu0 %v9687_v6  ;;  %v11521_v6 = vrot.slane %v5351_v5, 5 }
 0x30c   : > { %9059 = vmatmul.mubr.msk.bf16.gmra.mrb[28].mxu0 %vm460_vm2, %v4367_v3 }
 0x30d   : > { %4966 = vmatprep.mubr.bf16.mxu0 %v11429_v60  ;;  %4947 = vmatpush1.bf16.msra.mxu0 %v9685_v37 }
 0x30e   : > { %4948 = vmatprep.subr.bf16.mxu0 %v9690_v14 }
 0x311   : > { %4949 = vmatpush1.bf16.msra.mxu0 %v9688_v54 }
 0x3c7   : > { %v9048_v43 = vpop.f32.mrb[16].mxu0 }
 0x3c8   : > { %v4538_v36 = vadd.f32 %v9048_v43, %v11498_v48  ;;  %v4450_v1 = vpop.f32.mrb[17].mxu0 }
 0x3c9   : > { %v4536_v10 = vadd.f32 %v11498_v48, %v4450_v1  ;;  %v9049_v25 = vpop.f32.mrb[18].mxu0 }
 0x3ca   : > { %vm4554_vm2 = vcmp.gt.f32.partialorder %v4538_v36, 0.0  ;;  %v4570_v29 = vmul.f32 0.2, %v4538_v36  ;;  %v4539_v39 = vadd.f32 %v9049_v25, %v11498_v48  ;;  %v4453_v26 = vpop.f32.mrb[19].mxu0  ;;  %v4829_v25 = vrot.slane %v11505_v16, 4 }
 0x3cb   : > { %vm4552_vm15 = vcmp.gt.f32.partialorder %v4536_v10, 0.0  ;;  %v4568_v44 = vmul.f32 0.2, %v4536_v10  ;;  %v4537_v51 = vadd.f32 %v11498_v48, %v4453_v26  ;;  %v5354_v26 = vor.u32 %v11521_v6, %v11519_v38 }
 0x3cc   : > { %v4586_v55 = vsel %vm4554_vm2, %v4538_v36, %v4570_v29  ;;  %vm4555_vm3 = vcmp.gt.f32.partialorder %v4539_v39, 0.0  ;;  %v4571_v53 = vmul.f32 0.2, %v4539_v39 }
 0x3cd   : > { %v4584_v17 = vsel %vm4552_vm15, %v4536_v10, %v4568_v44  ;;  %vm4553_vm10 = vcmp.gt.f32.partialorder %v4537_v51, 0.0  ;;  %v4569_v24 = vmul.f32 0.2, %v4537_v51  ;;  %v4714_v62 = vsel %vm4698_vm5, %v4586_v55, 0.0 }
 0x3ce   : > { %v4587_v0 = vsel %vm4555_vm3, %v4539_v39, %v4571_v53  ;;  %v4712_v9 = vsel %vm4696_vm8, %v4584_v17, 0.0  ;;  %vm4704_vm3 = vcmp.eq.s32.totalorder %v11479_v45, 1  ;;  %vm4707_vm8 = vcmp.eq.s32.totalorder %v11485_v15, 1 }
 0x3cf   : > { %v4715_v21 = vsel %vm4699_vm11, %v4587_v0, 0.0  ;;  %v4585_v33 = vsel %vm4553_vm10, %v4537_v51, %v4569_v24  ;;  %v9052_v63 = vpop.f32.mrb[20].mxu0  ;;  %vm4706_vm10 = vcmp.eq.s32.totalorder %v11483_v7, 1  ;;  %vm4705_vm5 = vcmp.eq.s32.totalorder %v11481_v50, 1 }
 0x3d0   : > { %v4729_v42 = vpack.c.bf16 %v4715_v21, %v4714_v62  ;;  %v4713_v52 = vsel %vm4697_vm0, %v4585_v33, 0.0  ;;  %v4542_v41 = vadd.f32 %v9052_v63, %v11498_v48  ;;  %v4466_v27 = vpop.f32.mrb[21].mxu0  ;;  %vm4710_vm0 = vcmp.eq.s32.totalorder %v11491_v57, 1 }
 0x3d1   : > { %v4728_v2 = vpack.c.bf16 %v4713_v52, %v4712_v9  ;;  %v4540_v46 = vadd.f32 %v11498_v48, %v4466_v27  ;;  %v9053_v40 = vpop.f32.mrb[22].mxu0 }
 0x3d2   : > { %v4745_v4 = vrot.slane %v4729_v42, 4  ;;  %vm4558_vm12 = vcmp.gt.f32.partialorder %v4542_v41, 0.0  ;;  %v4574_v30 = vmul.f32 0.2, %v4542_v41  ;;  %v4543_v3 = vadd.f32 %v9053_v40, %v11498_v48  ;;  %v4469_v31 = vpop.f32.mrb[23].mxu0 }
 0x3d3   : > { %v4744_v8 = vrot.slane %v4728_v2, 4  ;;  %vm4556_vm1 = vcmp.gt.f32.partialorder %v4540_v46, 0.0  ;;  %v4572_v35 = vmul.f32 0.2, %v4540_v46  ;;  %v4541_v13 = vadd.f32 %v11498_v48, %v4469_v31 }
 0x3d4   : > { %v4590_v59 = vsel %vm4558_vm12, %v4542_v41, %v4574_v30  ;;  %vm4559_vm2 = vcmp.gt.f32.partialorder %v4543_v3, 0.0  ;;  %v4575_v49 = vmul.f32 0.2, %v4543_v3 }
 0x3d5   : > { %v11517_v34 = vsel %vm2069_vm7, %v4744_v8, %v4745_v4  ;;  %4768 = vst [vmem:[#allocation4 + $0x8] sm:$0xf0] %v4744_v8  ;;  %vm4557_vm15 = vcmp.gt.f32.partialorder %v4541_v13, 0.0  ;;  %v4588_v37 = vsel %vm4556_vm1, %v4540_v46, %v4572_v35  ;;  %v4573_v14 = vmul.f32 0.2, %v4541_v13 }
 0x3d6   : > { %4769 = vst [vmem:[#allocation4 + $0x10] sm:$0xff] %v11517_v34  ;;  %v4591_v54 = vsel %vm4559_vm2, %v4543_v3, %v4575_v49  ;;  %v4718_v58 = vsel %vm4702_vm13, %v4590_v59, 0.0  ;;  %v4716_v29 = vsel %vm4700_vm14, %v4588_v37, 0.0  ;;  %v11549_v0 = vrot.slane %v11517_v34, 4 }
 0x3d7   : > { %v4719_v22 = vsel %vm4703_vm9, %v4591_v54, 0.0  ;;  %v9056_v28 = vpop.f32.mrb[24].mxu0  ;;  %v4589_v36 = vsel %vm4557_vm15, %v4541_v13, %v4573_v14  ;;  %v5066_v16 = vshrl.u32 %v11517_v34, 16  ;;  %v5069_v33 = vshll.u32 %v11517_v34, 16 }
 0x3d8   : > { %v4731_v43 = vpack.c.bf16 %v4719_v22, %v4718_v58  ;;  %v4546_v1 = vadd.f32 %v9056_v28, %v11498_v48  ;;  %v4482_v10 = vpop.f32.mrb[25].mxu0  ;;  %v4717_v20 = vsel %vm4701_vm4, %v4589_v36, 0.0  ;;  %vm4711_vm4 = vcmp.eq.s32.totalorder %v11493_v11, 1 }
 0x3d9   : > { %v4544_v39 = vadd.f32 %v11498_v48, %v4482_v10  ;;  %v9057_v23 = vpop.f32.mrb[26].mxu0  ;;  %v4730_v19 = vpack.c.bf16 %v4717_v20, %v4716_v29  ;;  %vm4708_vm1 = vcmp.eq.s32.totalorder %v11487_v47, 1  ;;  %vm4709_vm9 = vcmp.eq.s32.totalorder %v11489_v56, 1 }
 0x3da   : > { %v11541_v32 = vrot.slane %v4731_v43, 4  ;;  %vm4562_vm13 = vcmp.gt.f32.partialorder %v4546_v1, 0.0  ;;  %v4578_v44 = vmul.f32 0.2, %v4546_v1  ;;  %v4485_v51 = vpop.f32.mrb[27].mxu0  ;;  %v4547_v12 = vadd.f32 %v9057_v23, %v11498_v48 }
 0x3db   : > { %vm4560_vm11 = vcmp.gt.f32.partialorder %v4544_v39, 0.0  ;;  %v4576_v55 = vmul.f32 0.2, %v4544_v39  ;;  %v4545_v53 = vadd.f32 %v11498_v48, %v4485_v51  ;;  %v4747_v61 = vrot.slane %v4730_v19, 4 }
 0x3dc   : > { %v4594_v17 = vsel %vm4562_vm13, %v4546_v1, %v4578_v44  ;;  %v11546_v24 = vld [vmem:[#allocation4 + $0x8] sm:$0xff]  ;;  %vm4563_vm14 = vcmp.gt.f32.partialorder %v4547_v12, 0.0  ;;  %v4579_v21 = vmul.f32 0.2, %v4547_v12  ;;  %v5068_v43 = vrot.slane %v5066_v16, 3 }
 0x3dd   : > { %v4592_v62 = vsel %vm4560_vm11, %v4544_v39, %v4576_v55  ;;  %v11555_v63 = vsel %vm2069_vm7, %v4745_v4, %v4747_v61  ;;  %v11559_v9 = vsel %vm2069_vm7, %v4747_v61, %v11541_v32  ;;  %v4722_v42 = vsel %vm4706_vm10, %v4594_v17, 0.0 }
 0x3de   : > { %vm4561_vm12 = vcmp.gt.f32.partialorder %v4545_v53, 0.0  ;;  %4770 = vst [vmem:[#allocation4 + $0x18] sm:$0xff] %v11555_v63  ;;  %4771 = vst [vmem:[#allocation4 + $0x20] sm:$0xff] %v11559_v9  ;;  %v4720_v52 = vsel %vm4704_vm3, %v4592_v62, 0.0  ;;  %v4595_v41 = vsel %vm4563_vm14, %v4547_v12, %v4579_v21  ;;  %v4577_v27 = vmul.f32 0.2, %v4545_v53 }
 0x3df   : > { %v9060_v2 = vpop.f32.mrb[28].mxu0  ;;  %v4830_v46 = vrot.slane %v11546_v24, 4  ;;  %v4723_v7 = vsel %vm4707_vm8, %v4595_v41, 0.0  ;;  %v4834_v5 = vrot.slane %v11555_v63, 4  ;;  %v4836_v45 = vrot.slane %v11559_v9, 4 }
 0x3e0   : > { %v4550_v40 = vadd.f32 %v9060_v2, %v11498_v48  ;;  %v4498_v18 = vpop.f32.mrb[29].mxu0  ;;  %v4733_v4 = vpack.c.bf16 %v4723_v7, %v4722_v42  ;;  %v4593_v30 = vsel %vm4561_vm12, %v4545_v53, %v4577_v27  ;;  %v5071_v36 = vrot.slane %v5069_v33, 4  ;;  %v9696_v12 = vld [vmem:[%s12632_s9 + $0x14] ss:$8 sps:$4 sm:$0xff]   ;;  %v9694_v27 = vld [vmem:[%s12632_s9 + $0x10] ss:$8 sps:$4 sm:$0xff]  }
 0x3e1   : > { %v4548_v3 = vadd.f32 %v11498_v48, %v4498_v18  ;;  %v4831_v31 = vsel %vm2069_vm7, %v4829_v25, %v4830_v46  ;;  %v9061_v8 = vpop.f32.mrb[30].mxu0  ;;  %v4721_v35 = vsel %vm4705_vm5, %v4593_v30, 0.0  ;;  %vm5047_vm8 = vsmask.f32 4352 }
 0x3e2   : > { %vm4566_vm2 = vcmp.gt.f32.partialorder %v4550_v40, 0.0  ;;  %v4582_v15 = vmul.f32 0.2, %v4550_v40  ;;  %4967 = vmatmul.mubr.bf16.vlgmr.msra.gmra.mrb[32].mxu0 %v4831_v31  ;;  %v4551_v13 = vadd.f32 %v9061_v8, %v11498_v48  ;;  %v4501_v59 = vpop.f32.mrb[31].mxu0  ;;  %v4753_v49 = vrot.slane %v4733_v4, 4 }
 0x3e3   : > { %v4732_v37 = vpack.c.bf16 %v4721_v35, %v4720_v52  ;;  %vm4564_vm15 = vcmp.gt.f32.partialorder %v4548_v3, 0.0  ;;  %v4580_v54 = vmul.f32 0.2, %v4548_v3  ;;  %4976 = vmatprep.mubr.bf16.mxu0 %v11429_v60  ;;  %v4549_v22 = vadd.f32 %v11498_v48, %v4501_v59 }
 0x3e4   : > { %v4598_v14 = vsel %vm4566_vm2, %v4550_v40, %v4582_v15  ;;  %vm4567_vm3 = vcmp.gt.f32.partialorder %v4551_v13, 0.0  ;;  %v4583_v58 = vmul.f32 0.2, %v4551_v13  ;;  %v11600_v20 = vsel %vm2069_vm7, %v11549_v0, %v4834_v5  ;;  %v9697_v15 = vld [vmem:[%s12632_s9 + $0x20] ss:$8 sps:$4 sm:$0xff]  }
 0x3e5   : > { %v4751_v28 = vrot.slane %v4732_v37, 4  ;;  %v4726_v50 = vsel %vm4710_vm0, %v4598_v14, 0.0  ;;  %v4596_v1 = vsel %vm4564_vm15, %v4548_v3, %v4580_v54  ;;  %vm4565_vm10 = vcmp.gt.f32.partialorder %v4549_v22, 0.0  ;;  %v9702_v54 = vld [vmem:[%s12632_s9 + $0x34] ss:$8 sps:$4 sm:$0xff]  }
 0x3e6   : > { %v4599_v10 = vsel %vm4567_vm3, %v4551_v13, %v4583_v58  ;;  %v4581_v25 = vmul.f32 0.2, %v4549_v22  ;;  %v11609_v44 = vsel %vm2069_vm7, %v4834_v5, %v4836_v45  ;;  %v4724_v11 = vsel %vm4708_vm1, %v4596_v1, 0.0 }
 0x3e7   : > { %v11591_v29 = vsel %vm2069_vm7, %v11541_v32, %v4751_v28  ;;  %v11594_v48 = vsel %vm2069_vm7, %v4751_v28, %v4753_v49  ;;  %v4727_v57 = vsel %vm4711_vm4, %v4599_v10, 0.0  ;;  %v9691_v32 = vld [vmem:[%s12632_s9] ss:$8 sps:$4 sm:$0xff]   ;;  %v4833_v55 = vsel %vm2069_vm7, %v4830_v46, %v11549_v0 }
 0x3e8   : > { %4772 = vst [vmem:[#allocation4 + $0x28] sm:$0xff] %v11591_v29  ;;  %4773 = vst [vmem:[#allocation4 + $0x30] sm:$0xff] %v11594_v48  ;;  %v4735_v39 = vpack.c.bf16 %v4727_v57, %v4726_v50  ;;  %v4597_v23 = vsel %vm4565_vm10, %v4549_v22, %v4581_v25  ;;  %v4838_v19 = vrot.slane %v11591_v29, 4  ;;  %v4840_v53 = vrot.slane %v11594_v48, 4 }
 0x3e9   : > { %v4725_v51 = vsel %vm4709_vm9, %v4597_v23, 0.0  ;;  %v5075_v47 = vshrl.u32 %v11555_v63, 16  ;;  %v11630_v21 = vor.u32 %v5071_v36, %v5068_v43  ;;  %v5078_v42 = vshll.u32 %v11555_v63, 16  ;;  %v9699_v63 = vld [vmem:[%s12632_s9 + $0x24] ss:$8 sps:$4 sm:$0xff]  }
 0x3ea   : > { %v4757_v61 = vrot.slane %v4735_v39, 4  ;;  %v4734_v17 = vpack.c.bf16 %v4725_v51, %v4724_v11  ;;  %4977 = vmatmul.mubr.bf16.gmra.mrb[36].mxu0 %v4833_v55  ;;  %v11622_v62 = vsel %vm2069_vm7, %v4836_v45, %v4838_v19  ;;  %v11628_v56 = vsel %vm2069_vm7, %v4838_v19, %v4840_v53  ;;  %v9700_v39 = vld [vmem:[%s12632_s9 + $0x30] ss:$8 sps:$4 sm:$0xff]   ;;  %v9705_v51 = vld [vmem:[%s12632_s9 + $0x44] ss:$8 sps:$4 sm:$0xff]  }
 0x3eb   : > { %4986 = vmatprep.mubr.bf16.mxu0 %v11429_v60  ;;  %5007 = vmatmul.mubr.bf16.vlgmr.msra.gmra.mrb[16].mxu1 %v11622_v62  ;;  %v5084_v52 = vshrl.u32 %v11559_v9, 16  ;;  %v5077_v2 = vrot.slane %v5075_v47, 3  ;;  %v5087_v46 = vshll.u32 %v11559_v9, 16  ;;  %v5093_v7 = vshrl.u32 %v11591_v29, 16 }
 0x3ec   : > { %4776 = vst [vmem:[#allocation4 + $0x48] sm:$0xf] %v4757_v61  ;;  %v4755_v41 = vrot.slane %v4734_v17, 4  ;;  %5217 = vmatpush1.bf16.msra.mxu1 %v9691_v32  ;;  %5016 = vmatprep.mubr.bf16.mxu1 %v11429_v60  ;;  %v5080_v40 = vrot.slane %v5078_v42, 4  ;;  %v5096_v5 = vshll.u32 %v11591_v29, 16  ;;  %v5359_v45 = vrot.slane %v5066_v16, 4 }
 0x3ed   : > { %5218 = vmatprep.subr.bf16.mxu1 %v9696_v12  ;;  %v5086_v18 = vrot.slane %v5084_v52, 3  ;;  %v5089_v9 = vrot.slane %v5087_v46, 4  ;;  %v5095_v3 = vrot.slane %v5093_v7, 3  ;;  %v5057_v8 = vshrl.u32 %v11546_v24, 16  ;;  %v4777_v17 = vld [vmem:[#allocation4] sm:$0xf8] }
 0x3ee   : > { %v11647_v4 = vsel %vm2069_vm7, %v4753_v49, %v4755_v41  ;;  %v11650_v30 = vsel %vm2069_vm7, %v4755_v41, %v4757_v61  ;;  %v5060_v35 = vshll.u32 %v11546_v24, 16  ;;  %v5081_v16 = vor.u32 %v5080_v40, %v5077_v2  ;;  %v9712_v24 = vld [vmem:[%s12632_s9 + $0x70] ss:$8 sps:$4 sm:$0xff]  }
 0x3ef   : > { %4774 = vst [vmem:[#allocation4 + $0x38] sm:$0xff] %v11647_v4  ;;  %4775 = vst [vmem:[#allocation4 + $0x40] sm:$0xff] %v11650_v30  ;;  %v11655_v31 = vrot.slane %v11647_v4, 4  ;;  %v5090_v13 = vor.u32 %v5089_v9, %v5086_v18  ;;  %v5098_v59 = vrot.slane %v5096_v5, 4  ;;  %v5102_v49 = vshrl.u32 %v11594_v48, 16 }
 0x3f0   : > { %5219 = vmatpush1.bf16.msra.mxu1 %v9694_v27  ;;  %v5105_v37 = vshll.u32 %v11594_v48, 16  ;;  %v11675_v58 = vsel %vm5047_vm8, %v11630_v21, %v5081_v16  ;;  %v5111_v22 = vshrl.u32 %v11647_v4, 16  ;;  %v5114_v28 = vshll.u32 %v11647_v4, 16  ;;  %v5625_v9 = vld [vmem:[#allocation4 + $0x8] sm:$0xf8] }
 0x3f1   : > { %5220 = vmatprep.subr.bf16.mxu1 %v9699_v63  ;;  %v11671_v14 = vsel %vm2069_vm7, %v4840_v53, %v11655_v31  ;;  %v11681_v50 = vsel %vm5047_vm8, %v5081_v16, %v5090_v13  ;;  %v5099_v43 = vor.u32 %v5098_v59, %v5095_v3  ;;  %v5104_v36 = vrot.slane %v5102_v49, 3  ;;  %v9711_v59 = vld [vmem:[%s12632_s9 + $0x64] ss:$8 sps:$4 sm:$0xff]  }
 0x3f2   : > { %4987 = vmatmul.mubr.bf16.gmra.mrb[40].mxu0 %v11600_v20  ;;  %v5107_v1 = vrot.slane %v5105_v37, 4  ;;  %v5113_v10 = vrot.slane %v5111_v22, 3  ;;  %v5116_v25 = vrot.slane %v5114_v28, 4  ;;  %v5355_v48 = vrot.slane %v5057_v8, 4 }
 0x3f3   : > { %4996 = vmatprep.mubr.bf16.mxu0 %v11429_v60  ;;  %5017 = vmatmul.mubr.bf16.gmra.mrb[20].mxu1 %v11628_v56  ;;  %v5356_v57 = vrot.slane %v5060_v35, 5  ;;  %v11694_v23 = vsel %vm5047_vm8, %v5090_v13, %v5099_v43  ;;  %v5360_v19 = vrot.slane %v5069_v33, 5  ;;  %v5363_v11 = vrot.slane %v5075_v47, 4  ;;  %v9703_v47 = vld [vmem:[%s12632_s9 + $0x40] ss:$8 sps:$4 sm:$0xff]  }
 0x3f4   : > { %5221 = vmatpush1.bf16.msra.mxu1 %v9697_v15  ;;  %5026 = vmatprep.mubr.bf16.mxu1 %v11429_v60  ;;  %v5108_v32 = vor.u32 %v5107_v1, %v5104_v36  ;;  %v11701_v55 = vor.u32 %v5116_v25, %v5113_v10  ;;  %v5364_v53 = vrot.slane %v5078_v42, 5  ;;  %v5367_v61 = vrot.slane %v5084_v52, 4 }
 0x3f5   : > { %5222 = vmatprep.subr.bf16.mxu1 %v9702_v54  ;;  %v5357_v12 = vor.u32 %v5356_v57, %v5355_v48  ;;  %v11706_v27 = vor.u32 %v5360_v19, %v5359_v45  ;;  %v5368_v2 = vrot.slane %v5087_v46, 5  ;;  %v5371_v33 = vrot.slane %v5093_v7, 4  ;;  %v9708_v7 = vld [vmem:[%s12632_s9 + $0x54] ss:$8 sps:$4 sm:$0xff]  }
 0x3f6   : > { %v11704_v41 = vsel %vm5047_vm8, %v5099_v43, %v5108_v32  ;;  %v11710_v34 = vsel %vm5047_vm8, %v5108_v32, %v11701_v55  ;;  %v5365_v46 = vor.u32 %v5364_v53, %v5363_v11  ;;  %v5049_v40 = vshrl.u32 %v4777_v17, 16  ;;  %v11739_v3 = vld [vmem:[#allocation4 + $0x40] sm:$0xf]  ;;  %v9714_v53 = vld [vmem:[%s12632_s9 + $0x74] ss:$8 sps:$4 sm:$0xff]  }
 0x3f7   : > { %v11719_v42 = vsel %vm2456_vm6, %v5354_v26, %v5357_v12  ;;  %v11723_v52 = vsel %vm2456_vm6, %v5357_v12, %v11706_v27  ;;  %v5369_v63 = vor.u32 %v5368_v2, %v5367_v61  ;;  %v5052_v18 = vshll.u32 %v4777_v17, 16  ;;  %v9709_v32 = vld [vmem:[%s12632_s9 + $0x60] ss:$8 sps:$4 sm:$0xff]  }
 0x3f8   : > { %5223 = vmatpush1.bf16.msra.mxu1 %v9700_v39  ;;  %v5372_v45 = vrot.slane %v5096_v5, 5  ;;  %v11733_v38 = vsel %vm2456_vm6, %v11706_v27, %v5365_v46  ;;  %v5375_v26 = vrot.slane %v5102_v49, 4  ;;  %v5376_v4 = vrot.slane %v5105_v37, 5  ;;  %v9706_v5 = vld [vmem:[%s12632_s9 + $0x50] ss:$8 sps:$4 sm:$0xff]  }
 0x3f9   : > { %5224 = vmatprep.subr.bf16.mxu1 %v9705_v51  ;;  %v11736_v6 = vsel %vm2456_vm6, %v5365_v46, %v5369_v63  ;;  %v5379_v15 = vrot.slane %v5111_v22, 4  ;;  %v5380_v29 = vrot.slane %v5114_v28, 5  ;;  %v5051_v49 = vrot.slane %v5049_v40, 3  ;;  %v5633_v28 = vld [vmem:[#allocation4 + $0x48] sm:$0xf] }
 0x3fa   : > { %4997 = vmatmul.mubr.bf16.gmra.mrb[44].mxu0 %v11609_v44  ;;  %v5373_v16 = vor.u32 %v5372_v45, %v5371_v33  ;;  %v5377_v13 = vor.u32 %v5376_v4, %v5375_v26  ;;  %v5652_v22 = vshrl.u32 %v5625_v9, 16  ;;  %v4844_v43 = vrot.slane %v11739_v3, 4  ;;  %v9717_v45 = vld [vmem:[%s12632_s9 + $0x104] ss:$8 sps:$4 sm:$0xff]  }
 0x3fb   : > { %5027 = vmatmul.mubr.bf16.gmra.mrb[24].mxu1 %v11671_v14  ;;  %v11751_v54 = vor.u32 %v5380_v29, %v5379_v15  ;;  %v5054_v36 = vrot.slane %v5052_v18, 4  ;;  %v5655_v10 = vshll.u32 %v5625_v9, 16  ;;  %v5714_v57 = vshrl.u32 %v11650_v30, 16 }
 0x3fc   : > { %5225 = vmatpush1.bf16.msra.mxu1 %v9703_v47  ;;  %5036 = vmatprep.mubr.bf16.mxu1 %v11429_v60  ;;  %v11749_v37 = vsel %vm2456_vm6, %v5369_v63, %v5373_v16  ;;  %v11755_v1 = vsel %vm2456_vm6, %v5373_v16, %v5377_v13  ;;  %v5654_v48 = vrot.slane %v5652_v22, 3  ;;  %v5717_v39 = vshll.u32 %v11650_v30, 16 }
 0x3fd   : > { %5226 = vmatprep.subr.bf16.mxu1 %v9708_v7  ;;  %v11759_v25 = vsel %vm2456_vm6, %v5377_v13, %v11751_v54  ;;  %v5059_v19 = vrot.slane %v5057_v8, 3  ;;  %v5657_v11 = vrot.slane %v5655_v10, 4  ;;  %v5723_v51 = vshrl.u32 %v5633_v28, 16  ;;  %v9715_v13 = vld [vmem:[%s12632_s9 + $0x100] ss:$8 sps:$4 sm:$0xff]   ;;  %v11825_v10 = vld [vmem:[#allocation4 + $0x18] sm:$0xff] }
 0x3fe   : > { %v5726_v12 = vshll.u32 %v5633_v28, 16  ;;  %v5062_v61 = vrot.slane %v5060_v35, 4  ;;  %v5716_v17 = vrot.slane %v5714_v57, 3  ;;  %v5719_v2 = vrot.slane %v5717_v39, 4 }
 0x3ff   : > { %v6004_v33 = vrot.slane %v11650_v30, 4  ;;  %v4845_v47 = vsel %vm2069_vm7, %v11655_v31, %v4844_v43  ;;  %v5658_v46 = vor.u32 %v5657_v11, %v5654_v48  ;;  %v5725_v8 = vrot.slane %v5723_v51, 3  ;;  %v9723_v43 = vld [vmem:[%s12632_s9 + $0x124] ss:$8 sps:$4 sm:$0xff]   ;;  %v11827_v48 = vld [vmem:[#allocation4 + $0x50] sm:$0xf] }
 0x400   : > { %5227 = vmatpush1.bf16.msra.mxu1 %v9706_v5  ;;  %v5728_v63 = vrot.slane %v5726_v12, 4  ;;  %v5720_v7 = vor.u32 %v5719_v2, %v5716_v17  ;;  %v6006_v18 = vrot.slane %v5633_v28, 4  ;;  %v6291_v4 = vrot.slane %v5714_v57, 4  ;;  %v9718_v28 = vld [vmem:[%s12632_s9 + $0x110] ss:$8 sps:$4 sm:$0xff]  }
 0x401   : > { %5228 = vmatprep.subr.bf16.mxu1 %v9711_v59  ;;  %v11778_v40 = vsel %vm2069_vm7, %v11655_v31, %v6004_v33  ;;  %v11786_v30 = vsel %vm5047_vm8, %v5658_v46, %v11630_v21  ;;  %v6292_v9 = vrot.slane %v5717_v39, 5  ;;  %v5055_v16 = vor.u32 %v5054_v36, %v5051_v49  ;;  %v9720_v59 = vld [vmem:[%s12632_s9 + $0x114] ss:$8 sps:$4 sm:$0xff]   ;;  %v9721_v36 = vld [vmem:[%s12632_s9 + $0x120] ss:$8 sps:$4 sm:$0xff]  }
 0x402   : > { %v5729_v35 = vor.u32 %v5728_v63, %v5725_v8  ;;  %v11793_v31 = vsel %vm5047_vm8, %v11701_v55, %v5720_v7  ;;  %v11796_v26 = vsel %vm2069_vm7, %v6004_v33, %v6006_v18  ;;  %v5063_v15 = vor.u32 %v5062_v61, %v5059_v19  ;;  %v9726_v57 = vld [vmem:[%s12632_s9 + $0x134] ss:$8 sps:$4 sm:$0xff]   ;;  %v11832_v39 = vld [vmem:[#allocation4 + $0x20] sm:$0xff]  ;;  %v11836_v19 = vld [vmem:[#allocation4 + $0x28] sm:$0xff] }
 0x403   : > { %5037 = vmatmul.mubr.bf16.gmra.mrb[28].mxu1 %v4845_v47  ;;  %v11801_v5 = vor.u32 %v6292_v9, %v6291_v4  ;;  %v11838_v11 = vld [vmem:[#allocation4 + $0x30] sm:$0xff]  ;;  %v11843_v12 = vld [vmem:[#allocation4 + $0x38] sm:$0xff]  ;;  %v6918_v61 = vrot.slane %v11827_v48, 4  ;;  %v12673_v17 = vshll.u32 %v11825_v10, 16  ;;  %v12672_v2 = vshrl.u32 %v11832_v39, 16  ;;  %v11851_v33 = vld [vmem:[#allocation4 + $0x40] sm:$0xff] }
 0x404   : > { %5229 = vmatpush1.bf16.msra.mxu1 %v9709_v32  ;;  %5248 = vmatprep.mubr.bf16.mxu1 %v11429_v60  ;;  %v11799_v29 = vsel %vm5047_vm8, %v5720_v7, %v5729_v35  ;;  %v5064_v22 = vsel %vm5047_vm8, %v5055_v16, %v5063_v15  ;;  %v5073_v32 = vsel %vm5047_vm8, %v5063_v15, %v11630_v21  ;;  %v9724_v51 = vld [vmem:[%s12632_s9 + $0x130] ss:$8 sps:$4 sm:$0xff]   ;;  %v12674_v21 = vshrl.u32 %v11825_v10, 16  ;;  %v11853_v47 = vld [vmem:[#allocation4 + $0x48] sm:$0xff] }
 0x405   : > { %5230 = vmatprep.subr.bf16.mxu1 %v9714_v53  ;;  %v11812_v49 = vsel %vm2456_vm6, %v11751_v54, %v11801_v5  ;;  %v12671_v53 = vrot.slane %v11825_v10, 4  ;;  %v6906_v46 = vrot.slane %v11832_v39, 4  ;;  %v9729_v8 = vld [vmem:[%s12632_s9 + $0x144] ss:$8 sps:$4 sm:$0xff]   ;;  %v12675_v63 = vshll.u32 %v11832_v39, 16 }
 0x406   : > { %v12676_v7 = vshrl.u32 %v11836_v19, 16  ;;  %v6908_v18 = vrot.slane %v11836_v19, 4  ;;  %v12677_v35 = vshll.u32 %v11836_v19, 16  ;;  %v6912_v9 = vrot.slane %v11843_v12, 4 }
 0x407   : > { %v11868_v4 = vsel %vm2069_vm7, %v12671_v53, %v6906_v46 }
 0x408   : > { %5231 = vmatpush1.bf16.msra.mxu1 %v9712_v24  ;;  %v6910_v24 = vrot.slane %v11838_v11, 4  ;;  %v11872_v16 = vsel %vm2069_vm7, %v6906_v46, %v6908_v18 }
 0x409   : > { %5480 = vmatprep.subr.bf16.mxu1 %v9717_v45  ;;  %v12678_v45 = vshrl.u32 %v11838_v11, 16 }
 0x40a   : > { %v11875_v15 = vsel %vm2069_vm7, %v6908_v18, %v6910_v24 }
 0x40b   : > { %5249 = vmatmul.mubr.bf16.vlgmr.msra.gmra.mrb[32].mxu1 %v5064_v22  ;;  %v9727_v22 = vld [vmem:[%s12632_s9 + $0x140] ss:$8 sps:$4 sm:$0xff]  }
 0x40c   : > { %5481 = vmatpush1.bf16.msra.mxu1 %v9715_v13  ;;  %5258 = vmatprep.mubr.bf16.mxu1 %v11429_v60  ;;  %v6914_v13 = vrot.slane %v11851_v33, 4 }
 0x40d   : > { %5482 = vmatprep.subr.bf16.mxu1 %v9720_v59  ;;  %v6916_v59 = vrot.slane %v11853_v47, 4 }
 0x40e   : > { %v11893_v46 = vsel %vm2069_vm7, %v6912_v9, %v6914_v13 }
 0x40f   : > { %v11896_v18 = vsel %vm2069_vm7, %v6914_v13, %v6916_v59  ;;  %v11899_v53 = vsel %vm2069_vm7, %v6916_v59, %v6918_v61  ;;  %v7184_v13 = vrot.slane %v12675_v63, 5  ;;  %v7187_v61 = vrot.slane %v12676_v7, 4 }
 0x410   : > { %5483 = vmatpush1.bf16.msra.mxu1 %v9718_v28  ;;  %v12679_v28 = vshll.u32 %v11838_v11, 16  ;;  %12750 = vst [vmem:[#allocation7_spill] sm:$0xff] %v11896_v18  ;;  %12751 = vst [vmem:[#allocation8_spill] sm:$0xff] %v11899_v53  ;;  %v7188_v59 = vrot.slane %v12677_v35, 5  ;;  %v7191_v63 = vrot.slane %v12678_v45, 4  ;;  %v12754_v18 = vshll.u32 %v11851_v33, 16 }
 0x411   : > { %5484 = vmatprep.subr.bf16.mxu1 %v9723_v43  ;;  %v12680_v43 = vshrl.u32 %v11843_v12, 16  ;;  %v9735_v35 = vld [vmem:[%s12632_s9 + $0x164] ss:$8 sps:$4 sm:$0xff]  }
 0x412   : > { %v7192_v7 = vrot.slane %v12679_v28, 5  ;;  %v7200_v28 = vrot.slane %v12754_v18, 5 }
 0x413   : > { %5259 = vmatmul.mubr.bf16.gmra.mrb[36].mxu1 %v5073_v32  ;;  %v9732_v32 = vld [vmem:[%s12632_s9 + $0x154] ss:$8 sps:$4 sm:$0xff]  }
 0x414   : > { %5268 = vmatprep.mubr.bf16.mxu1 %v11429_v60  ;;  %5485 = vmatpush1.bf16.msra.mxu1 %v9721_v36  ;;  %v7195_v36 = vrot.slane %v12680_v43, 4  ;;  %v7193_v53 = vor.u32 %v7192_v7, %v7191_v63  ;;  %v9733_v63 = vld [vmem:[%s12632_s9 + $0x160] ss:$8 sps:$4 sm:$0xff]  }
 0x415   : > { %5486 = vmatprep.subr.bf16.mxu1 %v9726_v57  ;;  %v11886_v57 = vsel %vm2069_vm7, %v6910_v24, %v6912_v9  ;;  %v7180_v24 = vrot.slane %v12673_v17, 5  ;;  %v7189_v9 = vor.u32 %v7188_v59, %v7187_v61  ;;  %v12753_v17 = vshrl.u32 %v11851_v33, 16 }
 0x416   : > { %v12756_v59 = vshll.u32 %v11853_v47, 16 }
 0x417   : > { %v7199_v45 = vrot.slane %v12753_v17, 4  ;;  %v11951_v17 = vsel %vm2456_vm6, %v7189_v9, %v7193_v53 }
 0x418   : > { %5487 = vmatpush1.bf16.msra.mxu1 %v9724_v51  ;;  %v7183_v51 = vrot.slane %v12672_v2, 4  ;;  %v9730_v2 = vld [vmem:[%s12632_s9 + $0x150] ss:$8 sps:$4 sm:$0xff]  }
 0x419   : > { %5488 = vmatprep.subr.bf16.mxu1 %v9729_v8  ;;  %v7179_v8 = vrot.slane %v12674_v21, 4  ;;  %v7201_v18 = vor.u32 %v7200_v28, %v7199_v45  ;;  %v5120_v28 = vshrl.u32 %v11739_v3, 16 }
 0x41b   : > { %5269 = vmatmul.mubr.bf16.gmra.mrb[40].mxu1 %v11675_v58  ;;  %v11921_v21 = vor.u32 %v7180_v24, %v7179_v8  ;;  %v12752_v8 = vshll.u32 %v11843_v12, 16 }
 0x41c   : > { %5278 = vmatprep.mubr.bf16.mxu1 %v11429_v60  ;;  %5489 = vmatpush1.bf16.msra.mxu1 %v9727_v22  ;;  %v7185_v22 = vor.u32 %v7184_v13, %v7183_v51  ;;  %v12755_v13 = vshrl.u32 %v11853_v47, 16 }
 0x41d   : > { %5490 = vmatprep.subr.bf16.mxu1 %v9732_v32  ;;  %v7196_v24 = vrot.slane %v12752_v8, 5  ;;  %v7204_v8 = vrot.slane %v12756_v59, 5  ;;  %v9745_v59 = vld [vmem:[%s12632_s9 + $0x1a0] ss:$8 sps:$4 sm:$0xff]  }
 0x41e   : > { %v11940_v32 = vsel %vm2456_vm6, %v11921_v21, %v7185_v22  ;;  %v11943_v51 = vsel %vm2456_vm6, %v7185_v22, %v7189_v9  ;;  %v7203_v61 = vrot.slane %v12755_v13, 4  ;;  %v9738_v22 = vld [vmem:[%s12632_s9 + $0x174] ss:$8 sps:$4 sm:$0xff]   ;;  %v5122_v9 = vrot.slane %v5120_v28, 3  ;;  %v9759_v28 = vld [vmem:[%s12632_s9 + $0x1e4] ss:$8 sps:$4 sm:$0xff]  }
 0x41f   : > { %v7197_v7 = vor.u32 %v7196_v24, %v7195_v36  ;;  %v5123_v36 = vshll.u32 %v11739_v3, 16  ;;  %v9744_v3 = vld [vmem:[%s12632_s9 + $0x194] ss:$8 sps:$4 sm:$0xff]  }
 0x420   : > { %5491 = vmatpush1.bf16.msra.mxu1 %v9730_v2  ;;  %v11964_v43 = vor.u32 %v7204_v8, %v7203_v61  ;;  %v9748_v8 = vld [vmem:[%s12632_s9 + $0x1b0] ss:$8 sps:$4 sm:$0xff]  }
 0x421   : > { %5492 = vmatprep.subr.bf16.mxu1 %v9735_v35  ;;  %v11959_v13 = vsel %vm2456_vm6, %v7193_v53, %v7197_v7  ;;  %v11962_v2 = vsel %vm2456_vm6, %v7197_v7, %v7201_v18  ;;  %v9736_v35 = vld [vmem:[%s12632_s9 + $0x170] ss:$8 sps:$4 sm:$0xff]   ;;  %v9741_v53 = vld [vmem:[%s12632_s9 + $0x184] ss:$8 sps:$4 sm:$0xff]   ;;  %v5125_v24 = vrot.slane %v5123_v36, 4 }
 0x422   : > { %v11973_v45 = vsel %vm2456_vm6, %v7201_v18, %v11964_v43  ;;  %v9739_v7 = vld [vmem:[%s12632_s9 + $0x180] ss:$8 sps:$4 sm:$0xff]   ;;  %v9747_v18 = vld [vmem:[%s12632_s9 + $0x1a4] ss:$8 sps:$4 sm:$0xff]  }
 0x423   : > { %5279 = vmatmul.mubr.bf16.gmra.mrb[44].mxu1 %v11681_v50  ;;  %v5126_v61 = vor.u32 %v5125_v24, %v5122_v9  ;;  %v9757_v36 = vld [vmem:[%s12632_s9 + $0x1e0] ss:$8 sps:$4 sm:$0xff]   ;;  %v9762_v9 = vld [vmem:[%s12632_s9 + $0x1f4] ss:$8 sps:$4 sm:$0xff]   ;;  %v9760_v24 = vld [vmem:[%s12632_s9 + $0x1f0] ss:$8 sps:$4 sm:$0xff]  }
 0x424   : > { %5288 = vmatprep.mubr.bf16.mxu1 %v11429_v60  ;;  %5493 = vmatpush1.bf16.msra.mxu1 %v9733_v63 }
 0x425   : > { %5494 = vmatprep.subr.bf16.mxu1 %v9738_v22  ;;  %v5127_v63 = vsel %vm5047_vm8, %v11701_v55, %v5126_v61  ;;  %v9742_v55 = vld [vmem:[%s12632_s9 + $0x190] ss:$8 sps:$4 sm:$0xff]   ;;  %v9753_v22 = vld [vmem:[%s12632_s9 + $0x1c4] ss:$8 sps:$4 sm:$0xff]  }
 0x426   : > { %v9765_v61 = vld [vmem:[%s12632_s9 + $0x204] ss:$8 sps:$4 sm:$0xff]  }
 0x428   : > { %5495 = vmatpush1.bf16.msra.mxu1 %v9736_v35  ;;  %v9751_v35 = vld [vmem:[%s12632_s9 + $0x1c0] ss:$8 sps:$4 sm:$0xff]  }
 0x429   : > { %5819 = vmatprep.subr.bf16.mxu1 %v9741_v53  ;;  %v9754_v53 = vld [vmem:[%s12632_s9 + $0x1d0] ss:$8 sps:$4 sm:$0xff]  }
 0x42b   : > { %5289 = vmatmul.mubr.bf16.gmra.mrb[16].mxu1 %v11694_v23 }
 0x42c   : > { %5298 = vmatprep.mubr.bf16.mxu1 %v11429_v60 }
 0x433   : > { %5299 = vmatmul.mubr.bf16.gmra.mrb[20].mxu1 %v11704_v41 }
 0x434   : > { %5308 = vmatprep.mubr.bf16.mxu1 %v11429_v60 }
 0x43b   : > { %5309 = vmatmul.mubr.bf16.gmra.mrb[24].mxu1 %v11710_v34 }
 0x43c   : > { %5318 = vmatprep.mubr.bf16.mxu1 %v11429_v60 }
 0x443   : > { %5319 = vmatmul.mubr.bf16.gmra.mrb[28].mxu1 %v5127_v63  ;;  %v5329_v63 = vld [vmem:[#allocation4 + $0x40] sm:$0x1f] }
 0x444   : > { %5512 = vmatprep.mubr.bf16.mxu1 %v11429_v60 }
 0x44b   : > { %5513 = vmatmul.mubr.bf16.vlgmr.msra.gmra.mrb[32].mxu1 %v11719_v42  ;;  %v9750_v42 = vld [vmem:[%s12632_s9 + $0x1b4] ss:$8 sps:$4 sm:$0xff]  }
 0x44c   : > { %5820 = vmatpush1.bf16.msra.mxu1 %v9739_v7  ;;  %5522 = vmatprep.mubr.bf16.mxu1 %v11429_v60  ;;  %v5384_v7 = vshrl.u32 %v5329_v63, 16 }
 0x44d   : > { %5821 = vmatprep.subr.bf16.mxu1 %v9744_v3  ;;  %v5387_v3 = vshll.u32 %v5329_v63, 16  ;;  %v9784_v63 = vld [vmem:[%s12632_s9 + $0x270] ss:$8 sps:$4 sm:$0xff]  }
 0x450   : > { %5822 = vmatpush1.bf16.msra.mxu1 %v9742_v55  ;;  %v5386_v55 = vrot.slane %v5384_v7, 4  ;;  %v9789_v7 = vld [vmem:[%s12632_s9 + $0x284] ss:$8 sps:$4 sm:$0xff]  }
 0x451   : > { %5823 = vmatprep.subr.bf16.mxu1 %v9747_v18  ;;  %v5389_v18 = vrot.slane %v5387_v3, 5 }
 0x453   : > { %5523 = vmatmul.mubr.bf16.gmra.mrb[36].mxu1 %v11723_v52  ;;  %v12024_v52 = vld [vmem:[#allocation4] sm:$0xff] }
 0x454   : > { %5532 = vmatprep.mubr.bf16.mxu1 %v11429_v60  ;;  %5824 = vmatpush1.bf16.msra.mxu1 %v9745_v59  ;;  %v9756_v60 = vld [vmem:[%s12632_s9 + $0x1d4] ss:$8 sps:$4 sm:$0xff]   ;;  %v5390_v59 = vor.u32 %v5389_v18, %v5386_v55 }
 0x455   : > { %5825 = vmatprep.subr.bf16.mxu1 %v9750_v42 }
 0x456   : > { %v5391_v42 = vsel %vm2456_vm6, %v11751_v54, %v5390_v59  ;;  %v9766_v54 = vld [vmem:[%s12632_s9 + $0x210] ss:$8 sps:$4 sm:$0xff]  }
 0x458   : > { %5826 = vmatpush1.bf16.msra.mxu1 %v9748_v8  ;;  %v9763_v8 = vld [vmem:[%s12632_s9 + $0x200] ss:$8 sps:$4 sm:$0xff]  }
 0x459   : > { %5827 = vmatprep.subr.bf16.mxu1 %v9753_v22  ;;  %v9768_v22 = vld [vmem:[%s12632_s9 + $0x214] ss:$8 sps:$4 sm:$0xff]  }
 0x45b   : > { %5533 = vmatmul.mubr.bf16.gmra.mrb[40].mxu1 %v11733_v38 }
 0x45c   : > { %5542 = vmatprep.mubr.bf16.mxu1 %v12024_v52  ;;  %5828 = vmatpush1.bf16.msra.mxu1 %v9751_v35  ;;  %v9771_v35 = vld [vmem:[%s12632_s9 + $0x224] ss:$8 sps:$4 sm:$0xff]  }
 0x45d   : > { %5829 = vmatprep.subr.bf16.mxu1 %v9756_v60  ;;  %v9769_v60 = vld [vmem:[%s12632_s9 + $0x220] ss:$8 sps:$4 sm:$0xff]  }
 0x460   : > { %5830 = vmatpush1.bf16.msra.mxu1 %v9754_v53  ;;  %v9772_v53 = vld [vmem:[%s12632_s9 + $0x230] ss:$8 sps:$4 sm:$0xff]  }
 0x461   : > { %5831 = vmatprep.subr.bf16.mxu1 %v9759_v28  ;;  %v9777_v28 = vld [vmem:[%s12632_s9 + $0x244] ss:$8 sps:$4 sm:$0xff]  }
 0x463   : > { %5543 = vmatmul.mubr.bf16.gmra.mrb[44].mxu1 %v11736_v6 }
 0x464   : > { %5552 = vmatprep.mubr.bf16.mxu1 %v12024_v52  ;;  %5832 = vmatpush1.bf16.msra.mxu1 %v9757_v36  ;;  %v9775_v36 = vld [vmem:[%s12632_s9 + $0x240] ss:$8 sps:$4 sm:$0xff]  }
 0x465   : > { %5833 = vmatprep.subr.bf16.mxu1 %v9762_v9  ;;  %v9778_v9 = vld [vmem:[%s12632_s9 + $0x250] ss:$8 sps:$4 sm:$0xff]  }
 0x468   : > { %5834 = vmatpush1.bf16.msra.mxu1 %v9760_v24  ;;  %v9783_v24 = vld [vmem:[%s12632_s9 + $0x264] ss:$8 sps:$4 sm:$0xff]  }
 0x469   : > { %6096 = vmatprep.subr.bf16.mxu1 %v9765_v61  ;;  %v9781_v61 = vld [vmem:[%s12632_s9 + $0x260] ss:$8 sps:$4 sm:$0xff]  }
 0x46b   : > { %5553 = vmatmul.mubr.bf16.gmra.mrb[16].mxu1 %v11749_v37 }
 0x46c   : > { %5562 = vmatprep.mubr.bf16.mxu1 %v12024_v52 }
 0x473   : > { %5563 = vmatmul.mubr.bf16.gmra.mrb[20].mxu1 %v11755_v1 }
 0x474   : > { %5572 = vmatprep.mubr.bf16.mxu1 %v12024_v52 }
 0x47b   : > { %5573 = vmatmul.mubr.bf16.gmra.mrb[24].mxu1 %v11759_v25 }
 0x47c   : > { %5582 = vmatprep.mubr.bf16.mxu1 %v12024_v52 }
 0x483   : > { %5583 = vmatmul.mubr.bf16.gmra.mrb[28].mxu1 %v5391_v42 }
 0x484   : > { %5851 = vmatprep.mubr.bf16.mxu1 %v12024_v52 }
 0x48b   : > { %5852 = vmatmul.mubr.bf16.vlgmr.msra.gmra.mrb[32].mxu1 %v11786_v30  ;;  %v9774_v30 = vld [vmem:[%s12632_s9 + $0x234] ss:$8 sps:$4 sm:$0xff]  }
 0x48c   : > { %6097 = vmatpush1.bf16.msra.mxu1 %v9763_v8  ;;  %5861 = vmatprep.mubr.bf16.mxu1 %v12024_v52  ;;  %v5964_v8 = vld [vmem:[#allocation4 + $0x8] sm:$0xf0] }
 0x48d   : > { %6098 = vmatprep.subr.bf16.mxu1 %v9768_v22 }
 0x490   : > { %6099 = vmatpush1.bf16.msra.mxu1 %v9766_v54 }
 0x491   : > { %6100 = vmatprep.subr.bf16.mxu1 %v9771_v35 }
 0x493   : > { %5862 = vmatmul.mubr.bf16.gmra.mrb[36].mxu1 %v11675_v58  ;;  %v9780_v58 = vld [vmem:[%s12632_s9 + $0x254] ss:$8 sps:$4 sm:$0xff]  }
 0x494   : > { %5871 = vmatprep.mubr.bf16.mxu1 %v12024_v52  ;;  %6101 = vmatpush1.bf16.msra.mxu1 %v9769_v60 }
 0x495   : > { %6102 = vmatprep.subr.bf16.mxu1 %v9774_v30  ;;  %v9787_v30 = vld [vmem:[%s12632_s9 + $0x280] ss:$8 sps:$4 sm:$0xff]  }
 0x498   : > { %6103 = vmatpush1.bf16.msra.mxu1 %v9772_v53 }
 0x499   : > { %6104 = vmatprep.subr.bf16.mxu1 %v9777_v28  ;;  %v9790_v28 = vld [vmem:[%s12632_s9 + $0x290] ss:$8 sps:$4 sm:$0xff]  }
 0x49b   : > { %5872 = vmatmul.mubr.bf16.gmra.mrb[40].mxu1 %v11681_v50  ;;  %v9786_v50 = vld [vmem:[%s12632_s9 + $0x274] ss:$8 sps:$4 sm:$0xff]  }
 0x49c   : > { %5881 = vmatprep.mubr.bf16.mxu1 %v12024_v52  ;;  %6105 = vmatpush1.bf16.msra.mxu1 %v9775_v36 }
 0x49d   : > { %6106 = vmatprep.subr.bf16.mxu1 %v9780_v58  ;;  %v9795_v58 = vld [vmem:[%s12632_s9 + $0x2a4] ss:$8 sps:$4 sm:$0xff]  }
 0x4a0   : > { %6107 = vmatpush1.bf16.msra.mxu1 %v9778_v9 }
 0x4a1   : > { %6108 = vmatprep.subr.bf16.mxu1 %v9783_v24 }
 0x4a3   : > { %5882 = vmatmul.mubr.bf16.gmra.mrb[44].mxu1 %v11694_v23 }
 0x4a4   : > { %5891 = vmatprep.mubr.bf16.mxu1 %v12024_v52  ;;  %6109 = vmatpush1.bf16.msra.mxu1 %v9781_v61  ;;  %v9793_v61 = vld [vmem:[%s12632_s9 + $0x2a0] ss:$8 sps:$4 sm:$0xff]  }
 0x4a5   : > { %6110 = vmatprep.subr.bf16.mxu1 %v9786_v50  ;;  %v9798_v50 = vld [vmem:[%s12632_s9 + $0x2b4] ss:$8 sps:$4 sm:$0xff]  }
 0x4a8   : > { %6111 = vmatpush1.bf16.msra.mxu1 %v9784_v63  ;;  %v9796_v63 = vld [vmem:[%s12632_s9 + $0x2b0] ss:$8 sps:$4 sm:$0xff]  }
 0x4a9   : > { %6392 = vmatprep.subr.bf16.mxu1 %v9789_v7  ;;  %v9801_v7 = vld [vmem:[%s12632_s9 + $0x2c4] ss:$8 sps:$4 sm:$0xff]  }
 0x4ab   : > { %5892 = vmatmul.mubr.bf16.gmra.mrb[16].mxu1 %v11704_v41 }
 0x4ac   : > { %5901 = vmatprep.mubr.bf16.mxu1 %v12024_v52 }
 0x4b3   : > { %5902 = vmatmul.mubr.bf16.gmra.mrb[20].mxu1 %v11710_v34 }
 0x4b4   : > { %5911 = vmatprep.mubr.bf16.mxu1 %v12024_v52 }
 0x4b5   : > { %v12116_v23 = vpop.f32.mrb[32].mxu0 }
 0x4b6   : > { %v12118_v3 = vpop.f32.mrb[33].mxu0 }
 0x4b7   : > { %v12120_v55 = vpop.f32.mrb[34].mxu0 }
 0x4b8   : > { %v12122_v18 = vpop.f32.mrb[35].mxu0 }
 0x4bb   : > { %5912 = vmatmul.mubr.bf16.gmra.mrb[24].mxu1 %v11793_v31  ;;  %v5991_v31 = vrot.slane %v5964_v8, 4 }
 0x4bc   : > { %5921 = vmatprep.mubr.bf16.mxu1 %v12024_v52 }
 0x4bd   : > { %v12126_v59 = vpop.f32.mrb[36].mxu0  ;;  %v5993_v53 = vsel %vm2069_vm7, %v5991_v31, %v11549_v0  ;;  %v9799_v31 = vld [vmem:[%s12632_s9 + $0x2c0] ss:$8 sps:$4 sm:$0xff]  }
 0x4be   : > { %v12128_v41 = vpop.f32.mrb[37].mxu0 }
 0x4bf   : > { %v12130_v42 = vpop.f32.mrb[38].mxu0 }
 0x4c0   : > { %v12132_v34 = vpop.f32.mrb[39].mxu0 }
 0x4c3   : > { %5922 = vmatmul.mubr.bf16.gmra.mrb[28].mxu1 %v11799_v29  ;;  %v9792_v29 = vld [vmem:[%s12632_s9 + $0x294] ss:$8 sps:$4 sm:$0xff]  }
 0x4c4   : > { %6128 = vmatprep.mubr.bf16.mxu1 %v12024_v52 }
 0x4c5   : > { %v12136_v22 = vpop.f32.mrb[40].mxu0 }
 0x4c6   : > { %v12138_v54 = vpop.f32.mrb[41].mxu0 }
 0x4c7   : > { %v12140_v35 = vpop.f32.mrb[42].mxu0 }
 0x4c8   : > { %v12142_v60 = vpop.f32.mrb[43].mxu0 }
 0x4cb   : > { %6129 = vmatmul.mubr.bf16.vlgmr.msra.gmra.mrb[32].mxu1 %v5993_v53  ;;  %v9805_v53 = vld [vmem:[%s12632_s9 + $0x2e0] ss:$8 sps:$4 sm:$0xff]  }
 0x4cc   : > { %6393 = vmatpush1.bf16.msra.mxu1 %v9787_v30  ;;  %6138 = vmatprep.mubr.bf16.mxu1 %v12024_v52  ;;  %v9802_v30 = vld [vmem:[%s12632_s9 + $0x2d0] ss:$8 sps:$4 sm:$0xff]  }
 0x4cd   : > { %v12156_v36 = vpop.f32.mrb[44].mxu0  ;;  %6394 = vmatprep.subr.bf16.mxu1 %v9792_v29  ;;  %v9807_v29 = vld [vmem:[%s12632_s9 + $0x2e4] ss:$8 sps:$4 sm:$0xff]  }
 0x4ce   : > { %v12161_v9 = vpop.f32.mrb[45].mxu0 }
 0x4cf   : > { %v12163_v24 = vpop.f32.mrb[46].mxu0 }
 0x4d0   : > { %v12165_v0 = vpop.f32.mrb[47].mxu0  ;;  %6395 = vmatpush1.bf16.msra.mxu1 %v9790_v28  ;;  %v9808_v28 = vld [vmem:[%s12632_s9 + $0x2f0] ss:$8 sps:$4 sm:$0xff]  }
 0x4d1   : > { %6396 = vmatprep.subr.bf16.mxu1 %v9795_v58  ;;  %v9813_v58 = vld [vmem:[%s12632_s9 + $0x304] ss:$8 sps:$4 sm:$0xff]  }
 0x4d3   : > { %6139 = vmatmul.mubr.bf16.gmra.mrb[36].mxu1 %v11600_v20  ;;  %v9804_v20 = vld [vmem:[%s12632_s9 + $0x2d4] ss:$8 sps:$4 sm:$0xff]  }
 0x4d4   : > { %6148 = vmatprep.mubr.bf16.mxu1 %v12024_v52  ;;  %6397 = vmatpush1.bf16.msra.mxu1 %v9793_v61  ;;  %v6263_v61 = vshll.u32 %v5964_v8, 16 }
 0x4d5   : > { %6398 = vmatprep.subr.bf16.mxu1 %v9798_v50 }
 0x4d8   : > { %6399 = vmatpush1.bf16.msra.mxu1 %v9796_v63  ;;  %v6265_v63 = vrot.slane %v6263_v61, 5 }
 0x4d9   : > { %6400 = vmatprep.subr.bf16.mxu1 %v9801_v7 }
 0x4db   : > { %6149 = vmatmul.mubr.bf16.gmra.mrb[40].mxu1 %v11609_v44  ;;  %v9810_v44 = vld [vmem:[%s12632_s9 + $0x2f4] ss:$8 sps:$4 sm:$0xff]  }
 0x4dc   : > { %6158 = vmatprep.mubr.bf16.mxu1 %v12024_v52  ;;  %6401 = vmatpush1.bf16.msra.mxu1 %v9799_v31  ;;  %v9817_v31 = vld [vmem:[%s12632_s9 + $0x320] ss:$8 sps:$4 sm:$0xff]  }
 0x4dd   : > { %6402 = vmatprep.subr.bf16.mxu1 %v9804_v20  ;;  %v9820_v20 = vld [vmem:[%s12632_s9 + $0x330] ss:$8 sps:$4 sm:$0xff]  }
 0x4e0   : > { %6403 = vmatpush1.bf16.msra.mxu1 %v9802_v30  ;;  %v9825_v30 = vld [vmem:[%s12632_s9 + $0x344] ss:$8 sps:$4 sm:$0xff]  }
 0x4e1   : > { %6404 = vmatprep.subr.bf16.mxu1 %v9807_v29  ;;  %v9823_v29 = vld [vmem:[%s12632_s9 + $0x340] ss:$8 sps:$4 sm:$0xff]  }
 0x4e3   : > { %6159 = vmatmul.mubr.bf16.gmra.mrb[44].mxu1 %v11622_v62  ;;  %v6260_v62 = vshrl.u32 %v5964_v8, 16  ;;  %v9819_v8 = vld [vmem:[%s12632_s9 + $0x324] ss:$8 sps:$4 sm:$0xff]  }
 0x4e4   : > { %6168 = vmatprep.mubr.bf16.mxu1 %v12024_v52  ;;  %6405 = vmatpush1.bf16.msra.mxu1 %v9805_v53  ;;  %v9826_v53 = vld [vmem:[%s12632_s9 + $0x350] ss:$8 sps:$4 sm:$0xff]  }
 0x4e5   : > { %6406 = vmatprep.subr.bf16.mxu1 %v9810_v44  ;;  %v6262_v50 = vrot.slane %v6260_v62, 4  ;;  %v9831_v44 = vld [vmem:[%s12632_s9 + $0x364] ss:$8 sps:$4 sm:$0xff]  }
 0x4e6   : > { %v9837_v62 = vld [vmem:[%s12632_s9 + $0x384] ss:$8 sps:$4 sm:$0xff]  }
 0x4e7   : > { %v6266_v7 = vor.u32 %v6265_v63, %v6262_v50 }
 0x4e8   : > { %6407 = vmatpush1.bf16.msra.mxu1 %v9808_v28  ;;  %v9829_v28 = vld [vmem:[%s12632_s9 + $0x360] ss:$8 sps:$4 sm:$0xff]  }
 0x4e9   : > { %6731 = vmatprep.subr.bf16.mxu1 %v9813_v58  ;;  %v9832_v58 = vld [vmem:[%s12632_s9 + $0x370] ss:$8 sps:$4 sm:$0xff]  }
 0x4eb   : > { %6169 = vmatmul.mubr.bf16.gmra.mrb[16].mxu1 %v11628_v56  ;;  %v9811_v56 = vld [vmem:[%s12632_s9 + $0x300] ss:$8 sps:$4 sm:$0xff]  }
 0x4ec   : > { %6178 = vmatprep.mubr.bf16.mxu1 %v12024_v52 }
 0x4f3   : > { %6179 = vmatmul.mubr.bf16.gmra.mrb[20].mxu1 %v11671_v14  ;;  %v9816_v14 = vld [vmem:[%s12632_s9 + $0x314] ss:$8 sps:$4 sm:$0xff]  }
 0x4f4   : > { %6188 = vmatprep.mubr.bf16.mxu1 %v12024_v52 }
 0x4fb   : > { %6189 = vmatmul.mubr.bf16.gmra.mrb[24].mxu1 %v11778_v40  ;;  %v6270_v40 = vsel %vm2456_vm6, %v6266_v7, %v11706_v27  ;;  %v9822_v27 = vld [vmem:[%s12632_s9 + $0x334] ss:$8 sps:$4 sm:$0xff]  }
 0x4fc   : > { %6198 = vmatprep.mubr.bf16.mxu1 %v12024_v52 }
 0x503   : > { %6199 = vmatmul.mubr.bf16.gmra.mrb[28].mxu1 %v11796_v26  ;;  %v9814_v26 = vld [vmem:[%s12632_s9 + $0x310] ss:$8 sps:$4 sm:$0xff]  }
 0x504   : > { %6424 = vmatprep.mubr.bf16.mxu1 %v12024_v52 }
 0x50b   : > { %6425 = vmatmul.mubr.bf16.vlgmr.msra.gmra.mrb[32].mxu1 %v6270_v40 }
 0x50c   : > { %6732 = vmatpush1.bf16.msra.mxu1 %v9811_v56  ;;  %6434 = vmatprep.mubr.bf16.mxu1 %v12024_v52  ;;  %v6537_v56 = vld [vmem:[#allocation4 + $0x10] sm:$0xf8] }
 0x50d   : > { %6733 = vmatprep.subr.bf16.mxu1 %v9816_v14  ;;  %v6564_v40 = vshrl.u32 %v6537_v56, 16 }
 0x510   : > { %6734 = vmatpush1.bf16.msra.mxu1 %v9814_v26  ;;  %v6567_v26 = vshll.u32 %v6537_v56, 16 }
 0x511   : > { %6735 = vmatprep.subr.bf16.mxu1 %v9819_v8 }
 0x513   : > { %6435 = vmatmul.mubr.bf16.gmra.mrb[36].mxu1 %v11733_v38  ;;  %v9828_v38 = vld [vmem:[%s12632_s9 + $0x354] ss:$8 sps:$4 sm:$0xff]  }
 0x514   : > { %6444 = vmatprep.mubr.bf16.mxu1 %v12024_v52  ;;  %6736 = vmatpush1.bf16.msra.mxu1 %v9817_v31  ;;  %v12758_v31 = vshll.u32 %v11825_v10, 16 }
 0x515   : > { %6737 = vmatprep.subr.bf16.mxu1 %v9822_v27 }
 0x516   : > { %v6577_v27 = vrot.slane %v12758_v31, 4 }
 0x518   : > { %6738 = vmatpush1.bf16.msra.mxu1 %v9820_v20  ;;  %v6566_v20 = vrot.slane %v6564_v40, 3 }
 0x519   : > { %6739 = vmatprep.subr.bf16.mxu1 %v9825_v30 }
 0x51b   : > { %6445 = vmatmul.mubr.bf16.gmra.mrb[40].mxu1 %v11736_v6  ;;  %v9834_v6 = vld [vmem:[%s12632_s9 + $0x374] ss:$8 sps:$4 sm:$0xff]  }
 0x51c   : > { %6454 = vmatprep.mubr.bf16.mxu1 %v12024_v52  ;;  %6740 = vmatpush1.bf16.msra.mxu1 %v9823_v29  ;;  %v9835_v29 = vld [vmem:[%s12632_s9 + $0x380] ss:$8 sps:$4 sm:$0xff]  }
 0x51d   : > { %6741 = vmatprep.subr.bf16.mxu1 %v9828_v38 }
 0x520   : > { %6742 = vmatpush1.bf16.msra.mxu1 %v9826_v53 }
 0x521   : > { %6743 = vmatprep.subr.bf16.mxu1 %v9831_v44  ;;  %v12759_v44 = vshrl.u32 %v11832_v39, 16 }
 0x523   : > { %6455 = vmatmul.mubr.bf16.gmra.mrb[44].mxu1 %v11749_v37  ;;  %v6241_v37 = vld [vmem:[#allocation4 + $0x48] sm:$0x1f] }
 0x524   : > { %6464 = vmatprep.mubr.bf16.mxu1 %v12024_v52  ;;  %6744 = vmatpush1.bf16.msra.mxu1 %v9829_v28  ;;  %v6296_v61 = vshrl.u32 %v6241_v37, 16  ;;  %v6299_v50 = vshll.u32 %v6241_v37, 16  ;;  %v6583_v28 = vrot.slane %v12759_v44, 3  ;;  %v9843_v37 = vld [vmem:[%s12632_s9 + $0x3a4] ss:$8 sps:$4 sm:$0xff]  }
 0x525   : > { %6745 = vmatprep.subr.bf16.mxu1 %v9834_v6  ;;  %v12760_v6 = vshll.u32 %v11832_v39, 16  ;;  %v9841_v39 = vld [vmem:[%s12632_s9 + $0x3a0] ss:$8 sps:$4 sm:$0xff]  }
 0x526   : > { %v6298_v63 = vrot.slane %v6296_v61, 4  ;;  %v6301_v7 = vrot.slane %v6299_v50, 5  ;;  %v9846_v50 = vld [vmem:[%s12632_s9 + $0x3b4] ss:$8 sps:$4 sm:$0xff]  }
 0x528   : > { %6746 = vmatpush1.bf16.msra.mxu1 %v9832_v58  ;;  %v6302_v14 = vor.u32 %v6301_v7, %v6298_v63  ;;  %v6586_v58 = vrot.slane %v12760_v6, 4  ;;  %v12761_v7 = vshrl.u32 %v11836_v19, 16 }
 0x529   : > { %7008 = vmatprep.subr.bf16.mxu1 %v9837_v62  ;;  %v9838_v62 = vld [vmem:[%s12632_s9 + $0x390] ss:$8 sps:$4 sm:$0xff]  }
 0x52a   : > { %v6587_v61 = vor.u32 %v6586_v58, %v6583_v28  ;;  %v6592_v56 = vrot.slane %v12761_v7, 3  ;;  %v12765_v28 = vshrl.u32 %v11843_v12, 16  ;;  %v12766_v58 = vshll.u32 %v11843_v12, 16 }
 0x52b   : > { %6465 = vmatmul.mubr.bf16.gmra.mrb[16].mxu1 %v11755_v1  ;;  %v6303_v1 = vsel %vm2456_vm6, %v11801_v5, %v6302_v14  ;;  %v9840_v5 = vld [vmem:[%s12632_s9 + $0x394] ss:$8 sps:$4 sm:$0xff]   ;;  %v12762_v14 = vshll.u32 %v11836_v19, 16  ;;  %v9847_v19 = vld [vmem:[%s12632_s9 + $0x3c0] ss:$8 sps:$4 sm:$0xff]   ;;  %v12767_v12 = vshrl.u32 %v11851_v33, 16 }
 0x52c   : > { %6474 = vmatprep.mubr.bf16.mxu1 %v12024_v52  ;;  %v6610_v6 = vrot.slane %v12765_v28, 3  ;;  %v12768_v7 = vshll.u32 %v11851_v33, 16  ;;  %v6638_v33 = vshll.u32 %v11827_v48, 16  ;;  %v9867_v28 = vld [vmem:[%s12632_s9 + $0x424] ss:$8 sps:$4 sm:$0xff]  }
 0x52d   : > { %v6595_v40 = vrot.slane %v12762_v14, 4 }
 0x533   : > { %6475 = vmatmul.mubr.bf16.gmra.mrb[20].mxu1 %v11759_v25  ;;  %v12757_v25 = vshrl.u32 %v11825_v10, 16 }
 0x534   : > { %6484 = vmatprep.mubr.bf16.mxu1 %v12024_v52 }
 0x535   : > { %v6574_v8 = vrot.slane %v12757_v25, 3  ;;  %v6596_v25 = vor.u32 %v6595_v40, %v6592_v56  ;;  %v6622_v56 = vrot.slane %v12768_v7, 4 }
 0x537   : > { %v6578_v30 = vor.u32 %v6577_v27, %v6574_v8  ;;  %v9852_v8 = vld [vmem:[%s12632_s9 + $0x3d4] ss:$8 sps:$4 sm:$0xff]   ;;  %v6597_v31 = vsel %vm5047_vm8, %v6587_v61, %v6596_v25  ;;  %v12763_v27 = vshrl.u32 %v11838_v11, 16 }
 0x539   : > { %v6588_v63 = vsel %vm5047_vm8, %v6578_v30, %v6587_v61  ;;  %v9861_v61 = vld [vmem:[%s12632_s9 + $0x404] ss:$8 sps:$4 sm:$0xff]  }
 0x53b   : > { %6485 = vmatmul.mubr.bf16.gmra.mrb[24].mxu1 %v11812_v49  ;;  %v6569_v49 = vrot.slane %v6567_v26, 4  ;;  %v9844_v26 = vld [vmem:[%s12632_s9 + $0x3b0] ss:$8 sps:$4 sm:$0xff]  }
 0x53c   : > { %6494 = vmatprep.mubr.bf16.mxu1 %v12024_v52 }
 0x53d   : > { %v6570_v38 = vor.u32 %v6569_v49, %v6566_v20  ;;  %v6601_v20 = vrot.slane %v12763_v27, 3  ;;  %v12764_v49 = vshll.u32 %v11838_v11, 16  ;;  %v9853_v11 = vld [vmem:[%s12632_s9 + $0x3e0] ss:$8 sps:$4 sm:$0xff]  }
 0x53f   : > { %v6579_v53 = vsel %vm5047_vm8, %v6570_v38, %v6578_v30  ;;  %v6604_v30 = vrot.slane %v12764_v49, 4  ;;  %v9855_v38 = vld [vmem:[%s12632_s9 + $0x3e4] ss:$8 sps:$4 sm:$0xff]   ;;  %v6640_v49 = vrot.slane %v6638_v33, 4 }
 0x543   : > { %6495 = vmatmul.mubr.bf16.gmra.mrb[28].mxu1 %v6303_v1  ;;  %v9849_v1 = vld [vmem:[%s12632_s9 + $0x3c4] ss:$8 sps:$4 sm:$0xff]  }
 0x544   : > { %6763 = vmatprep.mubr.bf16.mxu1 %v12024_v52 }
 0x54b   : > { %6764 = vmatmul.mubr.bf16.vlgmr.msra.gmra.mrb[32].mxu1 %v6579_v53  ;;  %v9858_v53 = vld [vmem:[%s12632_s9 + $0x3f4] ss:$8 sps:$4 sm:$0xff]  }
 0x54c   : > { %7009 = vmatpush1.bf16.msra.mxu1 %v9835_v29  ;;  %6773 = vmatprep.mubr.bf16.mxu1 %v12024_v52  ;;  %v9850_v29 = vld [vmem:[%s12632_s9 + $0x3d0] ss:$8 sps:$4 sm:$0xff]  }
 0x54d   : > { %7010 = vmatprep.subr.bf16.mxu1 %v9840_v5  ;;  %v6605_v5 = vor.u32 %v6604_v30, %v6601_v20 }
 0x54f   : > { %v6606_v44 = vsel %vm5047_vm8, %v6596_v25, %v6605_v5  ;;  %v12770_v25 = vshll.u32 %v11853_v47, 16 }
 0x550   : > { %7011 = vmatpush1.bf16.msra.mxu1 %v9838_v62  ;;  %v6613_v62 = vrot.slane %v12766_v58, 4  ;;  %v9868_v58 = vld [vmem:[%s12632_s9 + $0x430] ss:$8 sps:$4 sm:$0xff]  }
 0x551   : > { %7012 = vmatprep.subr.bf16.mxu1 %v9843_v37  ;;  %v9856_v37 = vld [vmem:[%s12632_s9 + $0x3f0] ss:$8 sps:$4 sm:$0xff]  }
 0x553   : > { %6774 = vmatmul.mubr.bf16.gmra.mrb[36].mxu1 %v6588_v63  ;;  %v6619_v63 = vrot.slane %v12767_v12, 3  ;;  %v9880_v12 = vld [vmem:[%s12632_s9 + $0x470] ss:$8 sps:$4 sm:$0xff]  }
 0x554   : > { %6783 = vmatprep.mubr.bf16.mxu1 %v12024_v52  ;;  %7013 = vmatpush1.bf16.msra.mxu1 %v9841_v39  ;;  %v6614_v39 = vor.u32 %v6613_v62, %v6610_v6  ;;  %v9870_v6 = vld [vmem:[%s12632_s9 + $0x434] ss:$8 sps:$4 sm:$0xff]   ;;  %v9873_v62 = vld [vmem:[%s12632_s9 + $0x444] ss:$8 sps:$4 sm:$0xff]  }
 0x555   : > { %7014 = vmatprep.subr.bf16.mxu1 %v9846_v50  ;;  %v6623_v14 = vor.u32 %v6622_v56, %v6619_v63  ;;  %v12772_v63 = vld [vmem:[#allocation7_spill] sm:$0xff]  ;;  %v12773_v56 = vld [vmem:[#allocation8_spill] sm:$0xff] }
 0x556   : > { %v6615_v50 = vsel %vm5047_vm8, %v6605_v5, %v6614_v39  ;;  %v9864_v5 = vld [vmem:[%s12632_s9 + $0x414] ss:$8 sps:$4 sm:$0xff]  }
 0x557   : > { %v6624_v40 = vsel %vm5047_vm8, %v6614_v39, %v6623_v14  ;;  %v9879_v39 = vld [vmem:[%s12632_s9 + $0x464] ss:$8 sps:$4 sm:$0xff]  }
 0x558   : > { %7015 = vmatpush1.bf16.msra.mxu1 %v9844_v26  ;;  %v12769_v26 = vshrl.u32 %v11853_v47, 16  ;;  %v6876_v47 = vld [vmem:[#allocation4 + $0x10] sm:$0xf0] }
 0x559   : > { %7016 = vmatprep.subr.bf16.mxu1 %v9849_v1  ;;  %v7175_v7 = vshll.u32 %v6876_v47, 16 }
 0x55a   : > { %v6628_v1 = vrot.slane %v12769_v26, 3 }
 0x55b   : > { %6784 = vmatmul.mubr.bf16.gmra.mrb[40].mxu1 %v6597_v31 }
 0x55c   : > { %6793 = vmatprep.mubr.bf16.mxu1 %v12024_v52  ;;  %7017 = vmatpush1.bf16.msra.mxu1 %v9847_v19  ;;  %v6631_v19 = vrot.slane %v12770_v25, 4 }
 0x55d   : > { %7018 = vmatprep.subr.bf16.mxu1 %v9852_v8  ;;  %v6635_v8 = vshrl.u32 %v11827_v48, 16  ;;  %v6903_v48 = vrot.slane %v6876_v47, 4 }
 0x55e   : > { %v6632_v31 = vor.u32 %v6631_v19, %v6628_v1 }
 0x55f   : > { %v6637_v20 = vrot.slane %v6635_v8, 3  ;;  %v7449_v8 = vld [vmem:[%s12633_s10] sm:$0x3] }
 0x560   : > { %7019 = vmatpush1.bf16.msra.mxu1 %v9850_v29  ;;  %v6633_v27 = vsel %vm5047_vm8, %v6623_v14, %v6632_v31 }
 0x561   : > { %7020 = vmatprep.subr.bf16.mxu1 %v9855_v38  ;;  %v6641_v30 = vor.u32 %v6640_v49, %v6637_v20  ;;  %v9859_v38 = vld [vmem:[%s12632_s9 + $0x400] ss:$8 sps:$4 sm:$0xff]  }
 0x563   : > { %6794 = vmatmul.mubr.bf16.gmra.mrb[44].mxu1 %v6606_v44  ;;  %v6642_v29 = vsel %vm5047_vm8, %v6632_v31, %v6641_v30  ;;  %v9862_v44 = vld [vmem:[%s12632_s9 + $0x410] ss:$8 sps:$4 sm:$0xff]  }
 0x564   : > { %6803 = vmatprep.mubr.bf16.mxu1 %v12024_v52  ;;  %7021 = vmatpush1.bf16.msra.mxu1 %v9853_v11  ;;  %v12771_v11 = vrot.slane %v11825_v10, 4  ;;  %v9865_v10 = vld [vmem:[%s12632_s9 + $0x420] ss:$8 sps:$4 sm:$0xff]  }
 0x565   : > { %7022 = vmatprep.subr.bf16.mxu1 %v9858_v53 }
 0x566   : > { %v6905_v53 = vsel %vm2069_vm7, %v6903_v48, %v12771_v11 }
 0x568   : > { %7023 = vmatpush1.bf16.msra.mxu1 %v9856_v37  ;;  %v9871_v37 = vld [vmem:[%s12632_s9 + $0x440] ss:$8 sps:$4 sm:$0xff]  }
 0x569   : > { %7304 = vmatprep.subr.bf16.mxu1 %v9861_v61  ;;  %v9874_v61 = vld [vmem:[%s12632_s9 + $0x450] ss:$8 sps:$4 sm:$0xff]  }
 0x56b   : > { %6804 = vmatmul.mubr.bf16.gmra.mrb[16].mxu1 %v6615_v50  ;;  %v9877_v50 = vld [vmem:[%s12632_s9 + $0x460] ss:$8 sps:$4 sm:$0xff]  }
 0x56c   : > { %6813 = vmatprep.mubr.bf16.mxu1 %v12024_v52 }
 0x573   : > { %6814 = vmatmul.mubr.bf16.gmra.mrb[20].mxu1 %v6624_v40  ;;  %v7177_v40 = vrot.slane %v7175_v7, 5 }
 0x574   : > { %6823 = vmatprep.mubr.bf16.mxu1 %v12024_v52 }
 0x57b   : > { %6824 = vmatmul.mubr.bf16.gmra.mrb[24].mxu1 %v6633_v27 }
 0x57c   : > { %6833 = vmatprep.mubr.bf16.mxu1 %v12024_v52 }
 0x583   : > { %6834 = vmatmul.mubr.bf16.gmra.mrb[28].mxu1 %v6642_v29 }
 0x584   : > { %7040 = vmatprep.mubr.bf16.mxu1 %v12024_v52 }
 0x58b   : > { %7041 = vmatmul.mubr.bf16.vlgmr.msra.gmra.mrb[32].mxu1 %v6905_v53 }
 0x58c   : > { %7305 = vmatpush1.bf16.msra.mxu1 %v9859_v38  ;;  %7050 = vmatprep.mubr.bf16.mxu1 %v12024_v52 }
 0x58d   : > { %7306 = vmatprep.subr.bf16.mxu1 %v9864_v5 }
 0x590   : > { %7307 = vmatpush1.bf16.msra.mxu1 %v9862_v44 }
 0x591   : > { %7308 = vmatprep.subr.bf16.mxu1 %v9867_v28 }
 0x593   : > { %7051 = vmatmul.mubr.bf16.gmra.mrb[36].mxu1 %v11868_v4  ;;  %v9876_v4 = vld [vmem:[%s12632_s9 + $0x454] ss:$8 sps:$4 sm:$0xff]  }
 0x594   : > { %7060 = vmatprep.mubr.bf16.mxu1 %v12024_v52  ;;  %7309 = vmatpush1.bf16.msra.mxu1 %v9865_v10 }
 0x595   : > { %7310 = vmatprep.subr.bf16.mxu1 %v9870_v6 }
 0x598   : > { %7311 = vmatpush1.bf16.msra.mxu1 %v9868_v58 }
 0x599   : > { %7312 = vmatprep.subr.bf16.mxu1 %v9873_v62 }
 0x59b   : > { %7061 = vmatmul.mubr.bf16.gmra.mrb[40].mxu1 %v11872_v16  ;;  %v9882_v16 = vld [vmem:[%s12632_s9 + $0x474] ss:$8 sps:$4 sm:$0xff]  }
 0x59c   : > { %7070 = vmatprep.mubr.bf16.mxu1 %v12024_v52  ;;  %7313 = vmatpush1.bf16.msra.mxu1 %v9871_v37  ;;  %v7592_v37 = vld [vmem:[%s12634_s11 + $0x18] sm:$0xff] }
 0x59d   : > { %7314 = vmatprep.subr.bf16.mxu1 %v9876_v4 }
 0x5a0   : > { %7315 = vmatpush1.bf16.msra.mxu1 %v9874_v61 }
 0x5a1   : > { %7316 = vmatprep.subr.bf16.mxu1 %v9879_v39 }
 0x5a3   : > { %7071 = vmatmul.mubr.bf16.gmra.mrb[44].mxu1 %v11875_v15  ;;  %v7172_v15 = vshrl.u32 %v6876_v47, 16 }
 0x5a4   : > { %7080 = vmatprep.mubr.bf16.mxu1 %v12024_v52  ;;  %7317 = vmatpush1.bf16.msra.mxu1 %v9877_v50 }
 0x5a5   : > { %7318 = vmatprep.subr.bf16.mxu1 %v9882_v16  ;;  %v7174_v14 = vrot.slane %v7172_v15, 4 }
 0x5a7   : > { %v7178_v26 = vor.u32 %v7177_v40, %v7174_v14 }
 0x5a8   : > { %7319 = vmatpush1.bf16.msra.mxu1 %v9880_v12 }
 0x5ab   : > { %7081 = vmatmul.mubr.bf16.gmra.mrb[16].mxu1 %v11886_v57  ;;  %v7182_v57 = vsel %vm2456_vm6, %v7178_v26, %v11921_v21  ;;  %v7153_v21 = vld [vmem:[#allocation4 + $0x50] sm:$0x1f] }
 0x5ac   : > { %7090 = vmatprep.mubr.bf16.mxu1 %v12024_v52 }
 0x5b3   : > { %7091 = vmatmul.mubr.bf16.gmra.mrb[20].mxu1 %v11893_v46  ;;  %v7208_v46 = vshrl.u32 %v7153_v21, 16 }
 0x5b4   : > { %7100 = vmatprep.mubr.bf16.mxu1 %v12024_v52 }
 0x5b5   : > { %v7210_v1 = vrot.slane %v7208_v46, 4 }
 0x5bb   : > { %7101 = vmatmul.mubr.bf16.gmra.mrb[24].mxu1 %v12772_v63 }
 0x5bc   : > { %7110 = vmatprep.mubr.bf16.mxu1 %v12024_v52 }
 0x5c3   : > { %7111 = vmatmul.mubr.bf16.gmra.mrb[28].mxu1 %v12773_v56 }
 0x5c4   : > { %7336 = vmatprep.mubr.bf16.mxu1 %v12024_v52 }
 0x5cb   : > { %7337 = vmatmul.mubr.bf16.vlgmr.msra.gmra.mrb[32].mxu1 %v7182_v57 }
 0x5cc   : > { %7346 = vmatprep.mubr.bf16.mxu1 %v12024_v52 }
 0x5d3   : > { %7347 = vmatmul.mubr.bf16.gmra.mrb[36].mxu1 %v11940_v32  ;;  %v7211_v32 = vshll.u32 %v7153_v21, 16 }
 0x5d4   : > { %7356 = vmatprep.mubr.bf16.mxu1 %v12024_v52 }
 0x5d5   : > { %v7213_v25 = vrot.slane %v7211_v32, 5 }
 0x5db   : > { %7357 = vmatmul.mubr.bf16.gmra.mrb[40].mxu1 %v11943_v51  ;;  %v7214_v51 = vor.u32 %v7213_v25, %v7210_v1  ;;  %v7594_v25 = vld [vmem:[%s12634_s11 + $0x28] sm:$0xff] }
 0x5dc   : > { %7366 = vmatprep.mubr.bf16.mxu1 %v12024_v52 }
 0x5e3   : > { %7367 = vmatmul.mubr.bf16.gmra.mrb[44].mxu1 %v11951_v17  ;;  %v7215_v17 = vsel %vm2456_vm6, %v11964_v43, %v7214_v51 }
 0x5e4   : > { %7376 = vmatprep.mubr.bf16.mxu1 %v12024_v52 }
 0x5eb   : > { %7377 = vmatmul.mubr.bf16.gmra.mrb[16].mxu1 %v11959_v13  ;;  %v7451_v13 = vlaneseq }
 0x5ec   : > { %7386 = vmatprep.mubr.bf16.mxu1 %v12024_v52 }
 0x5ed   : > { %v12457_v19 = vshrl.u32 %v7451_v13, 7 }
 0x5ef   : > { %v7457_v33 = vsub.s32 1, %v12457_v19 }
 0x5f1   : > { %v12468_v31 = vrot.slane %v7449_v8, %v7457_v33 }
 0x5f3   : > { %7387 = vmatmul.mubr.bf16.gmra.mrb[20].mxu1 %v11962_v2  ;;  %v7453_v2 = vsub.s32 0, %v12457_v19 }
 0x5f4   : > { %7396 = vmatprep.mubr.bf16.mxu1 %v12024_v52 }
 0x5fb   : > { %7397 = vmatmul.mubr.bf16.gmra.mrb[24].mxu1 %v11973_v45  ;;  %v12466_v45 = vrot.slane %v7449_v8, %v7453_v2 }
 0x5fc   : > { %7406 = vmatprep.mubr.bf16.mxu1 %v12024_v52 }
 0x603   : > { %7407 = vmatmul.mubr.bf16.gmra.mrb[28].mxu1 %v7215_v17  ;;  %v7595_v17 = vld [vmem:[%s12634_s11 + $0x30] sm:$0xff] }
 0x69e   : > { %v7338_v52 = vpop.f32.mrb[32].mxu1 }
 0x69f   : > { %v9078_v43 = vadd.f32 %v7338_v52, %v12116_v23  ;;  %v7340_v27 = vpop.f32.mrb[33].mxu1  ;;  %v7589_v23 = vld [vmem:[%s12634_s11] sm:$0xff] }
 0x6a0   : > { %v9079_v20 = vadd.f32 %v7340_v27, %v12118_v3  ;;  %v7342_v49 = vpop.f32.mrb[34].mxu1 }
 0x6a1   : > { %v7461_v30 = vadd.f32 %v9078_v43, %v12466_v45  ;;  %v9080_v29 = vadd.f32 %v7342_v49, %v12120_v55  ;;  %v7344_v47 = vpop.f32.mrb[35].mxu1  ;;  %v7590_v55 = vld [vmem:[%s12634_s11 + $0x8] sm:$0xff]  ;;  %v7596_v43 = vld [vmem:[%s12634_s11 + $0x38] sm:$0xff] }
 0x6a2   : > { %v7462_v38 = vadd.f32 %v9079_v20, %v12468_v31  ;;  %v9081_v48 = vadd.f32 %v7344_v47, %v12122_v18  ;;  %v7591_v18 = vld [vmem:[%s12634_s11 + $0x10] sm:$0xff] }
 0x6a3   : > { %v7525_v5 = vmul.f32 0.2, %v7461_v30  ;;  %v7463_v11 = vadd.f32 %v9080_v29, %v12466_v45  ;;  %vm7493_vm6 = vcmp.gt.f32.partialorder %v7461_v30, 0.0 }
 0x6a4   : > { %v7526_v53 = vmul.f32 0.2, %v7462_v38  ;;  %v7464_v3 = vadd.f32 %v9081_v48, %v12468_v31  ;;  %vm7494_vm7 = vcmp.gt.f32.partialorder %v7462_v38, 0.0 }
 0x6a5   : > { %v7527_v44 = vmul.f32 0.2, %v7463_v11  ;;  %v7557_v28 = vsel %vm7493_vm6, %v7461_v30, %v7525_v5  ;;  %vm7495_vm5 = vcmp.gt.f32.partialorder %v7463_v11, 0.0 }
 0x6a6   : > { %v7528_v10 = vmul.f32 0.2, %v7464_v3  ;;  %v7348_v6 = vpop.f32.mrb[36].mxu1  ;;  %v7558_v58 = vsel %vm7494_vm7, %v7462_v38, %v7526_v53  ;;  %v7621_v62 = vmul.f32 %v7589_v23, %v7557_v28  ;;  %vm7496_vm13 = vcmp.gt.f32.partialorder %v7464_v3, 0.0 }
 0x6a7   : > { %v9082_v4 = vadd.f32 %v7348_v6, %v12126_v59  ;;  %v7350_v61 = vpop.f32.mrb[37].mxu1  ;;  %v7622_v39 = vmul.f32 %v7590_v55, %v7558_v58  ;;  %v7559_v50 = vsel %vm7495_vm5, %v7463_v11, %v7527_v44  ;;  %v7598_v6 = vld [vmem:[%s12634_s11 + $0x48] sm:$0xff] }
 0x6a8   : > { %v9083_v16 = vadd.f32 %v7350_v61, %v12128_v41  ;;  %v7352_v12 = vpop.f32.mrb[38].mxu1  ;;  %v7560_v63 = vsel %vm7496_vm13, %v7464_v3, %v7528_v10  ;;  %v7623_v15 = vmul.f32 %v7591_v18, %v7559_v50  ;;  %v7593_v41 = vld [vmem:[%s12634_s11 + $0x20] sm:$0xff]  ;;  %v7600_v50 = vld [vmem:[%s12634_s11 + $0x58] sm:$0xff] }
 0x6a9   : > { %v7465_v7 = vadd.f32 %v9082_v4, %v12466_v45  ;;  %v9084_v56 = vadd.f32 %v7352_v12, %v12130_v42  ;;  %v7354_v14 = vpop.f32.mrb[39].mxu1  ;;  %v7653_v40 = vadd.f32 %v7622_v39, %v7621_v62  ;;  %v7624_v26 = vmul.f32 %v7592_v37, %v7560_v63  ;;  %v7599_v62 = vld [vmem:[%s12634_s11 + $0x50] sm:$0xff] }
 0x6aa   : > { %v7466_v57 = vadd.f32 %v9083_v16, %v12468_v31  ;;  %v9085_v21 = vadd.f32 %v7354_v14, %v12132_v34 }
 0x6ab   : > { %v7529_v59 = vmul.f32 0.2, %v7465_v7  ;;  %v7467_v46 = vadd.f32 %v9084_v56, %v12466_v45  ;;  %7654 = vadd.xlane.f32.xlu0 %v7653_v40  ;;  %v7656_v32 = vadd.f32 %v7624_v26, %v7623_v15  ;;  %vm7497_vm11 = vcmp.gt.f32.partialorder %v7465_v7, 0.0 }
 0x6ac   : > { %v7530_v1 = vmul.f32 0.2, %v7466_v57  ;;  %v7468_v42 = vadd.f32 %v9085_v21, %v12468_v31  ;;  %vm7498_vm0 = vcmp.gt.f32.partialorder %v7466_v57, 0.0 }
 0x6ad   : > { %v7531_v51 = vmul.f32 0.2, %v7467_v46  ;;  %7657 = vadd.xlane.f32.xlu1 %v7656_v32  ;;  %v7561_v34 = vsel %vm7497_vm11, %v7465_v7, %v7529_v59  ;;  %vm7499_vm14 = vcmp.gt.f32.partialorder %v7467_v46, 0.0 }
 0x6ae   : > { %v7532_v13 = vmul.f32 0.2, %v7468_v42  ;;  %v7358_v8 = vpop.f32.mrb[40].mxu1  ;;  %v7562_v33 = vsel %vm7498_vm0, %v7466_v57, %v7530_v1  ;;  %v7625_v52 = vmul.f32 %v7593_v41, %v7561_v34  ;;  %vm7500_vm4 = vcmp.gt.f32.partialorder %v7468_v42, 0.0 }
 0x6af   : > { %v9086_v27 = vadd.f32 %v7358_v8, %v12136_v22  ;;  %v7360_v20 = vpop.f32.mrb[41].mxu1  ;;  %v7626_v49 = vmul.f32 %v7594_v25, %v7562_v33  ;;  %v7563_v30 = vsel %vm7499_vm14, %v7467_v46, %v7531_v51  ;;  %v7602_v51 = vld [vmem:[%s12634_s11 + $0x68] sm:$0xff] }
 0x6b0   : > { %v9087_v29 = vadd.f32 %v7360_v20, %v12138_v54  ;;  %v7362_v47 = vpop.f32.mrb[42].mxu1  ;;  %v7564_v38 = vsel %vm7500_vm4, %v7468_v42, %v7532_v13  ;;  %v7627_v48 = vmul.f32 %v7595_v17, %v7563_v30  ;;  %v7597_v54 = vld [vmem:[%s12634_s11 + $0x40] sm:$0xff]  ;;  %v7603_v17 = vld [vmem:[%s12634_s11 + $0x70] sm:$0xff]  ;;  %v7604_v30 = vld [vmem:[%s12634_s11 + $0x78] sm:$0xff] }
 0x6b1   : > { %v7469_v5 = vadd.f32 %v9086_v27, %v12466_v45  ;;  %v9088_v11 = vadd.f32 %v7362_v47, %v12140_v35  ;;  %v7364_v23 = vpop.f32.mrb[43].mxu1  ;;  %v7659_v53 = vadd.f32 %v7626_v49, %v7625_v52  ;;  %v7628_v3 = vmul.f32 %v7596_v43, %v7564_v38 }
 0x6b2   : > { %v7470_v55 = vadd.f32 %v9087_v29, %v12468_v31  ;;  %v9089_v44 = vadd.f32 %v7364_v23, %v12142_v60 }
 0x6b3   : > { %v7533_v22 = vmul.f32 0.2, %v7469_v5  ;;  %v7471_v28 = vadd.f32 %v9088_v11, %v12466_v45  ;;  %7660 = vadd.xlane.f32.xlu0 %v7659_v53  ;;  %v7662_v18 = vadd.f32 %v7628_v3, %v7627_v48  ;;  %vm7501_vm12 = vcmp.gt.f32.partialorder %v7469_v5, 0.0 }
 0x6b4   : > { %v7534_v10 = vmul.f32 0.2, %v7470_v55  ;;  %v7472_v35 = vadd.f32 %v9089_v44, %v12468_v31  ;;  %vm7502_vm1 = vcmp.gt.f32.partialorder %v7470_v55, 0.0 }
 0x6b5   : > { %v7535_v58 = vmul.f32 0.2, %v7471_v28  ;;  %v7565_v60 = vsel %vm7501_vm12, %v7469_v5, %v7533_v22  ;;  %vm7503_vm9 = vcmp.gt.f32.partialorder %v7471_v28, 0.0  ;;  %v7605_v22 = vld [vmem:[%s12634_s11 + $0x80] sm:$0xff] }
 0x6b6   : > { %v7536_v37 = vmul.f32 0.2, %v7472_v35  ;;  %v7368_v4 = vpop.f32.mrb[44].mxu1  ;;  %v7566_v61 = vsel %vm7502_vm1, %v7470_v55, %v7534_v10  ;;  %v7629_v39 = vmul.f32 %v7597_v54, %v7565_v60  ;;  %vm7504_vm2 = vcmp.gt.f32.partialorder %v7472_v35, 0.0  ;;  %v7607_v10 = vld [vmem:[%s12634_s11 + $0x90] sm:$0xff]  ;;  %v7608_v60 = vld [vmem:[%s12634_s11 + $0x98] sm:$0xff] }
 0x6b7   : > { %v9090_v16 = vadd.f32 %v7368_v4, %v12156_v36  ;;  %7663 = vadd.xlane.f32.xlu0 %v7662_v18  ;;  %v7370_v12 = vpop.f32.mrb[45].mxu1  ;;  %v7630_v63 = vmul.f32 %v7598_v6, %v7566_v61  ;;  %v7567_v15 = vsel %vm7503_vm9, %v7471_v28, %v7535_v58  ;;  %v7606_v28 = vld [vmem:[%s12634_s11 + $0x88] sm:$0xff] }
 0x6b8   : > { %v9091_v7 = vadd.f32 %v7370_v12, %v12161_v9  ;;  %v7372_v56 = vpop.f32.mrb[46].mxu1  ;;  %v7568_v14 = vsel %vm7504_vm2, %v7472_v35, %v7536_v37  ;;  %v7631_v40 = vmul.f32 %v7599_v62, %v7567_v15  ;;  %v7601_v9 = vld [vmem:[%s12634_s11 + $0x60] sm:$0xff] }
 0x6b9   : > { %v7473_v26 = vadd.f32 %v9090_v16, %v12466_v45  ;;  %v9092_v57 = vadd.f32 %v7372_v56, %v12163_v24  ;;  %v7374_v21 = vpop.f32.mrb[47].mxu1  ;;  %v7665_v59 = vadd.f32 %v7630_v63, %v7629_v39  ;;  %v7632_v46 = vmul.f32 %v7600_v50, %v7568_v14 }
 0x6ba   : > { %v7474_v32 = vadd.f32 %v9091_v7, %v12468_v31  ;;  %v9093_v36 = vadd.f32 %v7374_v21, %v12165_v0  ;;  %v7609_v21 = vld [vmem:[%s12634_s11 + $0xa0] sm:$0xff] }
 0x6bb   : > { %v7537_v41 = vmul.f32 0.2, %v7473_v26  ;;  %v7475_v1 = vadd.f32 %v9092_v57, %v12466_v45  ;;  %7666 = vadd.xlane.f32.xlu1 %v7665_v59  ;;  %v7668_v42 = vadd.f32 %v7632_v46, %v7631_v40  ;;  %vm7505_vm15 = vcmp.gt.f32.partialorder %v7473_v26, 0.0 }
 0x6bc   : > { %v7538_v25 = vmul.f32 0.2, %v7474_v32  ;;  %v7476_v24 = vadd.f32 %v9093_v36, %v12468_v31  ;;  %vm7506_vm3 = vcmp.gt.f32.partialorder %v7474_v32, 0.0 }
 0x6bd   : > { %v7539_v34 = vmul.f32 0.2, %v7475_v1  ;;  %7669 = vadd.xlane.f32.xlu0 %v7668_v42  ;;  %v7569_v0 = vsel %vm7505_vm15, %v7473_v26, %v7537_v41  ;;  %vm7507_vm10 = vcmp.gt.f32.partialorder %v7475_v1, 0.0 }
 0x6be   : > { %v7540_v13 = vmul.f32 0.2, %v7476_v24  ;;  %v7378_v8 = vpop.f32.mrb[16].mxu1  ;;  %v7570_v33 = vsel %vm7506_vm3, %v7474_v32, %v7538_v25  ;;  %v7633_v52 = vmul.f32 %v7601_v9, %v7569_v0  ;;  %vm7508_vm8 = vcmp.gt.f32.partialorder %v7476_v24, 0.0  ;;  %v7610_v32 = vld [vmem:[%s12634_s11 + $0xa8] sm:$0xff] }
 0x6bf   : > { %v7477_v43 = vadd.f32 %v12466_v45, %v7378_v8  ;;  %v7380_v27 = vpop.f32.mrb[17].mxu1  ;;  %v7634_v20 = vmul.f32 %v7602_v51, %v7570_v33  ;;  %v7571_v49 = vsel %vm7507_vm10, %v7475_v1, %v7539_v34  ;;  %v7611_v1 = vld [vmem:[%s12634_s11 + $0xb0] sm:$0xff] }
 0x6c0   : > { %v7478_v29 = vadd.f32 %v12468_v31, %v7380_v27  ;;  %v7382_v47 = vpop.f32.mrb[18].mxu1  ;;  %v7572_v38 = vsel %vm7508_vm8, %v7476_v24, %v7540_v13  ;;  %v7635_v48 = vmul.f32 %v7603_v17, %v7571_v49  ;;  %v7612_v24 = vld [vmem:[%s12634_s11 + $0xb8] sm:$0xff] }
 0x6c1   : > { %vm7509_vm6 = vcmp.gt.f32.partialorder %v7477_v43, 0.0  ;;  %v7541_v5 = vmul.f32 0.2, %v7477_v43  ;;  %v7479_v11 = vadd.f32 %v12466_v45, %v7382_v47  ;;  %v7384_v23 = vpop.f32.mrb[19].mxu1  ;;  %v7671_v53 = vadd.f32 %v7634_v20, %v7633_v52 }
 0x6c2   : > { %vm7510_vm7 = vcmp.gt.f32.partialorder %v7478_v29, 0.0  ;;  %v7542_v3 = vmul.f32 0.2, %v7478_v29  ;;  %v7480_v55 = vadd.f32 %v12468_v31, %v7384_v23  ;;  %v7636_v44 = vmul.f32 %v7604_v30, %v7572_v38  ;;  %v7613_v38 = vld [vmem:[%s12634_s11 + $0xc0] sm:$0xff] }
 0x6c3   : > { %vm7511_vm5 = vcmp.gt.f32.partialorder %v7479_v11, 0.0  ;;  %v7543_v18 = vmul.f32 0.2, %v7479_v11  ;;  %7672 = vadd.xlane.f32.xlu1 %v7671_v53  ;;  %v7573_v54 = vsel %vm7509_vm6, %v7477_v43, %v7541_v5 }
 0x6c4   : > { %vm7512_vm13 = vcmp.gt.f32.partialorder %v7480_v55, 0.0  ;;  %v7544_v35 = vmul.f32 0.2, %v7480_v55  ;;  %v7674_v6 = vadd.f32 %v7636_v44, %v7635_v48  ;;  %v7574_v58 = vsel %vm7510_vm7, %v7478_v29, %v7542_v3  ;;  %v7615_v3 = vld [vmem:[%s12634_s11 + $0xd0] sm:$0xff] }
 0x6c5   : > { %v7637_v62 = vmul.f32 %v7605_v22, %v7573_v54  ;;  %v7638_v37 = vmul.f32 %v7606_v28, %v7574_v58  ;;  %v7575_v4 = vsel %vm7511_vm5, %v7479_v11, %v7543_v18  ;;  %v7614_v11 = vld [vmem:[%s12634_s11 + $0xc8] sm:$0xff]  ;;  %v7616_v28 = vld [vmem:[%s12634_s11 + $0xd8] sm:$0xff] }
 0x6c6   : > { %7675 = vadd.xlane.f32.xlu0 %v7674_v6  ;;  %v7388_v61 = vpop.f32.mrb[20].mxu1  ;;  %v7576_v39 = vsel %vm7512_vm13, %v7480_v55, %v7544_v35  ;;  %v7639_v50 = vmul.f32 %v7607_v10, %v7575_v4 }
 0x6c7   : > { %v7481_v16 = vadd.f32 %v12466_v45, %v7388_v61  ;;  %v7390_v12 = vpop.f32.mrb[21].mxu1  ;;  %v7677_v63 = vadd.f32 %v7638_v37, %v7637_v62  ;;  %v7640_v15 = vmul.f32 %v7608_v60, %v7576_v39 }
 0x6c8   : > { %v7482_v7 = vadd.f32 %v12468_v31, %v7390_v12  ;;  %v7392_v56 = vpop.f32.mrb[22].mxu1 }
 0x6c9   : > { %vm7513_vm11 = vcmp.gt.f32.partialorder %v7481_v16, 0.0  ;;  %v7545_v14 = vmul.f32 0.2, %v7481_v16  ;;  %v7483_v40 = vadd.f32 %v12466_v45, %v7392_v56  ;;  %7678 = vadd.xlane.f32.xlu1 %v7677_v63  ;;  %v7394_v26 = vpop.f32.mrb[23].mxu1  ;;  %v7680_v57 = vadd.f32 %v7640_v15, %v7639_v50  ;;  %v7617_v63 = vld [vmem:[%s12634_s11 + $0xe0] sm:$0xff]  ;;  %v7618_v56 = vld [vmem:[%s12634_s11 + $0xe8] sm:$0xff] }
 0x6ca   : > { %vm7514_vm0 = vcmp.gt.f32.partialorder %v7482_v7, 0.0  ;;  %v7546_v59 = vmul.f32 0.2, %v7482_v7  ;;  %v7484_v46 = vadd.f32 %v12468_v31, %v7394_v26 }
 0x6cb   : > { %vm7515_vm14 = vcmp.gt.f32.partialorder %v7483_v40, 0.0  ;;  %v7547_v36 = vmul.f32 0.2, %v7483_v40  ;;  %7681 = vadd.xlane.f32.xlu0 %v7680_v57  ;;  %v7577_v41 = vsel %vm7513_vm11, %v7481_v16, %v7545_v14 }
 0x6cc   : > { %vm7516_vm4 = vcmp.gt.f32.partialorder %v7484_v46, 0.0  ;;  %v7548_v42 = vmul.f32 0.2, %v7484_v46  ;;  %v7578_v9 = vsel %vm7514_vm0, %v7482_v7, %v7546_v59  ;;  %v7641_v25 = vmul.f32 %v7609_v21, %v7577_v41 }
 0x6cd   : > { %v7642_v51 = vmul.f32 %v7610_v32, %v7578_v9  ;;  %v7579_v34 = vsel %vm7515_vm14, %v7483_v40, %v7547_v36 }
 0x6ce   : > { %v7398_v0 = vpop.f32.mrb[24].mxu1  ;;  %v7580_v17 = vsel %vm7516_vm4, %v7484_v46, %v7548_v42  ;;  %v7643_v13 = vmul.f32 %v7611_v1, %v7579_v34 }
 0x6cf   : > { %v7485_v8 = vadd.f32 %v12466_v45, %v7398_v0  ;;  %v7400_v33 = vpop.f32.mrb[25].mxu1  ;;  %v7683_v52 = vadd.f32 %v7642_v51, %v7641_v25  ;;  %v7644_v43 = vmul.f32 %v7612_v24, %v7580_v17 }
 0x6d0   : > { %v7486_v27 = vadd.f32 %v12468_v31, %v7400_v33  ;;  %v7402_v20 = vpop.f32.mrb[26].mxu1 }
 0x6d1   : > { %vm7517_vm12 = vcmp.gt.f32.partialorder %v7485_v8, 0.0  ;;  %v7549_v49 = vmul.f32 0.2, %v7485_v8  ;;  %v7487_v30 = vadd.f32 %v12466_v45, %v7402_v20  ;;  %7684 = vadd.xlane.f32.xlu1 %v7683_v52  ;;  %v7404_v29 = vpop.f32.mrb[27].mxu1  ;;  %v7686_v47 = vadd.f32 %v7644_v43, %v7643_v13 }
 0x6d2   : > { %vm7518_vm1 = vcmp.gt.f32.partialorder %v7486_v27, 0.0  ;;  %v7550_v48 = vmul.f32 0.2, %v7486_v27  ;;  %v7488_v5 = vadd.f32 %v12468_v31, %v7404_v29 }
 0x6d3   : > { %vm7519_vm9 = vcmp.gt.f32.partialorder %v7487_v30, 0.0  ;;  %v7551_v23 = vmul.f32 0.2, %v7487_v30  ;;  %7687 = vadd.xlane.f32.xlu0 %v7686_v47  ;;  %v7581_v53 = vsel %vm7517_vm12, %v7485_v8, %v7549_v49 }
 0x6d4   : > { %vm7520_vm2 = vcmp.gt.f32.partialorder %v7488_v5, 0.0  ;;  %v7552_v55 = vmul.f32 0.2, %v7488_v5  ;;  %v7582_v44 = vsel %vm7518_vm1, %v7486_v27, %v7550_v48  ;;  %v7645_v22 = vmul.f32 %v7613_v38, %v7581_v53 }
 0x6d5   : > { %v7646_v18 = vmul.f32 %v7614_v11, %v7582_v44  ;;  %v7583_v54 = vsel %vm7519_vm9, %v7487_v30, %v7551_v23 }
 0x6d6   : > { %v7408_v10 = vpop.f32.mrb[28].mxu1  ;;  %v7584_v35 = vsel %vm7520_vm2, %v7488_v5, %v7552_v55  ;;  %v7647_v6 = vmul.f32 %v7615_v3, %v7583_v54 }
 0x6d7   : > { %v7489_v58 = vadd.f32 %v12466_v45, %v7408_v10  ;;  %v7410_v60 = vpop.f32.mrb[29].mxu1  ;;  %v7689_v62 = vadd.f32 %v7646_v18, %v7645_v22  ;;  %v7648_v37 = vmul.f32 %v7616_v28, %v7584_v35 }
 0x6d8   : > { %v7490_v4 = vadd.f32 %v12468_v31, %v7410_v60  ;;  %v7412_v61 = vpop.f32.mrb[30].mxu1 }
 0x6d9   : > { %vm7521_vm15 = vcmp.gt.f32.partialorder %v7489_v58, 0.0  ;;  %v7553_v39 = vmul.f32 0.2, %v7489_v58  ;;  %v7491_v50 = vadd.f32 %v12466_v45, %v7412_v61  ;;  %7690 = vadd.xlane.f32.xlu1 %v7689_v62  ;;  %v7414_v16 = vpop.f32.mrb[31].mxu1  ;;  %v7692_v12 = vadd.f32 %v7648_v37, %v7647_v6  ;;  %v7619_v45 = vld [vmem:[%s12634_s11 + $0xf0] sm:$0xff] }
 0x6da   : > { %vm7522_vm3 = vcmp.gt.f32.partialorder %v7490_v4, 0.0  ;;  %v7554_v15 = vmul.f32 0.2, %v7490_v4  ;;  %v7492_v7 = vadd.f32 %v12468_v31, %v7414_v16  ;;  %v7620_v31 = vld [vmem:[%s12634_s11 + $0xf8] sm:$0xff] }
 0x6db   : > { %vm7523_vm10 = vcmp.gt.f32.partialorder %v7491_v50, 0.0  ;;  %v7555_v14 = vmul.f32 0.2, %v7491_v50  ;;  %7693 = vadd.xlane.f32.xlu0 %v7692_v12  ;;  %v7585_v40 = vsel %vm7521_vm15, %v7489_v58, %v7553_v39  ;;  %v7722_v62 = vld [vmem:[#allocation5] sm:$0x1] }
 0x6dc   : > { %vm7524_vm8 = vcmp.gt.f32.partialorder %v7492_v7, 0.0  ;;  %v7556_v26 = vmul.f32 0.2, %v7492_v7  ;;  %v7586_v57 = vsel %vm7522_vm3, %v7490_v4, %v7554_v15  ;;  %v7649_v21 = vmul.f32 %v7617_v63, %v7585_v40 }
 0x6dd   : > { %v7650_v59 = vmul.f32 %v7618_v56, %v7586_v57  ;;  %v7587_v46 = vsel %vm7523_vm10, %v7491_v50, %v7555_v14 }
 0x6de   : > { %v7588_v32 = vsel %vm7524_vm8, %v7492_v7, %v7556_v26  ;;  %v7651_v36 = vmul.f32 %v7619_v45, %v7587_v46 }
 0x6df   : > { %v7695_v41 = vadd.f32 %v7650_v59, %v7649_v21  ;;  %v7652_v1 = vmul.f32 %v7620_v31, %v7588_v32 }
 0x6e1   : > { %7696 = vadd.xlane.f32.xlu1 %v7695_v41  ;;  %v7698_v42 = vadd.f32 %v7652_v1, %v7651_v36 }
 0x6e3   : > { %7699 = vadd.xlane.f32.xlu0 %v7698_v42 }
 0x738   : > { %v7655_v9 = vpop.xlane.xlu0 %7654 }
 0x73a   : > { %v7658_v24 = vpop.xlane.xlu1 %7657 }
 0x73b   : > { %v7701_v51 = vadd.f32 %v7658_v24, %v7655_v9 }
 0x740   : > { %v7661_v25 = vpop.xlane.xlu0 %7660 }
 0x741   : > { %v7702_v0 = vadd.f32 %v7701_v51, %v7661_v25 }
 0x744   : > { %v7664_v34 = vpop.xlane.xlu0 %7663 }
 0x745   : > { %v7703_v13 = vadd.f32 %v7702_v0, %v7664_v34 }
 0x748   : > { %v7667_v17 = vpop.xlane.xlu1 %7666 }
 0x749   : > { %v7704_v8 = vadd.f32 %v7703_v13, %v7667_v17 }
 0x74a   : > { %v7670_v33 = vpop.xlane.xlu0 %7669 }
 0x74b   : > { %v7705_v43 = vadd.f32 %v7704_v8, %v7670_v33 }
 0x750   : > { %v7673_v52 = vpop.xlane.xlu1 %7672 }
 0x751   : > { %v7706_v27 = vadd.f32 %v7705_v43, %v7673_v52 }
 0x753   : > { %v7676_v20 = vpop.xlane.xlu0 %7675 }
 0x754   : > { %v7707_v30 = vadd.f32 %v7706_v27, %v7676_v20 }
 0x756   : > { %v7679_v49 = vpop.xlane.xlu1 %7678 }
 0x757   : > { %v7708_v29 = vadd.f32 %v7707_v30, %v7679_v49 }
 0x758   : > { %v7682_v47 = vpop.xlane.xlu0 %7681 }
 0x759   : > { %v7709_v48 = vadd.f32 %v7708_v29, %v7682_v47 }
 0x75e   : > { %v7685_v38 = vpop.xlane.xlu1 %7684 }
 0x75f   : > { %v7710_v5 = vadd.f32 %v7709_v48, %v7685_v38 }
 0x760   : > { %v7688_v11 = vpop.xlane.xlu0 %7687 }
 0x761   : > { %v7711_v53 = vadd.f32 %v7710_v5, %v7688_v11 }
 0x766   : > { %v7691_v23 = vpop.xlane.xlu1 %7690 }
 0x767   : > { %v7712_v3 = vadd.f32 %v7711_v53, %v7691_v23 }
 0x768   : > { %v7694_v55 = vpop.xlane.xlu0 %7693 }
 0x769   : > { %v7713_v44 = vadd.f32 %v7712_v3, %v7694_v55 }
 0x76e   : > { %v7697_v22 = vpop.xlane.xlu1 %7696 }
 0x76f   : > { %v7714_v28 = vadd.f32 %v7713_v44, %v7697_v22 }
 0x770   : > { %v7700_v18 = vpop.xlane.xlu0 %7699 }
 0x771   : > { %v7715_v54 = vadd.f32 %v7714_v28, %v7700_v18 }
 0x773   : > { %v7716_v10 = vrot.slane %v7715_v54, 4 }
 0x775   : > { %v7717_v35 = vadd.f32 %v7716_v10, %v7715_v54 }
 0x777   : > { %v7718_v6 = vrot.slane %v7717_v35, 2 }
 0x779   : > { %v7719_v58 = vadd.f32 %v7718_v6, %v7717_v35 }
 0x77b   : > { %v7720_v60 = vrot.slane %v7719_v58, 1 }
 0x77d   : > { %v7721_v37 = vadd.f32 %v7720_v60, %v7719_v58 }
 0x77f   : > { %v7723_v4 = vadd.f32 %v7722_v62, %v7721_v37 }
 0x781   : > { %7726 = vperm.xlu1 %9584, %v7723_v4  }
 0x800   : > { %v7727_v61 = vpop.permute.xlu1 %7726 }
 0x801   : > { %v7732_v39 = vrot.slane %v7727_v61, %v7453_v2 }
 0x803   : > { %7733 = vst [vmem:[%s458_s20] sm:$0x1] %v7732_v39 }
 0x804 PF: > { %s25_s27 = sadd.s32 1, %s9892_s27  }
 0x805   : > { %p22_p4 = scmp.ge.s32.totalorder %s25_s27, 6  }
 0x807   :  { %24 = sbr.rel (!%p22_p4) target bundleno = 3 (0x3), region = 128 }

</bundles_post_ra>
